<compile_context>
chip_gen: v5e
topology: v5e:2x2
jax: 0.10.0
libtpu: 0.0.40
codegen_flags: <defaults>
</compile_context>

<pallas_src>
import functools

import numpy as np
import jax
import jax.numpy as jnp
from jax.experimental import pallas as pl
from jax.experimental.pallas import tpu as pltpu


def _round_up(x, m):
    return ((x + m - 1) // m) * m


def _pad_k(k):
    """Pad the GEMM reduction dim: to 128 when small, to 2048 when streamed."""
    kp = _round_up(k, 128)
    if kp > 4096:
        kp = _round_up(k, 2048)
    return kp


def _pad_n(n):
    """Pad the GEMM output dim: to 128 when small, to 512 when tiled."""
    np_ = _round_up(n, 128)
    if np_ > 512:
        np_ = _round_up(n, 512)
    return np_


# ----------------------------------------------------------------------------
# Pallas kernels
# ----------------------------------------------------------------------------
def _matmul_bias_act_kernel(a_ref, w_ref, b_ref, o_ref, *, activation):
    """Tiled GEMM.  Accumulates directly into the resident f32 output block:
    init with bias at k==0, add partial products each k, ReLU at the last k."""
    k = pl.program_id(2)

    @pl.when(k == 0)
    def _():
        o_ref[...] = jnp.broadcast_to(b_ref[...], o_ref.shape).astype(jnp.float32)

    o_ref[...] += jnp.dot(a_ref[...], w_ref[...],
                          preferred_element_type=jnp.float32)

    if activation == "relu":
        @pl.when(k == pl.num_programs(2) - 1)
        def _():
            o_ref[...] = jnp.maximum(o_ref[...], 0.0)


def linear_pallas(a, w_p, b_p, n_out, activation=None):
    """a: (M, K) activations.  w_p: (Kp, Np) weight pre-padded/pre-transposed at
    init (bf16).  b_p: (1, Np) f32 bias.  Returns (M, n_out) f32."""
    M, K = a.shape
    Kp, Np = w_p.shape

    # Tile selection (k innermost grid axis -- do not reorder).
    if M <= 256:
        tm = _round_up(M, 8)          # single M step for tiny batches
    elif M <= 2048:
        tm = 256
    else:
        tm = 512                      # big im2col GEMMs: amortize per-step overhead
    Mp = _round_up(M, tm)
    tk = Kp if Kp <= 4096 else 2048   # whole-K single step when it fits VMEM
    tn = Np if Np <= 512 else 512

    # Only the (cheap, data-dependent) activation is padded at runtime; cast to
    # the weight dtype (bf16) so the MXU runs at its bf16 rate, f32 accumulate.
    a_p = a.astype(w_p.dtype)
    if (Mp, Kp) != (M, K):
        a_p = jnp.pad(a_p, ((0, Mp - M), (0, Kp - K)))

    grid = (Mp // tm, Np // tn, Kp // tk)
    out = pl.pallas_call(
        functools.partial(_matmul_bias_act_kernel, activation=activation),
        out_shape=jax.ShapeDtypeStruct((Mp, Np), jnp.float32),
        grid_spec=pltpu.PrefetchScalarGridSpec(
            num_scalar_prefetch=0,
            grid=grid,
            in_specs=[
                pl.BlockSpec((tm, tk), lambda i, j, k: (i, k)),
                pl.BlockSpec((tk, tn), lambda i, j, k: (k, j)),
                pl.BlockSpec((1, tn), lambda i, j, k: (0, j)),
            ],
            out_specs=pl.BlockSpec((tm, tn), lambda i, j, k: (i, j)),
        ),
        compiler_params=pltpu.CompilerParams(
            dimension_semantics=("parallel", "parallel", "arbitrary")),
    )(a_p, w_p, b_p)
    return out[:M, :n_out]


def _bmm_xxt_kernel(x_ref, o_ref):
    x = x_ref[0]                                        # (Cp, Kp), f32
    o_ref[0] = jax.lax.dot_general(
        x, x, (((1,), (1,)), ((), ())), preferred_element_type=jnp.float32)


def bmm_xxt_pallas(x):
    """x: (B, C, K) f32 -> (B, C, C) = bmm(x, x^T); one batch element per grid
    step.  C is padded to a lane-dense multiple of 128 for unmasked stores
    (zero padding -> identical numerics), then sliced back."""
    B, C, K = x.shape
    Cp = _round_up(C, 128)
    Kp = _round_up(K, 128)
    xp = jnp.pad(x.astype(jnp.float32), ((0, 0), (0, Cp - C), (0, Kp - K)))
    out = pl.pallas_call(
        _bmm_xxt_kernel,
        out_shape=jax.ShapeDtypeStruct((B, Cp, Cp), jnp.float32),
        grid=(B,),
        in_specs=[pl.BlockSpec((1, Cp, Kp), lambda b: (b, 0, 0))],
        out_specs=pl.BlockSpec((1, Cp, Cp), lambda b: (b, 0, 0)),
        compiler_params=pltpu.CompilerParams(dimension_semantics=("parallel",)),
    )(xp)
    return out[:, :C, :C]


# ----------------------------------------------------------------------------
# Conv / pool glue (NHWC end-to-end; im2col in plain JAX, GEMM in Pallas)
# ----------------------------------------------------------------------------
def _im2col_nhwc(x, kh, kw, stride, pad):
    """NHWC -> (N*OH*OW, kh*kw*C) patches; K axis ordered (dh, dw, c), c fastest."""
    N, H, W, C = x.shape
    xp = jnp.pad(x, ((0, 0), (pad, pad), (pad, pad), (0, 0)))
    OH = (H + 2 * pad - kh) // stride + 1
    OW = (W + 2 * pad - kw) // stride + 1
    cols = []
    for dh in range(kh):
        for dw in range(kw):
            cols.append(xp[:, dh:dh + stride * (OH - 1) + 1:stride,
                           dw:dw + stride * (OW - 1) + 1:stride, :])
    patches = jnp.concatenate(cols, axis=-1)            # (N, OH, OW, kh*kw*C)
    return patches.reshape(N * OH * OW, kh * kw * C), OH, OW


def conv2d_relu_pallas(x_nhwc, layer, cout, k, stride, pad):
    N = x_nhwc.shape[0]
    patches, OH, OW = _im2col_nhwc(x_nhwc, k, k, stride, pad)
    y = linear_pallas(patches, layer["w"], layer["b"], cout, activation="relu")
    return y.reshape(N, OH, OW, cout)                   # already NHWC, no transpose


def maxpool2d_nhwc(x, k=3, s=2):
    # TODO(synk): MaxPool2d kept in plain JAX (lax.reduce_window); not the GEMM hot path.
    return jax.lax.reduce_window(x, -jnp.inf, jax.lax.max,
                                 (1, k, k, 1), (1, s, s, 1), "VALID")


# ----------------------------------------------------------------------------
# Configurations
# ----------------------------------------------------------------------------
# convs: (cout, kernel, stride, pad, maxpool_after)
FULL_CFG = dict(                      # original AlexNet-features + Bilinear_CNN head
    in_ch=3,
    convs=[(64, 11, 4, 2, True), (192, 5, 1, 2, True), (384, 3, 1, 1, False),
           (256, 3, 1, 1, False), (256, 3, 1, 1, True)],
    dense=[6796, 996, 356, 86],
    num_classes=18,
)
SMALL_CFG = dict(                     # structurally identical, small (fast demo)
    in_ch=3,
    convs=[(16, 11, 4, 2, True), (32, 5, 1, 2, True), (48, 3, 1, 1, False),
           (32, 3, 1, 1, False), (32, 3, 1, 1, True)],
    dense=[256, 128, 96, 64],
    num_classes=18,
)


# ----------------------------------------------------------------------------
# Parameters: raw f32 copies (reference only) + pre-padded bf16 GEMM weights
# ----------------------------------------------------------------------------
def init_params(key, cfg, gemm_dtype=jnp.bfloat16):
    n_layers = len(cfg["convs"]) + len(cfg["dense"]) + 1
    keys = iter(jax.random.split(key, 2 * n_layers))
    p = {}

    cin = cfg["in_ch"]
    for idx, (cout, k, s, pad, pool) in enumerate(cfg["convs"], start=1):
        fan_in = cin * k * k
        w = jax.random.normal(next(keys), (cout, cin, k, k), jnp.float32) / np.sqrt(fan_in)
        b = 0.01 * jax.random.normal(next(keys), (cout,), jnp.float32)
        # (Cout, Cin, kh, kw) -> (kh, kw, Cin, Cout) -> (K, N): matches NHWC im2col.
        wmat = jnp.transpose(w, (2, 3, 1, 0)).reshape(k * k * cin, cout)
        Kp, Np = _pad_k(k * k * cin), _pad_n(cout)
        p[f"c{idx}"] = dict(
            w=jnp.pad(wmat, ((0, Kp - wmat.shape[0]), (0, Np - cout))).astype(gemm_dtype),
            b=jnp.pad(b, (0, Np - cout)).reshape(1, Np),
            w_raw=w, b_raw=b)                            # raw copies: reference check only
        cin = cout

    din = cin * cin                                      # bilinear feature dim C*C
    names = [f"fc{i + 1}" for i in range(len(cfg["dense"]))] + ["clf"]
    dims = list(cfg["dense"]) + [cfg["num_classes"]]
    for name, dout in zip(names, dims):
        w = jax.random.normal(next(keys), (din, dout), jnp.float32) / np.sqrt(din)
        b = 0.01 * jax.random.normal(next(keys), (dout,), jnp.float32)
        Kp, Np = _pad_k(din), _pad_n(dout)
        p[name] = dict(
            w=jnp.pad(w, ((0, Kp - din), (0, Np - dout))).astype(gemm_dtype),
            b=jnp.pad(b, (0, Np - dout)).reshape(1, Np),
            w_raw=w, b_raw=b)
        din = dout
    return p


# ----------------------------------------------------------------------------
# Forward pass (matches Bilinear_CNN.forward)
# ----------------------------------------------------------------------------
def bilinear_cnn_forward(params, x_nchw, cfg):
    x = jnp.transpose(x_nchw, (0, 2, 3, 1))             # NHWC end-to-end
    for idx, (cout, k, s, pad, pool) in enumerate(cfg["convs"], start=1):
        x = conv2d_relu_pallas(x, params[f"c{idx}"], cout, k, s, pad)
        if pool:
            x = maxpool2d_nhwc(x)

    N, H, W, C = x.shape
    # x.view(B, C, H*W) in PyTorch is channel-major -> one small transpose back.
    x = jnp.transpose(x, (0, 3, 1, 2)).reshape(N, C, H * W)
    x = bmm_xxt_pallas(x)                                # torch.bmm(x, x^T)
    x = x.reshape(N, C * C)

    # self.dense (Dropout == identity in eval mode); tail layers are single-grid-step
    # Pallas calls since their weights are pre-padded (launch cost only).
    for i, dout in enumerate(cfg["dense"], start=1):
        lyr = params[f"fc{i}"]
        x = linear_pallas(x, lyr["w"], lyr["b"], dout, activation="relu")
    # self.clf
    lyr = params["clf"]
    return linear_pallas(x, lyr["w"], lyr["b"], cfg["num_classes"], activation=None)


# ----------------------------------------------------------------------------
# Pure-JAX reference (same bf16-in / f32-accumulate math, no Pallas)
# ----------------------------------------------------------------------------
def reference_forward(params, x, cfg):
    def conv(x, layer, s, pad):
        y = jax.lax.conv_general_dilated(
            x.astype(jnp.bfloat16), layer["w_raw"].astype(jnp.bfloat16),
            (s, s), ((pad, pad), (pad, pad)),
            dimension_numbers=("NCHW", "OIHW", "NCHW"),
            preferred_element_type=jnp.float32)
        return jax.nn.relu(y + layer["b_raw"][None, :, None, None])

    def pool(x):
        return jax.lax.reduce_window(x, -jnp.inf, jax.lax.max,
                                     (1, 1, 3, 3), (1, 1, 2, 2), "VALID")

    for idx, (cout, k, s, pad, do_pool) in enumerate(cfg["convs"], start=1):
        x = conv(x, params[f"c{idx}"], s, pad)
        if do_pool:
            x = pool(x)

    B, C, H, W = x.shape
    x = x.reshape(B, C, H * W)
    x = jnp.matmul(x, jnp.transpose(x, (0, 2, 1)))
    x = x.reshape(B, C * C)

    def dense(a, layer, relu):
        y = jnp.dot(a.astype(jnp.bfloat16), layer["w_raw"].astype(jnp.bfloat16),
                    preferred_element_type=jnp.float32) + layer["b_raw"]
        return jax.nn.relu(y) if relu else y

    for i in range(1, len(cfg["dense"]) + 1):
        x = dense(x, params[f"fc{i}"], True)
    return dense(x, params["clf"], False)


if __name__ == "__main__":
    cfg = SMALL_CFG                                      # small shapes -> fast demo run
    key = jax.random.PRNGKey(0)
    pkey, xkey = jax.random.split(key)
    params = init_params(pkey, cfg)

    # 96x96 input -> conv stack ends at a 2x2x32 feature map -> bilinear 32x32.
    x = jax.random.normal(xkey, (2, 3, 96, 96), jnp.float32)

    fwd = jax.jit(functools.partial(bilinear_cnn_forward, cfg=cfg))
    out = jax.block_until_ready(fwd(params, x))
    assert out.shape == (2, cfg["num_classes"]), out.shape

    ref = jax.block_until_ready(reference_forward(params, x, cfg))
    out_np = np.asarray(out, np.float32)
    ref_np = np.asarray(ref, np.float32)
    assert np.all(np.isfinite(out_np))
    rel_err = np.abs(out_np - ref_np).max() / (np.abs(ref_np).max() + 1e-6)
    assert rel_err < 1e-2, f"mismatch vs reference: rel_err={rel_err}"

    print("KERNEL_OK")
</pallas_src>

<mosaic_0001>
module attributes {stable_mosaic.version = 11 : i64} {
  func.func @_matmul_bias_act_kernel(%arg0: i32, %arg1: i32, %arg2: i32, %arg3: memref<256x384xbf16, #tpu.memory_space<vmem>>, %arg4: memref<384x128xbf16, #tpu.memory_space<vmem>>, %arg5: memref<1x128xf32, #tpu.memory_space<vmem>>, %arg6: memref<256x128xf32, #tpu.memory_space<vmem>>) attributes {dimension_semantics = [#tpu.dimension_semantics<parallel>, #tpu.dimension_semantics<parallel>, #tpu.dimension_semantics<arbitrary>], iteration_bounds = array<i64: 5, 1, 1>, scalar_prefetch = 0 : i64, scratch_operands = 0 : i64, tpu.core_type = #tpu.core_type<tc>, window_params = [{transform_indices = @transform_0, window_bounds = array<i64: 256, 384>}, {transform_indices = @transform_1, window_bounds = array<i64: 384, 128>}, {transform_indices = @transform_2, window_bounds = array<i64: 1, 128>}, {transform_indices = @transform_3, window_bounds = array<i64: 256, 128>}]} {
    %c0_i32 = arith.constant 0 : i32
    %0 = arith.cmpi eq, %arg2, %c0_i32 : i32
    %1 = arith.extui %0 : i1 to i32
    %c0_i32_0 = arith.constant 0 : i32
    %2 = arith.cmpi ne, %1, %c0_i32_0 : i32
    scf.if %2 {
      %c0_10 = arith.constant 0 : index
      %c0_11 = arith.constant 0 : index
      %12 = vector.load %arg5[%c0_10, %c0_11] : memref<1x128xf32, #tpu.memory_space<vmem>>, vector<1x128xf32>
      %13 = vector.shape_cast %12 : vector<1x128xf32> to vector<1x128xf32>
      %14 = vector.broadcast %13 : vector<1x128xf32> to vector<256x128xf32>
      %c0_12 = arith.constant 0 : index
      %c0_13 = arith.constant 0 : index
      %15 = vector.load %arg6[%c0_12, %c0_13] : memref<256x128xf32, #tpu.memory_space<vmem>>, vector<256x128xf32>
      tpu.vector_store %arg6[%c0_12, %c0_13], %14 {strides = array<i32>} : memref<256x128xf32, #tpu.memory_space<vmem>>, vector<256x128xf32>,
    } else {
    }
    %c0 = arith.constant 0 : index
    %c0_1 = arith.constant 0 : index
    %3 = vector.load %arg6[%c0, %c0_1] : memref<256x128xf32, #tpu.memory_space<vmem>>, vector<256x128xf32>
    %c0_2 = arith.constant 0 : index
    %c0_3 = arith.constant 0 : index
    %4 = vector.load %arg3[%c0_2, %c0_3] : memref<256x384xbf16, #tpu.memory_space<vmem>>, vector<256x384xbf16>
    %c0_4 = arith.constant 0 : index
    %c0_5 = arith.constant 0 : index
    %5 = vector.load %arg4[%c0_4, %c0_5] : memref<384x128xbf16, #tpu.memory_space<vmem>>, vector<384x128xbf16>
    %cst = arith.constant dense<0.000000e+00> : vector<256x128xf32>
    %6 = tpu.matmul %4, %5, %cst {dimension_numbers = #tpu.dot_dimension_numbers<[1], [0], [0], [1], [0, 0, 1, 1], [], []>} : vector<256x384xbf16>, vector<384x128xbf16>, vector<256x128xf32> -> vector<256x128xf32>
    %7 = arith.addf %3, %6 : vector<256x128xf32>
    %c0_6 = arith.constant 0 : index
    %c0_7 = arith.constant 0 : index
    %8 = vector.load %arg6[%c0_6, %c0_7] : memref<256x128xf32, #tpu.memory_space<vmem>>, vector<256x128xf32>
    tpu.vector_store %arg6[%c0_6, %c0_7], %7 {strides = array<i32>} : memref<256x128xf32, #tpu.memory_space<vmem>>, vector<256x128xf32>,
    %c0_i32_8 = arith.constant 0 : i32
    %9 = arith.cmpi eq, %arg2, %c0_i32_8 : i32
    %10 = arith.extui %9 : i1 to i32
    %c0_i32_9 = arith.constant 0 : i32
    %11 = arith.cmpi ne, %10, %c0_i32_9 : i32
    scf.if %11 {
      %c0_10 = arith.constant 0 : index
      %c0_11 = arith.constant 0 : index
      %12 = vector.load %arg6[%c0_10, %c0_11] : memref<256x128xf32, #tpu.memory_space<vmem>>, vector<256x128xf32>
      %cst_12 = arith.constant 0.000000e+00 : f32
      %13 = vector.broadcast %cst_12 : f32 to vector<256x128xf32>
      %14 = arith.maximumf %12, %13 : vector<256x128xf32>
      %c0_13 = arith.constant 0 : index
      %c0_14 = arith.constant 0 : index
      %15 = vector.load %arg6[%c0_13, %c0_14] : memref<256x128xf32, #tpu.memory_space<vmem>>, vector<256x128xf32>
      tpu.vector_store %arg6[%c0_13, %c0_14], %14 {strides = array<i32>} : memref<256x128xf32, #tpu.memory_space<vmem>>, vector<256x128xf32>,
    } else {
    }
    return
  }
  func.func @transform_0(%arg0: i32, %arg1: i32, %arg2: i32) -> (i32, i32) {
    %c0_i32 = arith.constant 0 : i32
    return %arg0, %arg2 : i32, i32
  }
  func.func @transform_1(%arg0: i32, %arg1: i32, %arg2: i32) -> (i32, i32) {
    %c0_i32 = arith.constant 0 : i32
    return %arg2, %arg1 : i32, i32
  }
  func.func @transform_2(%arg0: i32, %arg1: i32, %arg2: i32) -> (i32, i32) {
    %c0_i32 = arith.constant 0 : i32
    %c0_i32_0 = arith.constant 0 : i32
    return %c0_i32, %arg1 : i32, i32
  }
  func.func @transform_3(%arg0: i32, %arg1: i32, %arg2: i32) -> (i32, i32) {
    %c0_i32 = arith.constant 0 : i32
    return %arg0, %arg1 : i32, i32
  }
}

module attributes {stable_mosaic.version = 11 : i64} {
  func.func @_matmul_bias_act_kernel(%arg0: i32, %arg1: i32, %arg2: i32, %arg3: memref<248x512xbf16, #tpu.memory_space<vmem>>, %arg4: memref<512x128xbf16, #tpu.memory_space<vmem>>, %arg5: memref<1x128xf32, #tpu.memory_space<vmem>>, %arg6: memref<248x128xf32, #tpu.memory_space<vmem>>) attributes {dimension_semantics = [#tpu.dimension_semantics<parallel>, #tpu.dimension_semantics<parallel>, #tpu.dimension_semantics<arbitrary>], iteration_bounds = array<i64: 1, 1, 1>, scalar_prefetch = 0 : i64, scratch_operands = 0 : i64, tpu.core_type = #tpu.core_type<tc>, window_params = [{transform_indices = @transform_0, window_bounds = array<i64: 248, 512>}, {transform_indices = @transform_1, window_bounds = array<i64: 512, 128>}, {transform_indices = @transform_2, window_bounds = array<i64: 1, 128>}, {transform_indices = @transform_3, window_bounds = array<i64: 248, 128>}]} {
    %c0_i32 = arith.constant 0 : i32
    %0 = arith.cmpi eq, %arg2, %c0_i32 : i32
    %1 = arith.extui %0 : i1 to i32
    %c0_i32_0 = arith.constant 0 : i32
    %2 = arith.cmpi ne, %1, %c0_i32_0 : i32
    scf.if %2 {
      %c0_10 = arith.constant 0 : index
      %c0_11 = arith.constant 0 : index
      %12 = vector.load %arg5[%c0_10, %c0_11] : memref<1x128xf32, #tpu.memory_space<vmem>>, vector<1x128xf32>
      %13 = vector.shape_cast %12 : vector<1x128xf32> to vector<1x128xf32>
      %14 = vector.broadcast %13 : vector<1x128xf32> to vector<248x128xf32>
      %c0_12 = arith.constant 0 : index
      %c0_13 = arith.constant 0 : index
      %15 = vector.load %arg6[%c0_12, %c0_13] : memref<248x128xf32, #tpu.memory_space<vmem>>, vector<248x128xf32>
      tpu.vector_store %arg6[%c0_12, %c0_13], %14 {strides = array<i32>} : memref<248x128xf32, #tpu.memory_space<vmem>>, vector<248x128xf32>,
    } else {
    }
    %c0 = arith.constant 0 : index
    %c0_1 = arith.constant 0 : index
    %3 = vector.load %arg6[%c0, %c0_1] : memref<248x128xf32, #tpu.memory_space<vmem>>, vector<248x128xf32>
    %c0_2 = arith.constant 0 : index
    %c0_3 = arith.constant 0 : index
    %4 = vector.load %arg3[%c0_2, %c0_3] : memref<248x512xbf16, #tpu.memory_space<vmem>>, vector<248x512xbf16>
    %c0_4 = arith.constant 0 : index
    %c0_5 = arith.constant 0 : index
    %5 = vector.load %arg4[%c0_4, %c0_5] : memref<512x128xbf16, #tpu.memory_space<vmem>>, vector<512x128xbf16>
    %cst = arith.constant dense<0.000000e+00> : vector<248x128xf32>
    %6 = tpu.matmul %4, %5, %cst {dimension_numbers = #tpu.dot_dimension_numbers<[1], [0], [0], [1], [0, 0, 1, 1], [], []>} : vector<248x512xbf16>, vector<512x128xbf16>, vector<248x128xf32> -> vector<248x128xf32>
    %7 = arith.addf %3, %6 : vector<248x128xf32>
    %c0_6 = arith.constant 0 : index
    %c0_7 = arith.constant 0 : index
    %8 = vector.load %arg6[%c0_6, %c0_7] : memref<248x128xf32, #tpu.memory_space<vmem>>, vector<248x128xf32>
    tpu.vector_store %arg6[%c0_6, %c0_7], %7 {strides = array<i32>} : memref<248x128xf32, #tpu.memory_space<vmem>>, vector<248x128xf32>,
    %c0_i32_8 = arith.constant 0 : i32
    %9 = arith.cmpi eq, %arg2, %c0_i32_8 : i32
    %10 = arith.extui %9 : i1 to i32
    %c0_i32_9 = arith.constant 0 : i32
    %11 = arith.cmpi ne, %10, %c0_i32_9 : i32
    scf.if %11 {
      %c0_10 = arith.constant 0 : index
      %c0_11 = arith.constant 0 : index
      %12 = vector.load %arg6[%c0_10, %c0_11] : memref<248x128xf32, #tpu.memory_space<vmem>>, vector<248x128xf32>
      %cst_12 = arith.constant 0.000000e+00 : f32
      %13 = vector.broadcast %cst_12 : f32 to vector<248x128xf32>
      %14 = arith.maximumf %12, %13 : vector<248x128xf32>
      %c0_13 = arith.constant 0 : index
      %c0_14 = arith.constant 0 : index
      %15 = vector.load %arg6[%c0_13, %c0_14] : memref<248x128xf32, #tpu.memory_space<vmem>>, vector<248x128xf32>
      tpu.vector_store %arg6[%c0_13, %c0_14], %14 {strides = array<i32>} : memref<248x128xf32, #tpu.memory_space<vmem>>, vector<248x128xf32>,
    } else {
    }
    return
  }
  func.func @transform_0(%arg0: i32, %arg1: i32, %arg2: i32) -> (i32, i32) {
    %c0_i32 = arith.constant 0 : i32
    return %arg0, %arg2 : i32, i32
  }
  func.func @transform_1(%arg0: i32, %arg1: i32, %arg2: i32) -> (i32, i32) {
    %c0_i32 = arith.constant 0 : i32
    return %arg2, %arg1 : i32, i32
  }
  func.func @transform_2(%arg0: i32, %arg1: i32, %arg2: i32) -> (i32, i32) {
    %c0_i32 = arith.constant 0 : i32
    %c0_i32_0 = arith.constant 0 : i32
    return %c0_i32, %arg1 : i32, i32
  }
  func.func @transform_3(%arg0: i32, %arg1: i32, %arg2: i32) -> (i32, i32) {
    %c0_i32 = arith.constant 0 : i32
    return %arg0, %arg1 : i32, i32
  }
}

module attributes {stable_mosaic.version = 11 : i64} {
  func.func @_matmul_bias_act_kernel(%arg0: i32, %arg1: i32, %arg2: i32, %arg3: memref<56x384xbf16, #tpu.memory_space<vmem>>, %arg4: memref<384x128xbf16, #tpu.memory_space<vmem>>, %arg5: memref<1x128xf32, #tpu.memory_space<vmem>>, %arg6: memref<56x128xf32, #tpu.memory_space<vmem>>) attributes {dimension_semantics = [#tpu.dimension_semantics<parallel>, #tpu.dimension_semantics<parallel>, #tpu.dimension_semantics<arbitrary>], iteration_bounds = array<i64: 1, 1, 1>, scalar_prefetch = 0 : i64, scratch_operands = 0 : i64, tpu.core_type = #tpu.core_type<tc>, window_params = [{transform_indices = @transform_0, window_bounds = array<i64: 56, 384>}, {transform_indices = @transform_1, window_bounds = array<i64: 384, 128>}, {transform_indices = @transform_2, window_bounds = array<i64: 1, 128>}, {transform_indices = @transform_3, window_bounds = array<i64: 56, 128>}]} {
    %c0_i32 = arith.constant 0 : i32
    %0 = arith.cmpi eq, %arg2, %c0_i32 : i32
    %1 = arith.extui %0 : i1 to i32
    %c0_i32_0 = arith.constant 0 : i32
    %2 = arith.cmpi ne, %1, %c0_i32_0 : i32
    scf.if %2 {
      %c0_10 = arith.constant 0 : index
      %c0_11 = arith.constant 0 : index
      %12 = vector.load %arg5[%c0_10, %c0_11] : memref<1x128xf32, #tpu.memory_space<vmem>>, vector<1x128xf32>
      %13 = vector.shape_cast %12 : vector<1x128xf32> to vector<1x128xf32>
      %14 = vector.broadcast %13 : vector<1x128xf32> to vector<56x128xf32>
      %c0_12 = arith.constant 0 : index
      %c0_13 = arith.constant 0 : index
      %15 = vector.load %arg6[%c0_12, %c0_13] : memref<56x128xf32, #tpu.memory_space<vmem>>, vector<56x128xf32>
      tpu.vector_store %arg6[%c0_12, %c0_13], %14 {strides = array<i32>} : memref<56x128xf32, #tpu.memory_space<vmem>>, vector<56x128xf32>,
    } else {
    }
    %c0 = arith.constant 0 : index
    %c0_1 = arith.constant 0 : index
    %3 = vector.load %arg6[%c0, %c0_1] : memref<56x128xf32, #tpu.memory_space<vmem>>, vector<56x128xf32>
    %c0_2 = arith.constant 0 : index
    %c0_3 = arith.constant 0 : index
    %4 = vector.load %arg3[%c0_2, %c0_3] : memref<56x384xbf16, #tpu.memory_space<vmem>>, vector<56x384xbf16>
    %c0_4 = arith.constant 0 : index
    %c0_5 = arith.constant 0 : index
    %5 = vector.load %arg4[%c0_4, %c0_5] : memref<384x128xbf16, #tpu.memory_space<vmem>>, vector<384x128xbf16>
    %cst = arith.constant dense<0.000000e+00> : vector<56x128xf32>
    %6 = tpu.matmul %4, %5, %cst {dimension_numbers = #tpu.dot_dimension_numbers<[1], [0], [0], [1], [0, 0, 1, 1], [], []>} : vector<56x384xbf16>, vector<384x128xbf16>, vector<56x128xf32> -> vector<56x128xf32>
    %7 = arith.addf %3, %6 : vector<56x128xf32>
    %c0_6 = arith.constant 0 : index
    %c0_7 = arith.constant 0 : index
    %8 = vector.load %arg6[%c0_6, %c0_7] : memref<56x128xf32, #tpu.memory_space<vmem>>, vector<56x128xf32>
    tpu.vector_store %arg6[%c0_6, %c0_7], %7 {strides = array<i32>} : memref<56x128xf32, #tpu.memory_space<vmem>>, vector<56x128xf32>,
    %c0_i32_8 = arith.constant 0 : i32
    %9 = arith.cmpi eq, %arg2, %c0_i32_8 : i32
    %10 = arith.extui %9 : i1 to i32
    %c0_i32_9 = arith.constant 0 : i32
    %11 = arith.cmpi ne, %10, %c0_i32_9 : i32
    scf.if %11 {
      %c0_10 = arith.constant 0 : index
      %c0_11 = arith.constant 0 : index
      %12 = vector.load %arg6[%c0_10, %c0_11] : memref<56x128xf32, #tpu.memory_space<vmem>>, vector<56x128xf32>
      %cst_12 = arith.constant 0.000000e+00 : f32
      %13 = vector.broadcast %cst_12 : f32 to vector<56x128xf32>
      %14 = arith.maximumf %12, %13 : vector<56x128xf32>
      %c0_13 = arith.constant 0 : index
      %c0_14 = arith.constant 0 : index
      %15 = vector.load %arg6[%c0_13, %c0_14] : memref<56x128xf32, #tpu.memory_space<vmem>>, vector<56x128xf32>
      tpu.vector_store %arg6[%c0_13, %c0_14], %14 {strides = array<i32>} : memref<56x128xf32, #tpu.memory_space<vmem>>, vector<56x128xf32>,
    } else {
    }
    return
  }
  func.func @transform_0(%arg0: i32, %arg1: i32, %arg2: i32) -> (i32, i32) {
    %c0_i32 = arith.constant 0 : i32
    return %arg0, %arg2 : i32, i32
  }
  func.func @transform_1(%arg0: i32, %arg1: i32, %arg2: i32) -> (i32, i32) {
    %c0_i32 = arith.constant 0 : i32
    return %arg2, %arg1 : i32, i32
  }
  func.func @transform_2(%arg0: i32, %arg1: i32, %arg2: i32) -> (i32, i32) {
    %c0_i32 = arith.constant 0 : i32
    %c0_i32_0 = arith.constant 0 : i32
    return %c0_i32, %arg1 : i32, i32
  }
  func.func @transform_3(%arg0: i32, %arg1: i32, %arg2: i32) -> (i32, i32) {
    %c0_i32 = arith.constant 0 : i32
    return %arg0, %arg1 : i32, i32
  }
}

module attributes {stable_mosaic.version = 11 : i64} {
  func.func @_matmul_bias_act_kernel(%arg0: i32, %arg1: i32, %arg2: i32, %arg3: memref<56x512xbf16, #tpu.memory_space<vmem>>, %arg4: memref<512x128xbf16, #tpu.memory_space<vmem>>, %arg5: memref<1x128xf32, #tpu.memory_space<vmem>>, %arg6: memref<56x128xf32, #tpu.memory_space<vmem>>) attributes {dimension_semantics = [#tpu.dimension_semantics<parallel>, #tpu.dimension_semantics<parallel>, #tpu.dimension_semantics<arbitrary>], iteration_bounds = array<i64: 1, 1, 1>, scalar_prefetch = 0 : i64, scratch_operands = 0 : i64, tpu.core_type = #tpu.core_type<tc>, window_params = [{transform_indices = @transform_0, window_bounds = array<i64: 56, 512>}, {transform_indices = @transform_1, window_bounds = array<i64: 512, 128>}, {transform_indices = @transform_2, window_bounds = array<i64: 1, 128>}, {transform_indices = @transform_3, window_bounds = array<i64: 56, 128>}]} {
    %c0_i32 = arith.constant 0 : i32
    %0 = arith.cmpi eq, %arg2, %c0_i32 : i32
    %1 = arith.extui %0 : i1 to i32
    %c0_i32_0 = arith.constant 0 : i32
    %2 = arith.cmpi ne, %1, %c0_i32_0 : i32
    scf.if %2 {
      %c0_10 = arith.constant 0 : index
      %c0_11 = arith.constant 0 : index
      %12 = vector.load %arg5[%c0_10, %c0_11] : memref<1x128xf32, #tpu.memory_space<vmem>>, vector<1x128xf32>
      %13 = vector.shape_cast %12 : vector<1x128xf32> to vector<1x128xf32>
      %14 = vector.broadcast %13 : vector<1x128xf32> to vector<56x128xf32>
      %c0_12 = arith.constant 0 : index
      %c0_13 = arith.constant 0 : index
      %15 = vector.load %arg6[%c0_12, %c0_13] : memref<56x128xf32, #tpu.memory_space<vmem>>, vector<56x128xf32>
      tpu.vector_store %arg6[%c0_12, %c0_13], %14 {strides = array<i32>} : memref<56x128xf32, #tpu.memory_space<vmem>>, vector<56x128xf32>,
    } else {
    }
    %c0 = arith.constant 0 : index
    %c0_1 = arith.constant 0 : index
    %3 = vector.load %arg6[%c0, %c0_1] : memref<56x128xf32, #tpu.memory_space<vmem>>, vector<56x128xf32>
    %c0_2 = arith.constant 0 : index
    %c0_3 = arith.constant 0 : index
    %4 = vector.load %arg3[%c0_2, %c0_3] : memref<56x512xbf16, #tpu.memory_space<vmem>>, vector<56x512xbf16>
    %c0_4 = arith.constant 0 : index
    %c0_5 = arith.constant 0 : index
    %5 = vector.load %arg4[%c0_4, %c0_5] : memref<512x128xbf16, #tpu.memory_space<vmem>>, vector<512x128xbf16>
    %cst = arith.constant dense<0.000000e+00> : vector<56x128xf32>
    %6 = tpu.matmul %4, %5, %cst {dimension_numbers = #tpu.dot_dimension_numbers<[1], [0], [0], [1], [0, 0, 1, 1], [], []>} : vector<56x512xbf16>, vector<512x128xbf16>, vector<56x128xf32> -> vector<56x128xf32>
    %7 = arith.addf %3, %6 : vector<56x128xf32>
    %c0_6 = arith.constant 0 : index
    %c0_7 = arith.constant 0 : index
    %8 = vector.load %arg6[%c0_6, %c0_7] : memref<56x128xf32, #tpu.memory_space<vmem>>, vector<56x128xf32>
    tpu.vector_store %arg6[%c0_6, %c0_7], %7 {strides = array<i32>} : memref<56x128xf32, #tpu.memory_space<vmem>>, vector<56x128xf32>,
    %c0_i32_8 = arith.constant 0 : i32
    %9 = arith.cmpi eq, %arg2, %c0_i32_8 : i32
    %10 = arith.extui %9 : i1 to i32
    %c0_i32_9 = arith.constant 0 : i32
    %11 = arith.cmpi ne, %10, %c0_i32_9 : i32
    scf.if %11 {
      %c0_10 = arith.constant 0 : index
      %c0_11 = arith.constant 0 : index
      %12 = vector.load %arg6[%c0_10, %c0_11] : memref<56x128xf32, #tpu.memory_space<vmem>>, vector<56x128xf32>
      %cst_12 = arith.constant 0.000000e+00 : f32
      %13 = vector.broadcast %cst_12 : f32 to vector<56x128xf32>
      %14 = arith.maximumf %12, %13 : vector<56x128xf32>
      %c0_13 = arith.constant 0 : index
      %c0_14 = arith.constant 0 : index
      %15 = vector.load %arg6[%c0_13, %c0_14] : memref<56x128xf32, #tpu.memory_space<vmem>>, vector<56x128xf32>
      tpu.vector_store %arg6[%c0_13, %c0_14], %14 {strides = array<i32>} : memref<56x128xf32, #tpu.memory_space<vmem>>, vector<56x128xf32>,
    } else {
    }
    return
  }
  func.func @transform_0(%arg0: i32, %arg1: i32, %arg2: i32) -> (i32, i32) {
    %c0_i32 = arith.constant 0 : i32
    return %arg0, %arg2 : i32, i32
  }
  func.func @transform_1(%arg0: i32, %arg1: i32, %arg2: i32) -> (i32, i32) {
    %c0_i32 = arith.constant 0 : i32
    return %arg2, %arg1 : i32, i32
  }
  func.func @transform_2(%arg0: i32, %arg1: i32, %arg2: i32) -> (i32, i32) {
    %c0_i32 = arith.constant 0 : i32
    %c0_i32_0 = arith.constant 0 : i32
    return %c0_i32, %arg1 : i32, i32
  }
  func.func @transform_3(%arg0: i32, %arg1: i32, %arg2: i32) -> (i32, i32) {
    %c0_i32 = arith.constant 0 : i32
    return %arg0, %arg1 : i32, i32
  }
}

module attributes {stable_mosaic.version = 11 : i64} {
  func.func @_bmm_xxt_kernel(%arg0: i32, %arg1: memref<1x128x128xf32, #tpu.memory_space<vmem>>, %arg2: memref<1x128x128xf32, #tpu.memory_space<vmem>>) attributes {dimension_semantics = [#tpu.dimension_semantics<parallel>], iteration_bounds = array<i64: 2>, scalar_prefetch = 0 : i64, scratch_operands = 0 : i64, tpu.core_type = #tpu.core_type<tc>, window_params = [{transform_indices = @transform_0, window_bounds = array<i64: 1, 128, 128>}, {transform_indices = @transform_1, window_bounds = array<i64: 1, 128, 128>}]} {
    %c0 = arith.constant 0 : index
    %c0_0 = arith.constant 0 : index
    %c0_1 = arith.constant 0 : index
    %0 = vector.load %arg1[%c0, %c0_0, %c0_1] : memref<1x128x128xf32, #tpu.memory_space<vmem>>, vector<1x128x128xf32>
    %1 = vector.shape_cast %0 : vector<1x128x128xf32> to vector<128x128xf32>
    %cst = arith.constant dense<0.000000e+00> : vector<128x128xf32>
    %2 = tpu.matmul %1, %1, %cst {dimension_numbers = #tpu.dot_dimension_numbers<[1], [1], [0], [0], [0, 0, 1, 0], [], []>} : vector<128x128xf32>, vector<128x128xf32>, vector<128x128xf32> -> vector<128x128xf32>
    %c0_2 = arith.constant 0 : index
    %c0_3 = arith.constant 0 : index
    %c0_4 = arith.constant 0 : index
    %3 = vector.load %arg2[%c0_2, %c0_3, %c0_4] : memref<1x128x128xf32, #tpu.memory_space<vmem>>, vector<1x128x128xf32>
    %4 = vector.shape_cast %3 : vector<1x128x128xf32> to vector<128x128xf32>
    %5 = vector.shape_cast %2 : vector<128x128xf32> to vector<1x128x128xf32>
    tpu.vector_store %arg2[%c0_2, %c0_3, %c0_4], %5 {strides = array<i32>} : memref<1x128x128xf32, #tpu.memory_space<vmem>>, vector<1x128x128xf32>,
    return
  }
  func.func @transform_0(%arg0: i32) -> (i32, i32, i32) {
    %c0_i32 = arith.constant 0 : i32
    %c0_i32_0 = arith.constant 0 : i32
    %c0_i32_1 = arith.constant 0 : i32
    return %arg0, %c0_i32, %c0_i32_0 : i32, i32, i32
  }
  func.func @transform_1(%arg0: i32) -> (i32, i32, i32) {
    %c0_i32 = arith.constant 0 : i32
    %c0_i32_0 = arith.constant 0 : i32
    %c0_i32_1 = arith.constant 0 : i32
    return %arg0, %c0_i32, %c0_i32_0 : i32, i32, i32
  }
}

module attributes {stable_mosaic.version = 11 : i64} {
  func.func @_matmul_bias_act_kernel(%arg0: i32, %arg1: i32, %arg2: i32, %arg3: memref<8x1024xbf16, #tpu.memory_space<vmem>>, %arg4: memref<1024x256xbf16, #tpu.memory_space<vmem>>, %arg5: memref<1x256xf32, #tpu.memory_space<vmem>>, %arg6: memref<8x256xf32, #tpu.memory_space<vmem>>) attributes {dimension_semantics = [#tpu.dimension_semantics<parallel>, #tpu.dimension_semantics<parallel>, #tpu.dimension_semantics<arbitrary>], iteration_bounds = array<i64: 1, 1, 1>, scalar_prefetch = 0 : i64, scratch_operands = 0 : i64, tpu.core_type = #tpu.core_type<tc>, window_params = [{transform_indices = @transform_0, window_bounds = array<i64: 8, 1024>}, {transform_indices = @transform_1, window_bounds = array<i64: 1024, 256>}, {transform_indices = @transform_2, window_bounds = array<i64: 1, 256>}, {transform_indices = @transform_3, window_bounds = array<i64: 8, 256>}]} {
    %c0_i32 = arith.constant 0 : i32
    %0 = arith.cmpi eq, %arg2, %c0_i32 : i32
    %1 = arith.extui %0 : i1 to i32
    %c0_i32_0 = arith.constant 0 : i32
    %2 = arith.cmpi ne, %1, %c0_i32_0 : i32
    scf.if %2 {
      %c0_10 = arith.constant 0 : index
      %c0_11 = arith.constant 0 : index
      %12 = vector.load %arg5[%c0_10, %c0_11] : memref<1x256xf32, #tpu.memory_space<vmem>>, vector<1x256xf32>
      %13 = vector.shape_cast %12 : vector<1x256xf32> to vector<1x256xf32>
      %14 = vector.broadcast %13 : vector<1x256xf32> to vector<8x256xf32>
      %c0_12 = arith.constant 0 : index
      %c0_13 = arith.constant 0 : index
      %15 = vector.load %arg6[%c0_12, %c0_13] : memref<8x256xf32, #tpu.memory_space<vmem>>, vector<8x256xf32>
      tpu.vector_store %arg6[%c0_12, %c0_13], %14 {strides = array<i32>} : memref<8x256xf32, #tpu.memory_space<vmem>>, vector<8x256xf32>,
    } else {
    }
    %c0 = arith.constant 0 : index
    %c0_1 = arith.constant 0 : index
    %3 = vector.load %arg6[%c0, %c0_1] : memref<8x256xf32, #tpu.memory_space<vmem>>, vector<8x256xf32>
    %c0_2 = arith.constant 0 : index
    %c0_3 = arith.constant 0 : index
    %4 = vector.load %arg3[%c0_2, %c0_3] : memref<8x1024xbf16, #tpu.memory_space<vmem>>, vector<8x1024xbf16>
    %c0_4 = arith.constant 0 : index
    %c0_5 = arith.constant 0 : index
    %5 = vector.load %arg4[%c0_4, %c0_5] : memref<1024x256xbf16, #tpu.memory_space<vmem>>, vector<1024x256xbf16>
    %cst = arith.constant dense<0.000000e+00> : vector<8x256xf32>
    %6 = tpu.matmul %4, %5, %cst {dimension_numbers = #tpu.dot_dimension_numbers<[1], [0], [0], [1], [0, 0, 1, 1], [], []>} : vector<8x1024xbf16>, vector<1024x256xbf16>, vector<8x256xf32> -> vector<8x256xf32>
    %7 = arith.addf %3, %6 : vector<8x256xf32>
    %c0_6 = arith.constant 0 : index
    %c0_7 = arith.constant 0 : index
    %8 = vector.load %arg6[%c0_6, %c0_7] : memref<8x256xf32, #tpu.memory_space<vmem>>, vector<8x256xf32>
    tpu.vector_store %arg6[%c0_6, %c0_7], %7 {strides = array<i32>} : memref<8x256xf32, #tpu.memory_space<vmem>>, vector<8x256xf32>,
    %c0_i32_8 = arith.constant 0 : i32
    %9 = arith.cmpi eq, %arg2, %c0_i32_8 : i32
    %10 = arith.extui %9 : i1 to i32
    %c0_i32_9 = arith.constant 0 : i32
    %11 = arith.cmpi ne, %10, %c0_i32_9 : i32
    scf.if %11 {
      %c0_10 = arith.constant 0 : index
      %c0_11 = arith.constant 0 : index
      %12 = vector.load %arg6[%c0_10, %c0_11] : memref<8x256xf32, #tpu.memory_space<vmem>>, vector<8x256xf32>
      %cst_12 = arith.constant 0.000000e+00 : f32
      %13 = vector.broadcast %cst_12 : f32 to vector<8x256xf32>
      %14 = arith.maximumf %12, %13 : vector<8x256xf32>
      %c0_13 = arith.constant 0 : index
      %c0_14 = arith.constant 0 : index
      %15 = vector.load %arg6[%c0_13, %c0_14] : memref<8x256xf32, #tpu.memory_space<vmem>>, vector<8x256xf32>
      tpu.vector_store %arg6[%c0_13, %c0_14], %14 {strides = array<i32>} : memref<8x256xf32, #tpu.memory_space<vmem>>, vector<8x256xf32>,
    } else {
    }
    return
  }
  func.func @transform_0(%arg0: i32, %arg1: i32, %arg2: i32) -> (i32, i32) {
    %c0_i32 = arith.constant 0 : i32
    return %arg0, %arg2 : i32, i32
  }
  func.func @transform_1(%arg0: i32, %arg1: i32, %arg2: i32) -> (i32, i32) {
    %c0_i32 = arith.constant 0 : i32
    return %arg2, %arg1 : i32, i32
  }
  func.func @transform_2(%arg0: i32, %arg1: i32, %arg2: i32) -> (i32, i32) {
    %c0_i32 = arith.constant 0 : i32
    %c0_i32_0 = arith.constant 0 : i32
    return %c0_i32, %arg1 : i32, i32
  }
  func.func @transform_3(%arg0: i32, %arg1: i32, %arg2: i32) -> (i32, i32) {
    %c0_i32 = arith.constant 0 : i32
    return %arg0, %arg1 : i32, i32
  }
}

module attributes {stable_mosaic.version = 11 : i64} {
  func.func @_matmul_bias_act_kernel(%arg0: i32, %arg1: i32, %arg2: i32, %arg3: memref<8x256xbf16, #tpu.memory_space<vmem>>, %arg4: memref<256x128xbf16, #tpu.memory_space<vmem>>, %arg5: memref<1x128xf32, #tpu.memory_space<vmem>>, %arg6: memref<8x128xf32, #tpu.memory_space<vmem>>) attributes {dimension_semantics = [#tpu.dimension_semantics<parallel>, #tpu.dimension_semantics<parallel>, #tpu.dimension_semantics<arbitrary>], iteration_bounds = array<i64: 1, 1, 1>, scalar_prefetch = 0 : i64, scratch_operands = 0 : i64, tpu.core_type = #tpu.core_type<tc>, window_params = [{transform_indices = @transform_0, window_bounds = array<i64: 8, 256>}, {transform_indices = @transform_1, window_bounds = array<i64: 256, 128>}, {transform_indices = @transform_2, window_bounds = array<i64: 1, 128>}, {transform_indices = @transform_3, window_bounds = array<i64: 8, 128>}]} {
    %c0_i32 = arith.constant 0 : i32
    %0 = arith.cmpi eq, %arg2, %c0_i32 : i32
    %1 = arith.extui %0 : i1 to i32
    %c0_i32_0 = arith.constant 0 : i32
    %2 = arith.cmpi ne, %1, %c0_i32_0 : i32
    scf.if %2 {
      %c0_10 = arith.constant 0 : index
      %c0_11 = arith.constant 0 : index
      %12 = vector.load %arg5[%c0_10, %c0_11] : memref<1x128xf32, #tpu.memory_space<vmem>>, vector<1x128xf32>
      %13 = vector.shape_cast %12 : vector<1x128xf32> to vector<1x128xf32>
      %14 = vector.broadcast %13 : vector<1x128xf32> to vector<8x128xf32>
      %c0_12 = arith.constant 0 : index
      %c0_13 = arith.constant 0 : index
      %15 = vector.load %arg6[%c0_12, %c0_13] : memref<8x128xf32, #tpu.memory_space<vmem>>, vector<8x128xf32>
      tpu.vector_store %arg6[%c0_12, %c0_13], %14 {strides = array<i32>} : memref<8x128xf32, #tpu.memory_space<vmem>>, vector<8x128xf32>,
    } else {
    }
    %c0 = arith.constant 0 : index
    %c0_1 = arith.constant 0 : index
    %3 = vector.load %arg6[%c0, %c0_1] : memref<8x128xf32, #tpu.memory_space<vmem>>, vector<8x128xf32>
    %c0_2 = arith.constant 0 : index
    %c0_3 = arith.constant 0 : index
    %4 = vector.load %arg3[%c0_2, %c0_3] : memref<8x256xbf16, #tpu.memory_space<vmem>>, vector<8x256xbf16>
    %c0_4 = arith.constant 0 : index
    %c0_5 = arith.constant 0 : index
    %5 = vector.load %arg4[%c0_4, %c0_5] : memref<256x128xbf16, #tpu.memory_space<vmem>>, vector<256x128xbf16>
    %cst = arith.constant dense<0.000000e+00> : vector<8x128xf32>
    %6 = tpu.matmul %4, %5, %cst {dimension_numbers = #tpu.dot_dimension_numbers<[1], [0], [0], [1], [0, 0, 1, 1], [], []>} : vector<8x256xbf16>, vector<256x128xbf16>, vector<8x128xf32> -> vector<8x128xf32>
    %7 = arith.addf %3, %6 : vector<8x128xf32>
    %c0_6 = arith.constant 0 : index
    %c0_7 = arith.constant 0 : index
    %8 = vector.load %arg6[%c0_6, %c0_7] : memref<8x128xf32, #tpu.memory_space<vmem>>, vector<8x128xf32>
    tpu.vector_store %arg6[%c0_6, %c0_7], %7 {strides = array<i32>} : memref<8x128xf32, #tpu.memory_space<vmem>>, vector<8x128xf32>,
    %c0_i32_8 = arith.constant 0 : i32
    %9 = arith.cmpi eq, %arg2, %c0_i32_8 : i32
    %10 = arith.extui %9 : i1 to i32
    %c0_i32_9 = arith.constant 0 : i32
    %11 = arith.cmpi ne, %10, %c0_i32_9 : i32
    scf.if %11 {
      %c0_10 = arith.constant 0 : index
      %c0_11 = arith.constant 0 : index
      %12 = vector.load %arg6[%c0_10, %c0_11] : memref<8x128xf32, #tpu.memory_space<vmem>>, vector<8x128xf32>
      %cst_12 = arith.constant 0.000000e+00 : f32
      %13 = vector.broadcast %cst_12 : f32 to vector<8x128xf32>
      %14 = arith.maximumf %12, %13 : vector<8x128xf32>
      %c0_13 = arith.constant 0 : index
      %c0_14 = arith.constant 0 : index
      %15 = vector.load %arg6[%c0_13, %c0_14] : memref<8x128xf32, #tpu.memory_space<vmem>>, vector<8x128xf32>
      tpu.vector_store %arg6[%c0_13, %c0_14], %14 {strides = array<i32>} : memref<8x128xf32, #tpu.memory_space<vmem>>, vector<8x128xf32>,
    } else {
    }
    return
  }
  func.func @transform_0(%arg0: i32, %arg1: i32, %arg2: i32) -> (i32, i32) {
    %c0_i32 = arith.constant 0 : i32
    return %arg0, %arg2 : i32, i32
  }
  func.func @transform_1(%arg0: i32, %arg1: i32, %arg2: i32) -> (i32, i32) {
    %c0_i32 = arith.constant 0 : i32
    return %arg2, %arg1 : i32, i32
  }
  func.func @transform_2(%arg0: i32, %arg1: i32, %arg2: i32) -> (i32, i32) {
    %c0_i32 = arith.constant 0 : i32
    %c0_i32_0 = arith.constant 0 : i32
    return %c0_i32, %arg1 : i32, i32
  }
  func.func @transform_3(%arg0: i32, %arg1: i32, %arg2: i32) -> (i32, i32) {
    %c0_i32 = arith.constant 0 : i32
    return %arg0, %arg1 : i32, i32
  }
}

module attributes {stable_mosaic.version = 11 : i64} {
  func.func @_matmul_bias_act_kernel(%arg0: i32, %arg1: i32, %arg2: i32, %arg3: memref<8x128xbf16, #tpu.memory_space<vmem>>, %arg4: memref<128x128xbf16, #tpu.memory_space<vmem>>, %arg5: memref<1x128xf32, #tpu.memory_space<vmem>>, %arg6: memref<8x128xf32, #tpu.memory_space<vmem>>) attributes {dimension_semantics = [#tpu.dimension_semantics<parallel>, #tpu.dimension_semantics<parallel>, #tpu.dimension_semantics<arbitrary>], iteration_bounds = array<i64: 1, 1, 1>, scalar_prefetch = 0 : i64, scratch_operands = 0 : i64, tpu.core_type = #tpu.core_type<tc>, window_params = [{transform_indices = @transform_0, window_bounds = array<i64: 8, 128>}, {transform_indices = @transform_1, window_bounds = array<i64: 128, 128>}, {transform_indices = @transform_2, window_bounds = array<i64: 1, 128>}, {transform_indices = @transform_3, window_bounds = array<i64: 8, 128>}]} {
    %c0_i32 = arith.constant 0 : i32
    %0 = arith.cmpi eq, %arg2, %c0_i32 : i32
    %1 = arith.extui %0 : i1 to i32
    %c0_i32_0 = arith.constant 0 : i32
    %2 = arith.cmpi ne, %1, %c0_i32_0 : i32
    scf.if %2 {
      %c0_10 = arith.constant 0 : index
      %c0_11 = arith.constant 0 : index
      %12 = vector.load %arg5[%c0_10, %c0_11] : memref<1x128xf32, #tpu.memory_space<vmem>>, vector<1x128xf32>
      %13 = vector.shape_cast %12 : vector<1x128xf32> to vector<1x128xf32>
      %14 = vector.broadcast %13 : vector<1x128xf32> to vector<8x128xf32>
      %c0_12 = arith.constant 0 : index
      %c0_13 = arith.constant 0 : index
      %15 = vector.load %arg6[%c0_12, %c0_13] : memref<8x128xf32, #tpu.memory_space<vmem>>, vector<8x128xf32>
      tpu.vector_store %arg6[%c0_12, %c0_13], %14 {strides = array<i32>} : memref<8x128xf32, #tpu.memory_space<vmem>>, vector<8x128xf32>,
    } else {
    }
    %c0 = arith.constant 0 : index
    %c0_1 = arith.constant 0 : index
    %3 = vector.load %arg6[%c0, %c0_1] : memref<8x128xf32, #tpu.memory_space<vmem>>, vector<8x128xf32>
    %c0_2 = arith.constant 0 : index
    %c0_3 = arith.constant 0 : index
    %4 = vector.load %arg3[%c0_2, %c0_3] : memref<8x128xbf16, #tpu.memory_space<vmem>>, vector<8x128xbf16>
    %c0_4 = arith.constant 0 : index
    %c0_5 = arith.constant 0 : index
    %5 = vector.load %arg4[%c0_4, %c0_5] : memref<128x128xbf16, #tpu.memory_space<vmem>>, vector<128x128xbf16>
    %cst = arith.constant dense<0.000000e+00> : vector<8x128xf32>
    %6 = tpu.matmul %4, %5, %cst {dimension_numbers = #tpu.dot_dimension_numbers<[1], [0], [0], [1], [0, 0, 1, 1], [], []>} : vector<8x128xbf16>, vector<128x128xbf16>, vector<8x128xf32> -> vector<8x128xf32>
    %7 = arith.addf %3, %6 : vector<8x128xf32>
    %c0_6 = arith.constant 0 : index
    %c0_7 = arith.constant 0 : index
    %8 = vector.load %arg6[%c0_6, %c0_7] : memref<8x128xf32, #tpu.memory_space<vmem>>, vector<8x128xf32>
    tpu.vector_store %arg6[%c0_6, %c0_7], %7 {strides = array<i32>} : memref<8x128xf32, #tpu.memory_space<vmem>>, vector<8x128xf32>,
    %c0_i32_8 = arith.constant 0 : i32
    %9 = arith.cmpi eq, %arg2, %c0_i32_8 : i32
    %10 = arith.extui %9 : i1 to i32
    %c0_i32_9 = arith.constant 0 : i32
    %11 = arith.cmpi ne, %10, %c0_i32_9 : i32
    scf.if %11 {
      %c0_10 = arith.constant 0 : index
      %c0_11 = arith.constant 0 : index
      %12 = vector.load %arg6[%c0_10, %c0_11] : memref<8x128xf32, #tpu.memory_space<vmem>>, vector<8x128xf32>
      %cst_12 = arith.constant 0.000000e+00 : f32
      %13 = vector.broadcast %cst_12 : f32 to vector<8x128xf32>
      %14 = arith.maximumf %12, %13 : vector<8x128xf32>
      %c0_13 = arith.constant 0 : index
      %c0_14 = arith.constant 0 : index
      %15 = vector.load %arg6[%c0_13, %c0_14] : memref<8x128xf32, #tpu.memory_space<vmem>>, vector<8x128xf32>
      tpu.vector_store %arg6[%c0_13, %c0_14], %14 {strides = array<i32>} : memref<8x128xf32, #tpu.memory_space<vmem>>, vector<8x128xf32>,
    } else {
    }
    return
  }
  func.func @transform_0(%arg0: i32, %arg1: i32, %arg2: i32) -> (i32, i32) {
    %c0_i32 = arith.constant 0 : i32
    return %arg0, %arg2 : i32, i32
  }
  func.func @transform_1(%arg0: i32, %arg1: i32, %arg2: i32) -> (i32, i32) {
    %c0_i32 = arith.constant 0 : i32
    return %arg2, %arg1 : i32, i32
  }
  func.func @transform_2(%arg0: i32, %arg1: i32, %arg2: i32) -> (i32, i32) {
    %c0_i32 = arith.constant 0 : i32
    %c0_i32_0 = arith.constant 0 : i32
    return %c0_i32, %arg1 : i32, i32
  }
  func.func @transform_3(%arg0: i32, %arg1: i32, %arg2: i32) -> (i32, i32) {
    %c0_i32 = arith.constant 0 : i32
    return %arg0, %arg1 : i32, i32
  }
}

module attributes {stable_mosaic.version = 11 : i64} {
  func.func @_matmul_bias_act_kernel(%arg0: i32, %arg1: i32, %arg2: i32, %arg3: memref<8x128xbf16, #tpu.memory_space<vmem>>, %arg4: memref<128x128xbf16, #tpu.memory_space<vmem>>, %arg5: memref<1x128xf32, #tpu.memory_space<vmem>>, %arg6: memref<8x128xf32, #tpu.memory_space<vmem>>) attributes {dimension_semantics = [#tpu.dimension_semantics<parallel>, #tpu.dimension_semantics<parallel>, #tpu.dimension_semantics<arbitrary>], iteration_bounds = array<i64: 1, 1, 1>, scalar_prefetch = 0 : i64, scratch_operands = 0 : i64, tpu.core_type = #tpu.core_type<tc>, window_params = [{transform_indices = @transform_0, window_bounds = array<i64: 8, 128>}, {transform_indices = @transform_1, window_bounds = array<i64: 128, 128>}, {transform_indices = @transform_2, window_bounds = array<i64: 1, 128>}, {transform_indices = @transform_3, window_bounds = array<i64: 8, 128>}]} {
    %c0_i32 = arith.constant 0 : i32
    %0 = arith.cmpi eq, %arg2, %c0_i32 : i32
    %1 = arith.extui %0 : i1 to i32
    %c0_i32_0 = arith.constant 0 : i32
    %2 = arith.cmpi ne, %1, %c0_i32_0 : i32
    scf.if %2 {
      %c0_8 = arith.constant 0 : index
      %c0_9 = arith.constant 0 : index
      %9 = vector.load %arg5[%c0_8, %c0_9] : memref<1x128xf32, #tpu.memory_space<vmem>>, vector<1x128xf32>
      %10 = vector.shape_cast %9 : vector<1x128xf32> to vector<1x128xf32>
      %11 = vector.broadcast %10 : vector<1x128xf32> to vector<8x128xf32>
      %c0_10 = arith.constant 0 : index
      %c0_11 = arith.constant 0 : index
      %12 = vector.load %arg6[%c0_10, %c0_11] : memref<8x128xf32, #tpu.memory_space<vmem>>, vector<8x128xf32>
      tpu.vector_store %arg6[%c0_10, %c0_11], %11 {strides = array<i32>} : memref<8x128xf32, #tpu.memory_space<vmem>>, vector<8x128xf32>,
    } else {
    }
    %c0 = arith.constant 0 : index
    %c0_1 = arith.constant 0 : index
    %3 = vector.load %arg6[%c0, %c0_1] : memref<8x128xf32, #tpu.memory_space<vmem>>, vector<8x128xf32>
    %c0_2 = arith.constant 0 : index
    %c0_3 = arith.constant 0 : index
    %4 = vector.load %arg3[%c0_2, %c0_3] : memref<8x128xbf16, #tpu.memory_space<vmem>>, vector<8x128xbf16>
    %c0_4 = arith.constant 0 : index
    %c0_5 = arith.constant 0 : index
    %5 = vector.load %arg4[%c0_4, %c0_5] : memref<128x128xbf16, #tpu.memory_space<vmem>>, vector<128x128xbf16>
    %cst = arith.constant dense<0.000000e+00> : vector<8x128xf32>
    %6 = tpu.matmul %4, %5, %cst {dimension_numbers = #tpu.dot_dimension_numbers<[1], [0], [0], [1], [0, 0, 1, 1], [], []>} : vector<8x128xbf16>, vector<128x128xbf16>, vector<8x128xf32> -> vector<8x128xf32>
    %7 = arith.addf %3, %6 : vector<8x128xf32>
    %c0_6 = arith.constant 0 : index
    %c0_7 = arith.constant 0 : index
    %8 = vector.load %arg6[%c0_6, %c0_7] : memref<8x128xf32, #tpu.memory_space<vmem>>, vector<8x128xf32>
    tpu.vector_store %arg6[%c0_6, %c0_7], %7 {strides = array<i32>} : memref<8x128xf32, #tpu.memory_space<vmem>>, vector<8x128xf32>,
    return
  }
  func.func @transform_0(%arg0: i32, %arg1: i32, %arg2: i32) -> (i32, i32) {
    %c0_i32 = arith.constant 0 : i32
    return %arg0, %arg2 : i32, i32
  }
  func.func @transform_1(%arg0: i32, %arg1: i32, %arg2: i32) -> (i32, i32) {
    %c0_i32 = arith.constant 0 : i32
    return %arg2, %arg1 : i32, i32
  }
  func.func @transform_2(%arg0: i32, %arg1: i32, %arg2: i32) -> (i32, i32) {
    %c0_i32 = arith.constant 0 : i32
    %c0_i32_0 = arith.constant 0 : i32
    return %c0_i32, %arg1 : i32, i32
  }
  func.func @transform_3(%arg0: i32, %arg1: i32, %arg2: i32) -> (i32, i32) {
    %c0_i32 = arith.constant 0 : i32
    return %arg0, %arg1 : i32, i32
  }
}

</mosaic_0001>

<bundles_post_ra>
// kernel: bilinear_cnn_forward.11
= control target key start
LH: loop header
LB: loop body
LE: loop exit
PB: predicated region body
PF: predicated region fallthrough
CT: control target
= control target key end

     0   :  { %s1862_s12 = smov 0   ;;  %s1864_s13 = smov 0   ;;  %s2239_s0 = inlined_call_operand.vmem [shape: bf16[1280,384], index: 0, kind: input, shape index: {}]   ;;  %s2240_s1 = inlined_call_operand.vmem [shape: bf16[384,128], index: 1, kind: input, shape index: {}]   ;;  %s2241_s2 = inlined_call_operand.vmem [shape: f32[1,128], index: 2, kind: input, shape index: {}]   ;;  %s2242_s3 = inlined_call_operand.vmem [shape: f32[1280,128], index: 3, kind: output, shape index: {}]  }
   0x1   :  { %s1866_s14 = smov 0  }
   0x2 LB: > { %s32_s15 = sadd.s32 1, %s1836_s13  ;;  %p1401_p0 = scmp.ge.s32.totalorder %s1840_s14, 1  ;;  %s1840_s14 = sphi %s1866_s14, %s13_s14   ;;  %s1836_s13 = sphi %s1864_s13, %s2244_s13   ;;  %s1832_s12 = sphi %s1862_s12, %s2243_s12  }
   0x3   : > { %p34_p1 = scmp.ge.s32.totalorder %s32_s15, 5  ;;  %p191_p2 = scmp.lt.s32.totalorder %s1840_s14, 6 }
   0x5   : > { %s2246_s15 = smov (%p34_p1, %s32_s15), 0  ;;  %p192_p3 = pnand %p1401_p0, %p191_p2 }
   0x6   : > { %s1402_s7 = sshll.u32 (!%p192_p3), %s1832_s12, 5 }
   0x7   : > { %195 = sbr.rel (%p192_p3) target bundleno = 369 (0x171), region = 32  ;;  %p236_p4 = scmp.lt.s32.totalorder (!%p192_p3), %s1402_s7, 159 }
   0xc   : > { %v1751_v0 = vld [vmem:[%s2240_s1 + $0x38] sm:$0xff]  ;;  %v1750_v3 = vld [vmem:[%s2240_s1 + $0x30] sm:$0xff]  ;;  %v1749_v6 = vld [vmem:[%s2240_s1 + $0x28] sm:$0xff]  ;;  %s2248_s7 = smov (!%p236_p4, %s1402_s7), 159 }
   0xd   : > { %v1888_v1 = vld [vmem:[%s2240_s1 + $0x78] sm:$0xff]  ;;  %851 = vmatpush.bf16.msra.mxu0 %v1751_v0  ;;  %1768 = vmatpush.bf16.msra.mxu3 %v1751_v0  ;;  %v1903_v4 = vld [vmem:[%s2240_s1 + $0x70] sm:$0xff]  ;;  %v1918_v7 = vld [vmem:[%s2240_s1 + $0x68] sm:$0xff]  ;;  %s1792_s25 = smul.u32 12, %s2248_s7  ;;  %s1405_s24 = sshll.u32 %s2248_s7, 3 }
   0xe   : > { %v1893_v2 = vld [vmem:[%s2240_s1 + $0xb8] sm:$0xff]  ;;  %940 = vmatpush.bf16.msra.mxu1 %v1888_v1  ;;  %v1908_v5 = vld [vmem:[%s2240_s1 + $0xb0] sm:$0xff]  ;;  %v1923_v8 = vld [vmem:[%s2240_s1 + $0xa8] sm:$0xff]  ;;  %s2095_s27 = scalar_lea.vmem %s2242_s3, %s1405_s24 }
   0xf   : > { %1029 = vmatpush.bf16.msra.mxu2 %v1893_v2  ;;  %v1748_v9 = vld [vmem:[%s2240_s1 + $0x20] sm:$0xff]  ;;  %v1747_v12 = vld [vmem:[%s2240_s1 + $0x18] sm:$0xff]  ;;  %v1746_v15 = vld [vmem:[%s2240_s1 + $0x10] sm:$0xff]  ;;  %s1975_s8 = scalar_lea.vmem %s2239_s0, %s1792_s25 }
  0x10   : > { %v1934_v10 = vld [vmem:[%s2240_s1 + $0x60] sm:$0xff]  ;;  %v1755_v13 = vld [vmem:[%s2240_s1 + $0x58] sm:$0xff]  ;;  %v1754_v16 = vld [vmem:[%s2240_s1 + $0x50] sm:$0xff] }
  0x11   : > { %852 = vmatpush.bf16.msra.mxu0 %v1750_v3  ;;  %1769 = vmatpush.bf16.msra.mxu3 %v1750_v3  ;;  %v1939_v11 = vld [vmem:[%s2240_s1 + $0xa0] sm:$0xff]  ;;  %v1954_v14 = vld [vmem:[%s2240_s1 + $0x98] sm:$0xff]  ;;  %v1967_v17 = vld [vmem:[%s2240_s1 + $0x90] sm:$0xff] }
  0x12   : > { %941 = vmatpush.bf16.msra.mxu1 %v1903_v4  ;;  %v1745_v18 = vld [vmem:[%s2240_s1 + $0x8] sm:$0xff]  ;;  %v1744_v21 = vld [vmem:[%s2240_s1] sm:$0xff]  ;;  %v1410_v29 = vld [vmem:[%s1975_s8 + $0xc] sm:$0xf0] }
  0x13   : > { %1030 = vmatpush.bf16.msra.mxu2 %v1908_v5  ;;  %v1753_v19 = vld [vmem:[%s2240_s1 + $0x48] sm:$0xff]  ;;  %v1752_v22 = vld [vmem:[%s2240_s1 + $0x40] sm:$0xff]  ;;  %v1698_v31 = vld [vmem:[%s1975_s8 + $0x10] sm:$0xf0] }
  0x14   : > { %v1984_v20 = vld [vmem:[%s2240_s1 + $0x88] sm:$0xff]  ;;  %v1995_v23 = vld [vmem:[%s2240_s1 + $0x80] sm:$0xff]  ;;  %v1420_v36 = vld [vmem:[%s1975_s8 + $0x18] sm:$0xf] }
  0x15   : > { %853 = vmatpush.bf16.msra.mxu0 %v1749_v6  ;;  %1770 = vmatpush.bf16.msra.mxu3 %v1749_v6  ;;  %v1408_v24 = vld [vmem:[%s1975_s8] sm:$0xf]  ;;  %v1697_v25 = vld [vmem:[%s1975_s8 + $0x8] sm:$0xf0]  ;;  %v1696_v28 = vld [vmem:[%s1975_s8 + $0x4] sm:$0xf] }
  0x16   : > { %942 = vmatpush.bf16.msra.mxu1 %v1918_v7  ;;  %v1552_v26 = vld [vmem:[%s1975_s8 + $0x120] sm:$0xf]  ;;  %v1733_v27 = vld [vmem:[%s1975_s8 + $0x128] sm:$0xf0]  ;;  %v1416_v30 = vld [vmem:[%s1975_s8 + $0x8] sm:$0xf]  ;;  %v1409_v32 = vor.u32 %v1697_v25, %v1408_v24  ;;  %v1413_v34 = vor.u32 %v1696_v28, %v1410_v29 }
  0x17   : > { %1031 = vmatpush.bf16.msra.mxu2 %v1923_v8  ;;  %v1553_v33 = vor.u32 %v1733_v27, %v1552_v26  ;;  %v1417_v35 = vor.u32 %v1698_v31, %v1416_v30  ;;  %v1700_v37 = vld [vmem:[%s1975_s8 + $0x20] sm:$0xf0]  ;;  %v1564_v38 = vld [vmem:[%s1975_s8 + $0x138] sm:$0xf]  ;;  %v1699_v40 = vld [vmem:[%s1975_s8 + $0x1c] sm:$0xf] }
  0x18   : > { %v1736_v39 = vld [vmem:[%s1975_s8 + $0x140] sm:$0xf0]  ;;  %v1422_v41 = vld [vmem:[%s1975_s8 + $0x24] sm:$0xf0]  ;;  %v1428_v42 = vld [vmem:[%s1975_s8 + $0x20] sm:$0xf]  ;;  %v1421_v44 = vor.u32 %v1700_v37, %v1420_v36 }
  0x19   : > { %854 = vmatpush.bf16.msra.mxu0 %v1748_v9  ;;  %1771 = vmatpush.bf16.msra.mxu3 %v1748_v9  ;;  %v1701_v43 = vld [vmem:[%s1975_s8 + $0x28] sm:$0xf0]  ;;  %v1565_v45 = vor.u32 %v1736_v39, %v1564_v38  ;;  %v1425_v46 = vor.u32 %v1699_v40, %v1422_v41  ;;  %v1432_v48 = vld [vmem:[%s1975_s8 + $0x30] sm:$0xf]  ;;  %v1703_v49 = vld [vmem:[%s1975_s8 + $0x38] sm:$0xf0] }
  0x1a   : > { %943 = vmatpush.bf16.msra.mxu1 %v1934_v10  ;;  %v1429_v47 = vor.u32 %v1701_v43, %v1428_v42  ;;  %v1576_v50 = vld [vmem:[%s1975_s8 + $0x150] sm:$0xf]  ;;  %v1739_v51 = vld [vmem:[%s1975_s8 + $0x158] sm:$0xf0]  ;;  %v1702_v52 = vld [vmem:[%s1975_s8 + $0x34] sm:$0xf]  ;;  %v1433_v56 = vor.u32 %v1703_v49, %v1432_v48 }
  0x1b   : > { %1032 = vmatpush.bf16.msra.mxu2 %v1939_v11  ;;  %v1434_v53 = vld [vmem:[%s1975_s8 + $0x3c] sm:$0xf0]  ;;  %v1440_v54 = vld [vmem:[%s1975_s8 + $0x38] sm:$0xf]  ;;  %v1704_v55 = vld [vmem:[%s1975_s8 + $0x40] sm:$0xf0]  ;;  %v1577_v57 = vor.u32 %v1739_v51, %v1576_v50 }
  0x1c   : > { %v1437_v58 = vor.u32 %v1702_v52, %v1434_v53  ;;  %v1441_v59 = vor.u32 %v1704_v55, %v1440_v54  ;;  %v1444_v60 = vld [vmem:[%s1975_s8 + $0x48] sm:$0xf]  ;;  %v1706_v61 = vld [vmem:[%s1975_s8 + $0x50] sm:$0xf0]  ;;  %v1705_v0 = vld [vmem:[%s1975_s8 + $0x4c] sm:$0xf] }
  0x1d   : > { %855 = vmatpush.bf16.msra.mxu0 %v1747_v12  ;;  %1772 = vmatpush.bf16.msra.mxu3 %v1747_v12  ;;  %v1588_v62 = vld [vmem:[%s1975_s8 + $0x168] sm:$0xf]  ;;  %v1742_v63 = vld [vmem:[%s1975_s8 + $0x170] sm:$0xf0]  ;;  %v1707_v3 = vld [vmem:[%s1975_s8 + $0x58] sm:$0xf0] }
  0x1e   : > { %944 = vmatpush.bf16.msra.mxu1 %v1755_v13  ;;  %v1709_v9 = vld [vmem:[%s1975_s8 + $0x68] sm:$0xf0]  ;;  %v1554_v12 = vld [vmem:[%s1975_s8 + $0x12c] sm:$0xf0]  ;;  %v1735_v24 = vld [vmem:[%s1975_s8 + $0x13c] sm:$0xf] }
  0x1f   : > { %1033 = vmatpush.bf16.msra.mxu2 %v1954_v14  ;;  %v1566_v25 = vld [vmem:[%s1975_s8 + $0x144] sm:$0xf0]  ;;  %v1476_v26 = vld [vmem:[%s1975_s8 + $0x80] sm:$0xf]  ;;  %v1713_v27 = vld [vmem:[%s1975_s8 + $0x88] sm:$0xf0] }
  0x20   : > { %v1569_v29 = vor.u32 %v1735_v24, %v1566_v25  ;;  %v1477_v31 = vor.u32 %v1713_v27, %v1476_v26  ;;  %v1578_v36 = vld [vmem:[%s1975_s8 + $0x15c] sm:$0xf0]  ;;  %v1488_v38 = vld [vmem:[%s1975_s8 + $0x98] sm:$0xf]  ;;  %v1716_v39 = vld [vmem:[%s1975_s8 + $0xa0] sm:$0xf0] }
  0x21   : > { %856 = vmatpush.bf16.msra.mxu0 %v1746_v15  ;;  %1773 = vmatpush.bf16.msra.mxu3 %v1746_v15  ;;  %v1710_v15 = vld [vmem:[%s1975_s8 + $0x70] sm:$0xf0]  ;;  %v1482_v37 = vld [vmem:[%s1975_s8 + $0x9c] sm:$0xf0]  ;;  %v1489_v43 = vor.u32 %v1716_v39, %v1488_v38  ;;  %v1590_v48 = vld [vmem:[%s1975_s8 + $0x174] sm:$0xf0] }
  0x22   : > { %945 = vmatpush.bf16.msra.mxu1 %v1754_v16  ;;  %v1494_v49 = vld [vmem:[%s1975_s8 + $0xb4] sm:$0xf0]  ;;  %v1500_v50 = vld [vmem:[%s1975_s8 + $0xb0] sm:$0xf]  ;;  %v1719_v51 = vld [vmem:[%s1975_s8 + $0xb8] sm:$0xf0] }
  0x23   : > { %1034 = vmatpush.bf16.msra.mxu2 %v1967_v17  ;;  %v1501_v55 = vor.u32 %v1719_v51, %v1500_v50  ;;  %v1728_v50 = vld [vmem:[%s1975_s8 + $0x100] sm:$0xf0] }
  0x25   : > { %857 = vmatpush.bf16.msra.mxu0 %v1745_v18  ;;  %1774 = vmatpush.bf16.msra.mxu3 %v1745_v18 }
  0x26   : > { %946 = vmatpush.bf16.msra.mxu1 %v1753_v19 }
  0x27   : > { %1035 = vmatpush.bf16.msra.mxu2 %v1984_v20 }
  0x29   : > { %858 = vmatpush.bf16.msra.mxu0 %v1744_v21  ;;  %1775 = vmatpush.bf16.msra.mxu3 %v1744_v21  ;;  %v1712_v21 = vld [vmem:[%s1975_s8 + $0x80] sm:$0xf0] }
  0x2a   : > { %947 = vmatpush.bf16.msra.mxu1 %v1752_v22 }
  0x2b   : > { %1036 = vmatpush.bf16.msra.mxu2 %v1995_v23 }
  0x2c   : > { %859 = vmatmul.bf16.vlgmr.msra.gmra.mxu0 %v1409_v32  ;;  %919 = vmatmul.bf16.vlgmr.msra.gmra.mxu3 %v1553_v33  ;;  %v1480_v32 = vld [vmem:[%s1975_s8 + $0x90] sm:$0xf]  ;;  %v1715_v33 = vld [vmem:[%s1975_s8 + $0x98] sm:$0xf0] }
  0x2d   : > { %1776 = vmatpush.bf16.msrb.mxu3 %v1888_v1  ;;  %948 = vmatmul.bf16.vlgmr.msra.gmra.mxu1 %v1413_v34  ;;  %v1446_v1 = vld [vmem:[%s1975_s8 + $0x54] sm:$0xf0]  ;;  %v1714_v34 = vld [vmem:[%s1975_s8 + $0x94] sm:$0xf]  ;;  %v1481_v40 = vor.u32 %v1715_v33, %v1480_v32 }
  0x2e   : > { %1037 = vmatmul.bf16.vlgmr.msra.gmra.mxu2 %v1417_v35  ;;  %v1449_v6 = vor.u32 %v1705_v0, %v1446_v1  ;;  %v1738_v35 = vld [vmem:[%s1975_s8 + $0x154] sm:$0xf]  ;;  %v1485_v42 = vor.u32 %v1714_v34, %v1482_v37 }
  0x2f   : > { %v1581_v41 = vor.u32 %v1738_v35, %v1578_v36 }
  0x31   : > { %1777 = vmatpush.bf16.msrb.mxu3 %v1903_v4  ;;  %v1445_v4 = vor.u32 %v1706_v61, %v1444_v60  ;;  %v1734_v60 = vld [vmem:[%s1975_s8 + $0x130] sm:$0xf0]  ;;  %v1506_v61 = vld [vmem:[%s1975_s8 + $0xcc] sm:$0xf0] }
  0x35   : > { %1778 = vmatpush.bf16.msrb.mxu3 %v1918_v7 }
  0x39   : > { %1779 = vmatpush.bf16.msrb.mxu3 %v1934_v10  ;;  %v1708_v10 = vld [vmem:[%s1975_s8 + $0x64] sm:$0xf] }
  0x3c   : > { %864 = vmatmul.bf16.gmra.mxu0 %v1421_v44  ;;  %924 = vmatmul.bf16.gmra.mxu3 %v1565_v45  ;;  %v1492_v44 = vld [vmem:[%s1975_s8 + $0xa8] sm:$0xf]  ;;  %v1718_v45 = vld [vmem:[%s1975_s8 + $0xb0] sm:$0xf0] }
  0x3d   : > { %1780 = vmatpush.bf16.msrb.mxu3 %v1755_v13  ;;  %953 = vmatmul.bf16.gmra.mxu1 %v1425_v46  ;;  %v1458_v13 = vld [vmem:[%s1975_s8 + $0x6c] sm:$0xf0]  ;;  %v1717_v46 = vld [vmem:[%s1975_s8 + $0xac] sm:$0xf]  ;;  %v1493_v52 = vor.u32 %v1718_v45, %v1492_v44  ;;  %v1726_v44 = vld [vmem:[%s1975_s8 + $0xf4] sm:$0xf] }
  0x3e   : > { %1042 = vmatmul.bf16.gmra.mxu2 %v1429_v47  ;;  %v1461_v18 = vor.u32 %v1708_v10, %v1458_v13  ;;  %v1741_v47 = vld [vmem:[%s1975_s8 + $0x16c] sm:$0xf]  ;;  %v1497_v54 = vor.u32 %v1717_v46, %v1494_v49  ;;  %v1584_v46 = vld [vmem:[%s1975_s8 + $0x158] sm:$0xf] }
  0x3f   : > { %v1593_v53 = vor.u32 %v1741_v47, %v1590_v48  ;;  %v1740_v47 = vld [vmem:[%s1975_s8 + $0x160] sm:$0xf0]  ;;  %v1530_v48 = vld [vmem:[%s1975_s8 + $0xfc] sm:$0xf0]  ;;  %v1536_v49 = vld [vmem:[%s1975_s8 + $0xf8] sm:$0xf] }
  0x41   : > { %1781 = vmatpush.bf16.msrb.mxu3 %v1754_v16 }
  0x45   : > { %1782 = vmatpush.bf16.msrb.mxu3 %v1753_v19 }
  0x49   : > { %1783 = vmatpush.bf16.msrb.mxu3 %v1752_v22  ;;  %v1711_v22 = vld [vmem:[%s1975_s8 + $0x7c] sm:$0xf] }
  0x4c   : > { %869 = vmatmul.bf16.gmra.mxu0 %v1433_v56  ;;  %929 = vmatmul.bf16.gmra.mxu3 %v1577_v57  ;;  %v1504_v56 = vld [vmem:[%s1975_s8 + $0xc0] sm:$0xf]  ;;  %v1721_v57 = vld [vmem:[%s1975_s8 + $0xc8] sm:$0xf0] }
  0x4d   : > { %1784 = vmatpush.bf16.msra.mxu3 %v1893_v2  ;;  %958 = vmatmul.bf16.gmra.mxu1 %v1437_v58  ;;  %v1452_v2 = vld [vmem:[%s1975_s8 + $0x50] sm:$0xf]  ;;  %v1720_v58 = vld [vmem:[%s1975_s8 + $0xc4] sm:$0xf]  ;;  %v1505_v0 = vor.u32 %v1721_v57, %v1504_v56 }
  0x4e   : > { %1047 = vmatmul.bf16.gmra.mxu2 %v1441_v59  ;;  %v1453_v7 = vor.u32 %v1707_v3, %v1452_v2  ;;  %v1560_v59 = vld [vmem:[%s1975_s8 + $0x128] sm:$0xf]  ;;  %v1509_v3 = vor.u32 %v1720_v58, %v1506_v61  ;;  %v1533_v58 = vor.u32 %v1726_v44, %v1530_v48 }
  0x4f   : > { %v1561_v1 = vor.u32 %v1734_v60, %v1560_v59  ;;  %v1537_v59 = vor.u32 %v1728_v50, %v1536_v49 }
  0x51   : > { %1785 = vmatpush.bf16.msra.mxu3 %v1908_v5  ;;  %v1589_v5 = vor.u32 %v1742_v63, %v1588_v62  ;;  %v1512_v62 = vld [vmem:[%s1975_s8 + $0xc8] sm:$0xf]  ;;  %v1722_v63 = vld [vmem:[%s1975_s8 + $0xd0] sm:$0xf0] }
  0x55   : > { %1786 = vmatpush.bf16.msra.mxu3 %v1923_v8  ;;  %v1456_v8 = vld [vmem:[%s1975_s8 + $0x60] sm:$0xf] }
  0x56   : > { %v1457_v16 = vor.u32 %v1709_v9, %v1456_v8  ;;  %v2088_v8 = vld [vmem:[%s2241_s2] ss:$0 sm:$0xff] }
  0x59   : > { %1787 = vmatpush.bf16.msra.mxu3 %v1939_v11  ;;  %v1732_v11 = vld [vmem:[%s1975_s8 + $0x124] sm:$0xf] }
  0x5c   : > { %874 = vmatmul.bf16.gmra.mxu0 %v1445_v4  ;;  %934 = vmatmul.bf16.gmra.mxu3 %v1589_v5  ;;  %v1513_v4 = vor.u32 %v1722_v63, %v1512_v62 }
  0x5d   : > { %1788 = vmatpush.bf16.msra.mxu3 %v1954_v14  ;;  %963 = vmatmul.bf16.gmra.mxu1 %v1449_v6  ;;  %v1464_v14 = vld [vmem:[%s1975_s8 + $0x68] sm:$0xf] }
  0x5e   : > { %1052 = vmatmul.bf16.gmra.mxu2 %v1453_v7  ;;  %v1465_v19 = vor.u32 %v1710_v15, %v1464_v14  ;;  %v1516_v14 = vld [vmem:[%s1975_s8 + $0xd8] sm:$0xf]  ;;  %v1724_v15 = vld [vmem:[%s1975_s8 + $0xe0] sm:$0xf0] }
  0x5f   : > { %v1517_v26 = vor.u32 %v1724_v15, %v1516_v14  ;;  %v1542_v14 = vld [vmem:[%s1975_s8 + $0x114] sm:$0xf0]  ;;  %v1548_v15 = vld [vmem:[%s1975_s8 + $0x110] sm:$0xf] }
  0x61   : > { %1789 = vmatpush.bf16.msra.mxu3 %v1967_v17  ;;  %v1557_v17 = vor.u32 %v1732_v11, %v1554_v12 }
  0x65   : > { %1790 = vmatpush.bf16.msra.mxu3 %v1984_v20  ;;  %v1468_v20 = vld [vmem:[%s1975_s8 + $0x78] sm:$0xf] }
  0x66   : > { %v1469_v28 = vor.u32 %v1712_v21, %v1468_v20  ;;  %v1518_v20 = vld [vmem:[%s1975_s8 + $0xe4] sm:$0xf0]  ;;  %v1524_v21 = vld [vmem:[%s1975_s8 + $0xe0] sm:$0xf] }
  0x69   : > { %1791 = vmatpush.bf16.msra.mxu3 %v1995_v23  ;;  %v1470_v23 = vld [vmem:[%s1975_s8 + $0x84] sm:$0xf0] }
  0x6a   : > { %v1473_v30 = vor.u32 %v1711_v22, %v1470_v23  ;;  %v1725_v22 = vld [vmem:[%s1975_s8 + $0xe8] sm:$0xf0] }
  0x6c   : > { %879 = vmatmul.bf16.gmra.mxu0 %v1457_v16  ;;  %1008 = vmatmul.bf16.vlgmr.msrb.gmra.mxu3 %v1557_v17  ;;  %v1723_v16 = vld [vmem:[%s1975_s8 + $0xdc] sm:$0xf] }
  0x6d   : > { %968 = vmatmul.bf16.gmra.mxu1 %v1461_v18  ;;  %v1572_v18 = vld [vmem:[%s1975_s8 + $0x140] sm:$0xf] }
  0x6e   : > { %1057 = vmatmul.bf16.gmra.mxu2 %v1465_v19  ;;  %v1737_v19 = vld [vmem:[%s1975_s8 + $0x148] sm:$0xf0] }
  0x6f   : > { %v1573_v27 = vor.u32 %v1737_v19, %v1572_v18 }
  0x7c   : > { %884 = vmatmul.bf16.gmra.mxu0 %v1469_v28  ;;  %1013 = vmatmul.bf16.gmra.mxu3 %v1569_v29 }
  0x7d   : > { %973 = vmatmul.bf16.gmra.mxu1 %v1473_v30  ;;  %v1521_v30 = vor.u32 %v1723_v16, %v1518_v20  ;;  %v1731_v16 = vld [vmem:[%s1975_s8 + $0x118] sm:$0xf0] }
  0x7e   : > { %1062 = vmatmul.bf16.gmra.mxu2 %v1477_v31  ;;  %v1525_v31 = vor.u32 %v1725_v22, %v1524_v21 }
  0x8c   : > { %889 = vmatmul.bf16.gmra.mxu0 %v1481_v40  ;;  %1018 = vmatmul.bf16.gmra.mxu3 %v1581_v41 }
  0x8d   : > { %978 = vmatmul.bf16.gmra.mxu1 %v1485_v42  ;;  %v1528_v42 = vld [vmem:[%s1975_s8 + $0xf0] sm:$0xf] }
  0x8e   : > { %1067 = vmatmul.bf16.gmra.mxu2 %v1489_v43  ;;  %v1727_v43 = vld [vmem:[%s1975_s8 + $0xf8] sm:$0xf0] }
  0x9c   : > { %894 = vmatmul.bf16.gmra.mxu0 %v1493_v52  ;;  %1023 = vmatmul.bf16.gmra.mxu3 %v1593_v53 }
  0x9d   : > { %983 = vmatmul.bf16.gmra.mxu1 %v1497_v54  ;;  %v1529_v54 = vor.u32 %v1727_v43, %v1528_v42 }
  0x9e   : > { %1072 = vmatmul.bf16.gmra.mxu2 %v1501_v55  ;;  %v1585_v55 = vor.u32 %v1740_v47, %v1584_v46 }
  0xa9   : > { %v860_v2 = vpop.f32.mrf.mxu0 }
  0xaa   : > { %v949_v5 = vpop.f32.mrf.mxu1 }
  0xab   : > { %v950_v6 = vadd.f32 %v949_v5, %v860_v2 }
  0xac   : > { %899 = vmatmul.bf16.gmra.mxu0 %v1505_v0  ;;  %1097 = vmatmul.bf16.vlgmr.msra.gmra.mxu3 %v1561_v1 }
  0xad   : > { %988 = vmatmul.bf16.gmra.mxu1 %v1509_v3 }
  0xae   : > { %1077 = vmatmul.bf16.gmra.mxu2 %v1513_v4 }
  0xaf   : > { %v2083_v7 = vpop.f32.mrf.mxu3 }
  0xb1   : > { %v1038_v9 = vpop.f32.mrf.mxu2  ;;  %v862_v11 = vpop.f32.mrf.mxu0 }
  0xb2   : > { %v1039_v10 = vadd.f32 %v1038_v9, %v950_v6  ;;  %v951_v12 = vpop.f32.mrf.mxu1  ;;  %v1540_v6 = vld [vmem:[%s1975_s8 + $0x108] sm:$0xf]  ;;  %v1730_v9 = vld [vmem:[%s1975_s8 + $0x110] sm:$0xf0] }
  0xb3   : > { %v952_v24 = vadd.f32 %v951_v12, %v862_v11  ;;  %v1596_v12 = vld [vmem:[%s1975_s8 + $0x170] sm:$0xf]  ;;  %v1541_v20 = vor.u32 %v1730_v9, %v1540_v6 }
  0xb4   : > { %v1118_v13 = vadd.f32 %v2088_v8, %v1039_v10  ;;  %v1729_v10 = vld [vmem:[%s1975_s8 + $0x10c] sm:$0xf] }
  0xb6   : > { %v1217_v17 = vmax.f32 %v1118_v13, 0.0  ;;  %v1743_v13 = vld [vmem:[%s1975_s8 + $0x178] sm:$0xf0] }
  0xb7   : > { %v2106_v25 = vpop.f32.mrf.mxu3  ;;  %v1597_v21 = vor.u32 %v1743_v13, %v1596_v12 }
  0xb8   : > { %1249 = vst [vmem:[%s2095_s27] sm:$0xff] %v1217_v17 }
  0xb9   : > { %v1040_v23 = vpop.f32.mrf.mxu2  ;;  %v865_v29 = vpop.f32.mrf.mxu0 }
  0xba   : > { %v1041_v28 = vadd.f32 %v1040_v23, %v952_v24  ;;  %v954_v32 = vpop.f32.mrf.mxu1  ;;  %v1545_v23 = vor.u32 %v1729_v10, %v1542_v14 }
  0xbb   : > { %v955_v35 = vadd.f32 %v954_v32, %v865_v29 }
  0xbc   : > { %v1119_v33 = vadd.f32 %v2088_v8, %v1041_v28  ;;  %904 = vmatmul.bf16.gmra.mxu0 %v1517_v26  ;;  %1102 = vmatmul.bf16.gmra.mxu3 %v1573_v27  ;;  %v1549_v26 = vor.u32 %v1731_v16, %v1548_v15 }
  0xbd   : > { %993 = vmatmul.bf16.gmra.mxu1 %v1521_v30 }
  0xbe   : > { %v1218_v34 = vmax.f32 %v1119_v33, 0.0  ;;  %1082 = vmatmul.bf16.gmra.mxu2 %v1525_v31 }
  0xbf   : > { %v2110_v36 = vpop.f32.mrf.mxu3 }
  0xc0   : > { %1250 = vst [vmem:[%s2095_s27 + $0x8] sm:$0xff] %v1218_v34 }
  0xc1   : > { %v1043_v37 = vpop.f32.mrf.mxu2  ;;  %v867_v39 = vpop.f32.mrf.mxu0 }
  0xc2   : > { %v1044_v38 = vadd.f32 %v1043_v37, %v955_v35  ;;  %v956_v40 = vpop.f32.mrf.mxu1 }
  0xc3   : > { %v957_v51 = vadd.f32 %v956_v40, %v867_v39 }
  0xc4   : > { %v1120_v41 = vadd.f32 %v2088_v8, %v1044_v38 }
  0xc6   : > { %v1219_v45 = vmax.f32 %v1120_v41, 0.0 }
  0xc7   : > { %v2122_v52 = vpop.f32.mrf.mxu3 }
  0xc8   : > { %1251 = vst [vmem:[%s2095_s27 + $0x10] sm:$0xff] %v1219_v45 }
  0xc9   : > { %v1045_v53 = vpop.f32.mrf.mxu2  ;;  %v870_v57 = vpop.f32.mrf.mxu0 }
  0xca   : > { %v1046_v56 = vadd.f32 %v1045_v53, %v957_v51  ;;  %v959_v60 = vpop.f32.mrf.mxu1 }
  0xcb   : > { %v960_v63 = vadd.f32 %v959_v60, %v870_v57 }
  0xcc   : > { %v1121_v61 = vadd.f32 %v2088_v8, %v1046_v56  ;;  %909 = vmatmul.bf16.gmra.mxu0 %v1529_v54  ;;  %1107 = vmatmul.bf16.gmra.mxu3 %v1585_v55 }
  0xcd   : > { %998 = vmatmul.bf16.gmra.mxu1 %v1533_v58 }
  0xce   : > { %v1220_v62 = vmax.f32 %v1121_v61, 0.0  ;;  %1087 = vmatmul.bf16.gmra.mxu2 %v1537_v59 }
  0xcf   : > { %v2126_v0 = vpop.f32.mrf.mxu3 }
  0xd0   : > { %1252 = vst [vmem:[%s2095_s27 + $0x18] sm:$0xff] %v1220_v62 }
  0xd1   : > { %v1048_v1 = vpop.f32.mrf.mxu2  ;;  %v872_v3 = vpop.f32.mrf.mxu0 }
  0xd2   : > { %v1049_v2 = vadd.f32 %v1048_v1, %v960_v63  ;;  %v961_v4 = vpop.f32.mrf.mxu1 }
  0xd3   : > { %v962_v17 = vadd.f32 %v961_v4, %v872_v3 }
  0xd4   : > { %v1122_v5 = vadd.f32 %v2088_v8, %v1049_v2 }
  0xd6   : > { %v1221_v11 = vmax.f32 %v1122_v5, 0.0 }
  0xd7   : > { %v2138_v18 = vpop.f32.mrf.mxu3 }
  0xd8   : > { %1253 = vst [vmem:[%s2095_s27 + $0x20] sm:$0xff] %v1221_v11 }
  0xd9   : > { %v1050_v19 = vpop.f32.mrf.mxu2  ;;  %v875_v24 = vpop.f32.mrf.mxu0 }
  0xda   : > { %v1051_v22 = vadd.f32 %v1050_v19, %v962_v17  ;;  %v964_v27 = vpop.f32.mrf.mxu1 }
  0xdb   : > { %v965_v30 = vadd.f32 %v964_v27, %v875_v24 }
  0xdc   : > { %v1123_v28 = vadd.f32 %v2088_v8, %v1051_v22  ;;  %914 = vmatmul.bf16.gmra.mxu0 %v1541_v20  ;;  %1112 = vmatmul.bf16.gmra.mxu3 %v1597_v21 }
  0xdd   : > { %1003 = vmatmul.bf16.gmra.mxu1 %v1545_v23 }
  0xde   : > { %v1222_v29 = vmax.f32 %v1123_v28, 0.0  ;;  %1092 = vmatmul.bf16.gmra.mxu2 %v1549_v26 }
  0xdf   : > { %v2142_v31 = vpop.f32.mrf.mxu3 }
  0xe0   : > { %1254 = vst [vmem:[%s2095_s27 + $0x28] sm:$0xff] %v1222_v29 }
  0xe1   : > { %v1053_v32 = vpop.f32.mrf.mxu2  ;;  %v877_v34 = vpop.f32.mrf.mxu0 }
  0xe2   : > { %v1054_v33 = vadd.f32 %v1053_v32, %v965_v30  ;;  %v966_v35 = vpop.f32.mrf.mxu1 }
  0xe3   : > { %v967_v39 = vadd.f32 %v966_v35, %v877_v34 }
  0xe4   : > { %v1124_v37 = vadd.f32 %v2088_v8, %v1054_v33 }
  0xe6   : > { %v1223_v38 = vmax.f32 %v1124_v37, 0.0 }
  0xe7   : > { %v2146_v40 = vpop.f32.mrf.mxu3 }
  0xe8   : > { %1255 = vst [vmem:[%s2095_s27 + $0x30] sm:$0xff] %v1223_v38 }
  0xe9   : > { %v1055_v41 = vpop.f32.mrf.mxu2  ;;  %v880_v43 = vpop.f32.mrf.mxu0 }
  0xea   : > { %v1056_v42 = vadd.f32 %v1055_v41, %v967_v39  ;;  %v969_v44 = vpop.f32.mrf.mxu1 }
  0xeb   : > { %v970_v47 = vadd.f32 %v969_v44, %v880_v43 }
  0xec   : > { %v1125_v45 = vadd.f32 %v2088_v8, %v1056_v42 }
  0xee   : > { %v1224_v46 = vmax.f32 %v1125_v45, 0.0 }
  0xef   : > { %v2150_v48 = vpop.f32.mrf.mxu3 }
  0xf0   : > { %1256 = vst [vmem:[%s2095_s27 + $0x38] sm:$0xff] %v1224_v46 }
  0xf1   : > { %v1058_v49 = vpop.f32.mrf.mxu2  ;;  %v882_v51 = vpop.f32.mrf.mxu0 }
  0xf2   : > { %v1059_v50 = vadd.f32 %v1058_v49, %v970_v47  ;;  %v971_v53 = vpop.f32.mrf.mxu1 }
  0xf3   : > { %v972_v56 = vadd.f32 %v971_v53, %v882_v51 }
  0xf4   : > { %v1126_v54 = vadd.f32 %v2088_v8, %v1059_v50 }
  0xf6   : > { %v1225_v55 = vmax.f32 %v1126_v54, 0.0 }
  0xf7   : > { %v2154_v57 = vpop.f32.mrf.mxu3 }
  0xf8   : > { %1257 = vst [vmem:[%s2095_s27 + $0x40] sm:$0xff] %v1225_v55 }
  0xf9   : > { %v1060_v58 = vpop.f32.mrf.mxu2  ;;  %v885_v60 = vpop.f32.mrf.mxu0 }
  0xfa   : > { %v1061_v59 = vadd.f32 %v1060_v58, %v972_v56  ;;  %v974_v61 = vpop.f32.mrf.mxu1 }
  0xfb   : > { %v975_v1 = vadd.f32 %v974_v61, %v885_v60  ;;  %v1010_v60 = vadd.f32 %v2150_v48, %v2083_v7 }
  0xfc   : > { %v1127_v62 = vadd.f32 %v2088_v8, %v1061_v59 }
  0xfe   : > { %v1226_v63 = vmax.f32 %v1127_v62, 0.0 }
  0xff   : > { %v2158_v2 = vpop.f32.mrf.mxu3 }
 0x100   : > { %1258 = vst [vmem:[%s2095_s27 + $0x48] sm:$0xff] %v1226_v63 }
 0x101   : > { %v1063_v3 = vpop.f32.mrf.mxu2  ;;  %v887_v5 = vpop.f32.mrf.mxu0 }
 0x102   : > { %v1064_v4 = vadd.f32 %v1063_v3, %v975_v1  ;;  %v976_v6 = vpop.f32.mrf.mxu1 }
 0x103   : > { %v977_v11 = vadd.f32 %v976_v6, %v887_v5 }
 0x104   : > { %v1128_v9 = vadd.f32 %v2088_v8, %v1064_v4 }
 0x106   : > { %v1227_v10 = vmax.f32 %v1128_v9, 0.0 }
 0x107   : > { %v2162_v12 = vpop.f32.mrf.mxu3 }
 0x108   : > { %1259 = vst [vmem:[%s2095_s27 + $0x50] sm:$0xff] %v1227_v10 }
 0x109   : > { %v1065_v13 = vpop.f32.mrf.mxu2  ;;  %v890_v15 = vpop.f32.mrf.mxu0 }
 0x10a   : > { %v1066_v14 = vadd.f32 %v1065_v13, %v977_v11  ;;  %v979_v16 = vpop.f32.mrf.mxu1  ;;  %v1012_v11 = vadd.f32 %v2154_v57, %v2106_v25  ;;  %v1015_v25 = vadd.f32 %v2158_v2, %v2110_v36 }
 0x10b   : > { %v980_v20 = vadd.f32 %v979_v16, %v890_v15 }
 0x10c   : > { %v1129_v17 = vadd.f32 %v2088_v8, %v1066_v14 }
 0x10e   : > { %v1228_v19 = vmax.f32 %v1129_v17, 0.0 }
 0x10f   : > { %v2166_v21 = vpop.f32.mrf.mxu3 }
 0x110   : > { %1260 = vst [vmem:[%s2095_s27 + $0x58] sm:$0xff] %v1228_v19 }
 0x111   : > { %v1068_v22 = vpop.f32.mrf.mxu2  ;;  %v892_v23 = vpop.f32.mrf.mxu0 }
 0x112   : > { %v1069_v24 = vadd.f32 %v1068_v22, %v980_v20  ;;  %v981_v26 = vpop.f32.mrf.mxu1 }
 0x113   : > { %v982_v29 = vadd.f32 %v981_v26, %v892_v23 }
 0x114   : > { %v1130_v27 = vadd.f32 %v2088_v8, %v1069_v24 }
 0x116   : > { %v1229_v28 = vmax.f32 %v1130_v27, 0.0 }
 0x117   : > { %v2170_v30 = vpop.f32.mrf.mxu3 }
 0x118   : > { %1261 = vst [vmem:[%s2095_s27 + $0x60] sm:$0xff] %v1229_v28 }
 0x119   : > { %v1070_v32 = vpop.f32.mrf.mxu2  ;;  %v895_v34 = vpop.f32.mrf.mxu0 }
 0x11a   : > { %v1071_v33 = vadd.f32 %v1070_v32, %v982_v29  ;;  %v984_v35 = vpop.f32.mrf.mxu1 }
 0x11b   : > { %v985_v39 = vadd.f32 %v984_v35, %v895_v34 }
 0x11c   : > { %v1131_v37 = vadd.f32 %v2088_v8, %v1071_v33 }
 0x11e   : > { %v1230_v38 = vmax.f32 %v1131_v37, 0.0 }
 0x11f   : > { %v2174_v41 = vpop.f32.mrf.mxu3 }
 0x120   : > { %1262 = vst [vmem:[%s2095_s27 + $0x68] sm:$0xff] %v1230_v38  ;;  %v1017_v38 = vadd.f32 %v2162_v12, %v2122_v52  ;;  %v1020_v52 = vadd.f32 %v2166_v21, %v2126_v0 }
 0x121   : > { %v1073_v42 = vpop.f32.mrf.mxu2  ;;  %v897_v44 = vpop.f32.mrf.mxu0 }
 0x122   : > { %v1074_v43 = vadd.f32 %v1073_v42, %v985_v39  ;;  %v986_v45 = vpop.f32.mrf.mxu1 }
 0x123   : > { %v987_v49 = vadd.f32 %v986_v45, %v897_v44 }
 0x124   : > { %v1132_v46 = vadd.f32 %v2088_v8, %v1074_v43 }
 0x126   : > { %v1231_v47 = vmax.f32 %v1132_v46, 0.0 }
 0x127   : > { %v2178_v50 = vpop.f32.mrf.mxu3 }
 0x128   : > { %1263 = vst [vmem:[%s2095_s27 + $0x70] sm:$0xff] %v1231_v47 }
 0x129   : > { %v1075_v51 = vpop.f32.mrf.mxu2  ;;  %v900_v54 = vpop.f32.mrf.mxu0 }
 0x12a   : > { %v1076_v53 = vadd.f32 %v1075_v51, %v987_v49  ;;  %v989_v55 = vpop.f32.mrf.mxu1 }
 0x12b   : > { %v990_v59 = vadd.f32 %v989_v55, %v900_v54 }
 0x12c   : > { %v1133_v56 = vadd.f32 %v2088_v8, %v1076_v53 }
 0x12e   : > { %v1232_v58 = vmax.f32 %v1133_v56, 0.0 }
 0x12f   : > { %v1098_v61 = vpop.f32.mrf.mxu3 }
 0x130   : > { %1264 = vst [vmem:[%s2095_s27 + $0x78] sm:$0xff] %v1232_v58  ;;  %v1099_v63 = vadd.f32 %v1098_v61, %v1010_v60 }
 0x131   : > { %v1078_v62 = vpop.f32.mrf.mxu2  ;;  %v902_v3 = vpop.f32.mrf.mxu0 }
 0x132   : > { %v1079_v1 = vadd.f32 %v1078_v62, %v990_v59  ;;  %v1142_v4 = vadd.f32 %v2088_v8, %v1099_v63  ;;  %v991_v5 = vpop.f32.mrf.mxu1 }
 0x133   : > { %v992_v7 = vadd.f32 %v991_v5, %v902_v3 }
 0x134   : > { %v1134_v6 = vadd.f32 %v2088_v8, %v1079_v1  ;;  %v1241_v9 = vmax.f32 %v1142_v4, 0.0  ;;  %v1022_v1 = vadd.f32 %v2170_v30, %v2138_v18  ;;  %v1025_v18 = vadd.f32 %v2174_v41, %v2142_v31 }
 0x136   : > { %v1233_v10 = vmax.f32 %v1134_v6, 0.0  ;;  %1273 = vst [vmem:[%s2095_s27 + $0xc0] sm:$0xff] %v1241_v9 }
 0x137   : > { %v1100_v48 = vpop.f32.mrf.mxu3 }
 0x138   : > { %1265 = vst [vmem:[%s2095_s27 + $0x80] sm:$0xff] %v1233_v10  ;;  %v1101_v14 = vadd.f32 %v1100_v48, %v1012_v11 }
 0x139   : > { %v1080_v13 = vpop.f32.mrf.mxu2  ;;  %v905_v16 = vpop.f32.mrf.mxu0 }
 0x13a   : > { %v1081_v15 = vadd.f32 %v1080_v13, %v992_v7  ;;  %v1143_v17 = vadd.f32 %v2088_v8, %v1101_v14  ;;  %v994_v19 = vpop.f32.mrf.mxu1 }
 0x13b   : > { %v995_v23 = vadd.f32 %v994_v19, %v905_v16 }
 0x13c   : > { %v1135_v20 = vadd.f32 %v2088_v8, %v1081_v15  ;;  %v1242_v22 = vmax.f32 %v1143_v17, 0.0 }
 0x13e   : > { %v1234_v24 = vmax.f32 %v1135_v20, 0.0  ;;  %1274 = vst [vmem:[%s2095_s27 + $0xc8] sm:$0xff] %v1242_v22 }
 0x13f   : > { %v1103_v57 = vpop.f32.mrf.mxu3 }
 0x140   : > { %1266 = vst [vmem:[%s2095_s27 + $0x88] sm:$0xff] %v1234_v24  ;;  %v1104_v27 = vadd.f32 %v1103_v57, %v1015_v25  ;;  %v1027_v25 = vadd.f32 %v2178_v50, %v2146_v40 }
 0x141   : > { %v1083_v26 = vpop.f32.mrf.mxu2  ;;  %v907_v29 = vpop.f32.mrf.mxu0 }
 0x142   : > { %v1084_v28 = vadd.f32 %v1083_v26, %v995_v23  ;;  %v1144_v32 = vadd.f32 %v2088_v8, %v1104_v27  ;;  %v996_v33 = vpop.f32.mrf.mxu1 }
 0x143   : > { %v997_v36 = vadd.f32 %v996_v33, %v907_v29 }
 0x144   : > { %v1136_v34 = vadd.f32 %v2088_v8, %v1084_v28  ;;  %v1243_v35 = vmax.f32 %v1144_v32, 0.0 }
 0x146   : > { %v1235_v37 = vmax.f32 %v1136_v34, 0.0  ;;  %1275 = vst [vmem:[%s2095_s27 + $0xd0] sm:$0xff] %v1243_v35 }
 0x147   : > { %v1105_v2 = vpop.f32.mrf.mxu3 }
 0x148   : > { %1267 = vst [vmem:[%s2095_s27 + $0x90] sm:$0xff] %v1235_v37  ;;  %v1106_v42 = vadd.f32 %v1105_v2, %v1017_v38 }
 0x149   : > { %v1085_v39 = vpop.f32.mrf.mxu2  ;;  %v910_v44 = vpop.f32.mrf.mxu0 }
 0x14a   : > { %v1086_v43 = vadd.f32 %v1085_v39, %v997_v36  ;;  %v1145_v45 = vadd.f32 %v2088_v8, %v1106_v42  ;;  %v999_v46 = vpop.f32.mrf.mxu1 }
 0x14b   : > { %v1000_v53 = vadd.f32 %v999_v46, %v910_v44 }
 0x14c   : > { %v1137_v47 = vadd.f32 %v2088_v8, %v1086_v43  ;;  %v1244_v49 = vmax.f32 %v1145_v45, 0.0 }
 0x14e   : > { %v1236_v51 = vmax.f32 %v1137_v47, 0.0  ;;  %1276 = vst [vmem:[%s2095_s27 + $0xd8] sm:$0xff] %v1244_v49 }
 0x14f   : > { %v1108_v12 = vpop.f32.mrf.mxu3 }
 0x150   : > { %1268 = vst [vmem:[%s2095_s27 + $0x98] sm:$0xff] %v1236_v51  ;;  %v1109_v55 = vadd.f32 %v1108_v12, %v1020_v52 }
 0x151   : > { %v1088_v54 = vpop.f32.mrf.mxu2  ;;  %v912_v58 = vpop.f32.mrf.mxu0 }
 0x152   : > { %v1089_v56 = vadd.f32 %v1088_v54, %v1000_v53  ;;  %v1146_v59 = vadd.f32 %v2088_v8, %v1109_v55  ;;  %v1001_v60 = vpop.f32.mrf.mxu1 }
 0x153   : > { %v1002_v0 = vadd.f32 %v1001_v60, %v912_v58 }
 0x154   : > { %v1138_v61 = vadd.f32 %v2088_v8, %v1089_v56  ;;  %v1245_v62 = vmax.f32 %v1146_v59, 0.0 }
 0x156   : > { %v1237_v63 = vmax.f32 %v1138_v61, 0.0  ;;  %1277 = vst [vmem:[%s2095_s27 + $0xe0] sm:$0xff] %v1245_v62 }
 0x157   : > { %v1110_v21 = vpop.f32.mrf.mxu3 }
 0x158   : > { %1269 = vst [vmem:[%s2095_s27 + $0xa0] sm:$0xff] %v1237_v63  ;;  %v1111_v4 = vadd.f32 %v1110_v21, %v1022_v1 }
 0x159   : > { %v1090_v3 = vpop.f32.mrf.mxu2  ;;  %v915_v9 = vpop.f32.mrf.mxu0 }
 0x15a   : > { %v1091_v5 = vadd.f32 %v1090_v3, %v1002_v0  ;;  %v1147_v6 = vadd.f32 %v2088_v8, %v1111_v4  ;;  %v1004_v10 = vpop.f32.mrf.mxu1 }
 0x15b   : > { %v1005_v13 = vadd.f32 %v1004_v10, %v915_v9 }
 0x15c   : > { %v1139_v11 = vadd.f32 %v2088_v8, %v1091_v5  ;;  %v1246_v7 = vmax.f32 %v1147_v6, 0.0 }
 0x15e   : > { %v1238_v48 = vmax.f32 %v1139_v11, 0.0  ;;  %1278 = vst [vmem:[%s2095_s27 + $0xe8] sm:$0xff] %v1246_v7 }
 0x15f   : > { %v1113_v30 = vpop.f32.mrf.mxu3 }
 0x160   : > { %1270 = vst [vmem:[%s2095_s27 + $0xa8] sm:$0xff] %v1238_v48  ;;  %v1114_v15 = vadd.f32 %v1113_v30, %v1025_v18 }
 0x161   : > { %v1093_v14 = vpop.f32.mrf.mxu2  ;;  %v917_v22 = vpop.f32.mrf.mxu0 }
 0x162   : > { %v1094_v16 = vadd.f32 %v1093_v14, %v1005_v13  ;;  %v1148_v17 = vadd.f32 %v2088_v8, %v1114_v15  ;;  %v1006_v24 = vpop.f32.mrf.mxu1 }
 0x163   : > { %v1007_v31 = vadd.f32 %v1006_v24, %v917_v22 }
 0x164   : > { %v1140_v19 = vadd.f32 %v2088_v8, %v1094_v16  ;;  %v1247_v20 = vmax.f32 %v1148_v17, 0.0 }
 0x166   : > { %v1239_v23 = vmax.f32 %v1140_v19, 0.0  ;;  %1279 = vst [vmem:[%s2095_s27 + $0xf0] sm:$0xff] %v1247_v20 }
 0x167   : > { %v1115_v41 = vpop.f32.mrf.mxu3 }
 0x168   : > { %1271 = vst [vmem:[%s2095_s27 + $0xb0] sm:$0xff] %v1239_v23  ;;  %v1116_v26 = vadd.f32 %v1115_v41, %v1027_v25 }
 0x169   : > { %v1095_v57 = vpop.f32.mrf.mxu2 }
 0x16a   : > { %v1096_v27 = vadd.f32 %v1095_v57, %v1007_v31  ;;  %v1149_v28 = vadd.f32 %v2088_v8, %v1116_v26 }
 0x16c   : > { %v1141_v29 = vadd.f32 %v2088_v8, %v1096_v27  ;;  %v1248_v32 = vmax.f32 %v1149_v28, 0.0 }
 0x16e   : > { %v1240_v33 = vmax.f32 %v1141_v29, 0.0  ;;  %1280 = vst [vmem:[%s2095_s27 + $0xf8] sm:$0xff] %v1248_v32 }
 0x170   : > { %1272 = vst [vmem:[%s2095_s27 + $0xb8] sm:$0xff] %v1240_v33 }
 0x171 PF: > { %s13_s14 = sadd.s32 1, %s1840_s14   ;;  %s2243_s12 = smov %s1836_s13 }
 0x172   : > { %p10_p5 = scmp.ge.s32.totalorder %s13_s14, 7   ;;  %s2244_s13 = smov %s2246_s15 }
 0x174   :  { %12 = sbr.rel (!%p10_p5) target bundleno = 2 (0x2), region = 76 }

// kernel: bilinear_cnn_forward.12
= control target key start
LH: loop header
LB: loop body
LE: loop exit
PB: predicated region body
PF: predicated region fallthrough
CT: control target
= control target key end

     0   :  { %s2302_s1 = inlined_call_operand.vmem [shape: bf16[512,128], index: 1, kind: input, shape index: {}]   ;;  %s2303_s0 = inlined_call_operand.vmem [shape: bf16[248,512], index: 0, kind: input, shape index: {}]   ;;  %s2304_s2 = inlined_call_operand.vmem [shape: f32[1,128], index: 2, kind: input, shape index: {}]   ;;  %s2305_s3 = inlined_call_operand.vmem [shape: f32[248,128], index: 3, kind: output, shape index: {}]  }
   0x1   :  { %v1665_v0 = vld [vmem:[%s2302_s1 + $0x38] sm:$0xff]  ;;  %v1664_v4 = vld [vmem:[%s2302_s1 + $0x30] sm:$0xff]  ;;  %v1663_v8 = vld [vmem:[%s2302_s1 + $0x28] sm:$0xff] }
   0x2   :  { %v1673_v1 = vld [vmem:[%s2302_s1 + $0x78] sm:$0xff]  ;;  %716 = vmatpush.bf16.msra.mxu0 %v1665_v0  ;;  %v1672_v5 = vld [vmem:[%s2302_s1 + $0x70] sm:$0xff]  ;;  %v1671_v9 = vld [vmem:[%s2302_s1 + $0x68] sm:$0xff] }
   0x3   :  { %v1681_v2 = vld [vmem:[%s2302_s1 + $0xb8] sm:$0xff]  ;;  %804 = vmatpush.bf16.msra.mxu1 %v1673_v1  ;;  %v1680_v6 = vld [vmem:[%s2302_s1 + $0xb0] sm:$0xff]  ;;  %v1679_v10 = vld [vmem:[%s2302_s1 + $0xa8] sm:$0xff] }
   0x4   :  { %v1689_v3 = vld [vmem:[%s2302_s1 + $0xf8] sm:$0xff]  ;;  %892 = vmatpush.bf16.msra.mxu2 %v1681_v2  ;;  %v1688_v7 = vld [vmem:[%s2302_s1 + $0xf0] sm:$0xff]  ;;  %v1687_v11 = vld [vmem:[%s2302_s1 + $0xe8] sm:$0xff] }
   0x5   :  { %980 = vmatpush.bf16.msra.mxu3 %v1689_v3  ;;  %v1662_v12 = vld [vmem:[%s2302_s1 + $0x20] sm:$0xff]  ;;  %v1661_v16 = vld [vmem:[%s2302_s1 + $0x18] sm:$0xff]  ;;  %v1660_v20 = vld [vmem:[%s2302_s1 + $0x10] sm:$0xff] }
   0x6   :  { %717 = vmatpush.bf16.msra.mxu0 %v1664_v4  ;;  %v1670_v13 = vld [vmem:[%s2302_s1 + $0x60] sm:$0xff]  ;;  %v1669_v17 = vld [vmem:[%s2302_s1 + $0x58] sm:$0xff]  ;;  %v1668_v21 = vld [vmem:[%s2302_s1 + $0x50] sm:$0xff] }
   0x7   :  { %805 = vmatpush.bf16.msra.mxu1 %v1672_v5  ;;  %v1678_v14 = vld [vmem:[%s2302_s1 + $0xa0] sm:$0xff]  ;;  %v1677_v18 = vld [vmem:[%s2302_s1 + $0x98] sm:$0xff]  ;;  %v1676_v22 = vld [vmem:[%s2302_s1 + $0x90] sm:$0xff] }
   0x8   :  { %893 = vmatpush.bf16.msra.mxu2 %v1680_v6  ;;  %v1686_v15 = vld [vmem:[%s2302_s1 + $0xe0] sm:$0xff]  ;;  %v1685_v19 = vld [vmem:[%s2302_s1 + $0xd8] sm:$0xff]  ;;  %v1684_v23 = vld [vmem:[%s2302_s1 + $0xd0] sm:$0xff] }
   0x9   :  { %981 = vmatpush.bf16.msra.mxu3 %v1688_v7  ;;  %v1659_v24 = vld [vmem:[%s2302_s1 + $0x8] sm:$0xff]  ;;  %v1658_v28 = vld [vmem:[%s2302_s1] sm:$0xff]  ;;  %v1600_v33 = vld [vmem:[%s2303_s0 + $0xc] sm:$0xf0] }
   0xa   :  { %718 = vmatpush.bf16.msra.mxu0 %v1663_v8  ;;  %v1667_v25 = vld [vmem:[%s2302_s1 + $0x48] sm:$0xff]  ;;  %v1666_v29 = vld [vmem:[%s2302_s1 + $0x40] sm:$0xff]  ;;  %v1234_v35 = vld [vmem:[%s2303_s0 + $0x10] sm:$0xf0] }
   0xb   :  { %806 = vmatpush.bf16.msra.mxu1 %v1671_v9  ;;  %v1675_v26 = vld [vmem:[%s2302_s1 + $0x88] sm:$0xff]  ;;  %v1674_v30 = vld [vmem:[%s2302_s1 + $0x80] sm:$0xff]  ;;  %v1601_v37 = vld [vmem:[%s2303_s0 + $0x14] sm:$0xf0] }
   0xc   :  { %894 = vmatpush.bf16.msra.mxu2 %v1679_v10  ;;  %v1683_v27 = vld [vmem:[%s2302_s1 + $0xc8] sm:$0xff]  ;;  %v1682_v31 = vld [vmem:[%s2302_s1 + $0xc0] sm:$0xff]  ;;  %v1242_v39 = vld [vmem:[%s2303_s0 + $0x18] sm:$0xf0] }
   0xd   :  { %982 = vmatpush.bf16.msra.mxu3 %v1687_v11  ;;  %v1232_v32 = vld [vmem:[%s2303_s0] sm:$0xf]  ;;  %v1598_v34 = vld [vmem:[%s2303_s0 + $0x4] sm:$0xf]  ;;  %v1240_v36 = vld [vmem:[%s2303_s0 + $0x8] sm:$0xf] }
   0xe   :  { %719 = vmatpush.bf16.msra.mxu0 %v1662_v12  ;;  %v1599_v38 = vld [vmem:[%s2303_s0 + $0xc] sm:$0xf]  ;;  %v1233_v40 = vor.u32 %v1600_v33, %v1232_v32  ;;  %v1237_v41 = vor.u32 %v1598_v34, %v1234_v35  ;;  %v1241_v42 = vor.u32 %v1601_v37, %v1240_v36  ;;  %v1248_v44 = vld [vmem:[%s2303_s0 + $0x20] sm:$0xf]  ;;  %v1604_v45 = vld [vmem:[%s2303_s0 + $0x2c] sm:$0xf0] }
   0xf   :  { %807 = vmatpush.bf16.msra.mxu1 %v1670_v13  ;;  %v1245_v43 = vor.u32 %v1599_v38, %v1242_v39  ;;  %v1602_v46 = vld [vmem:[%s2303_s0 + $0x24] sm:$0xf]  ;;  %v1250_v47 = vld [vmem:[%s2303_s0 + $0x30] sm:$0xf0]  ;;  %v1256_v48 = vld [vmem:[%s2303_s0 + $0x28] sm:$0xf]  ;;  %v1249_v52 = vor.u32 %v1604_v45, %v1248_v44 }
  0x10   :  { %895 = vmatpush.bf16.msra.mxu2 %v1678_v14  ;;  %v1605_v49 = vld [vmem:[%s2303_s0 + $0x34] sm:$0xf0]  ;;  %v1603_v50 = vld [vmem:[%s2303_s0 + $0x2c] sm:$0xf]  ;;  %v1258_v51 = vld [vmem:[%s2303_s0 + $0x38] sm:$0xf0]  ;;  %v1253_v53 = vor.u32 %v1602_v46, %v1250_v47 }
  0x11   :  { %983 = vmatpush.bf16.msra.mxu3 %v1686_v15  ;;  %v1257_v54 = vor.u32 %v1605_v49, %v1256_v48  ;;  %v1261_v55 = vor.u32 %v1603_v50, %v1258_v51  ;;  %v1264_v56 = vld [vmem:[%s2303_s0 + $0x40] sm:$0xf]  ;;  %v1608_v57 = vld [vmem:[%s2303_s0 + $0x4c] sm:$0xf0]  ;;  %v1606_v58 = vld [vmem:[%s2303_s0 + $0x44] sm:$0xf] }
  0x12   :  { %720 = vmatpush.bf16.msra.mxu0 %v1661_v16  ;;  %v1266_v59 = vld [vmem:[%s2303_s0 + $0x50] sm:$0xf0]  ;;  %v1272_v60 = vld [vmem:[%s2303_s0 + $0x48] sm:$0xf]  ;;  %v1609_v61 = vld [vmem:[%s2303_s0 + $0x54] sm:$0xf0]  ;;  %v1265_v0 = vor.u32 %v1608_v57, %v1264_v56 }
  0x13   :  { %808 = vmatpush.bf16.msra.mxu1 %v1669_v17  ;;  %v1607_v62 = vld [vmem:[%s2303_s0 + $0x4c] sm:$0xf]  ;;  %v1274_v63 = vld [vmem:[%s2303_s0 + $0x58] sm:$0xf0]  ;;  %v1269_v1 = vor.u32 %v1606_v58, %v1266_v59  ;;  %v1273_v2 = vor.u32 %v1609_v61, %v1272_v60  ;;  %v1280_v4 = vld [vmem:[%s2303_s0 + $0x60] sm:$0xf] }
  0x14   :  { %896 = vmatpush.bf16.msra.mxu2 %v1677_v18  ;;  %v1277_v3 = vor.u32 %v1607_v62, %v1274_v63  ;;  %v1612_v5 = vld [vmem:[%s2303_s0 + $0x6c] sm:$0xf0]  ;;  %v1610_v6 = vld [vmem:[%s2303_s0 + $0x64] sm:$0xf]  ;;  %v1282_v7 = vld [vmem:[%s2303_s0 + $0x70] sm:$0xf0] }
  0x15   :  { %984 = vmatpush.bf16.msra.mxu3 %v1685_v19  ;;  %v1288_v8 = vld [vmem:[%s2303_s0 + $0x68] sm:$0xf]  ;;  %v1613_v9 = vld [vmem:[%s2303_s0 + $0x74] sm:$0xf0]  ;;  %v1611_v10 = vld [vmem:[%s2303_s0 + $0x6c] sm:$0xf]  ;;  %v1281_v12 = vor.u32 %v1612_v5, %v1280_v4  ;;  %v1285_v13 = vor.u32 %v1610_v6, %v1282_v7 }
  0x16   :  { %721 = vmatpush.bf16.msra.mxu0 %v1660_v20  ;;  %v1290_v11 = vld [vmem:[%s2303_s0 + $0x78] sm:$0xf0]  ;;  %v1289_v14 = vor.u32 %v1613_v9, %v1288_v8  ;;  %v1296_v16 = vld [vmem:[%s2303_s0 + $0x80] sm:$0xf]  ;;  %v1616_v17 = vld [vmem:[%s2303_s0 + $0x8c] sm:$0xf0] }
  0x17   :  { %809 = vmatpush.bf16.msra.mxu1 %v1668_v21  ;;  %v1293_v15 = vor.u32 %v1611_v10, %v1290_v11  ;;  %v1614_v18 = vld [vmem:[%s2303_s0 + $0x84] sm:$0xf]  ;;  %v1298_v19 = vld [vmem:[%s2303_s0 + $0x90] sm:$0xf0]  ;;  %v1304_v20 = vld [vmem:[%s2303_s0 + $0x88] sm:$0xf] }
  0x18   :  { %897 = vmatpush.bf16.msra.mxu2 %v1676_v22  ;;  %v1617_v21 = vld [vmem:[%s2303_s0 + $0x94] sm:$0xf0]  ;;  %v1615_v22 = vld [vmem:[%s2303_s0 + $0x8c] sm:$0xf]  ;;  %v1320_v32 = vld [vmem:[%s2303_s0 + $0xa8] sm:$0xf] }
  0x19   :  { %985 = vmatpush.bf16.msra.mxu3 %v1684_v23  ;;  %v1306_v23 = vld [vmem:[%s2303_s0 + $0x98] sm:$0xf0]  ;;  %v1621_v33 = vld [vmem:[%s2303_s0 + $0xb4] sm:$0xf0]  ;;  %v1619_v34 = vld [vmem:[%s2303_s0 + $0xac] sm:$0xf] }
  0x1a   :  { %722 = vmatpush.bf16.msra.mxu0 %v1659_v24  ;;  %v1297_v24 = vor.u32 %v1616_v17, %v1296_v16  ;;  %v1322_v35 = vld [vmem:[%s2303_s0 + $0xb8] sm:$0xf0]  ;;  %v1321_v38 = vor.u32 %v1621_v33, %v1320_v32  ;;  %v1336_v44 = vld [vmem:[%s2303_s0 + $0xc8] sm:$0xf]  ;;  %v1625_v45 = vld [vmem:[%s2303_s0 + $0xd4] sm:$0xf0] }
  0x1b   :  { %810 = vmatpush.bf16.msra.mxu1 %v1667_v25  ;;  %v1301_v25 = vor.u32 %v1614_v18, %v1298_v19  ;;  %v1325_v39 = vor.u32 %v1619_v34, %v1322_v35  ;;  %v1623_v46 = vld [vmem:[%s2303_s0 + $0xcc] sm:$0xf]  ;;  %v1338_v47 = vld [vmem:[%s2303_s0 + $0xd8] sm:$0xf0]  ;;  %v1337_v50 = vor.u32 %v1625_v45, %v1336_v44  ;;  %v1352_v56 = vld [vmem:[%s2303_s0 + $0xe8] sm:$0xf] }
  0x1c   :  { %898 = vmatpush.bf16.msra.mxu2 %v1675_v26  ;;  %v1305_v26 = vor.u32 %v1617_v21, %v1304_v20  ;;  %v1341_v51 = vor.u32 %v1623_v46, %v1338_v47  ;;  %v1629_v57 = vld [vmem:[%s2303_s0 + $0xf4] sm:$0xf0]  ;;  %v1627_v58 = vld [vmem:[%s2303_s0 + $0xec] sm:$0xf]  ;;  %v1354_v59 = vld [vmem:[%s2303_s0 + $0xf8] sm:$0xf0] }
  0x1d   :  { %986 = vmatpush.bf16.msra.mxu3 %v1683_v27  ;;  %v1309_v27 = vor.u32 %v1615_v22, %v1306_v23  ;;  %v1353_v62 = vor.u32 %v1629_v57, %v1352_v56  ;;  %v1357_v63 = vor.u32 %v1627_v58, %v1354_v59  ;;  %v1368_v4 = vld [vmem:[%s2303_s0 + $0x108] sm:$0xf]  ;;  %v1633_v5 = vld [vmem:[%s2303_s0 + $0x114] sm:$0xf0]  ;;  %v1631_v6 = vld [vmem:[%s2303_s0 + $0x10c] sm:$0xf] }
  0x1e   :  { %723 = vmatpush.bf16.msra.mxu0 %v1658_v28  ;;  %v1312_v28 = vld [vmem:[%s2303_s0 + $0xa0] sm:$0xf]  ;;  %v1370_v7 = vld [vmem:[%s2303_s0 + $0x118] sm:$0xf0]  ;;  %v1636_v23 = vld [vmem:[%s2303_s0 + $0x12c] sm:$0xf0] }
  0x1f   :  { %811 = vmatpush.bf16.msra.mxu1 %v1666_v29  ;;  %v1620_v29 = vld [vmem:[%s2303_s0 + $0xac] sm:$0xf0]  ;;  %v2026_v18 = vld [vmem:[%s2304_s2] ss:$0 sm:$0xff]  ;;  %v1394_v56 = vld [vmem:[%s2303_s0 + $0x150] sm:$0xf0] }
  0x20   :  { %899 = vmatpush.bf16.msra.mxu2 %v1674_v30  ;;  %v1618_v30 = vld [vmem:[%s2303_s0 + $0xa4] sm:$0xf]  ;;  %v1313_v36 = vor.u32 %v1620_v29, %v1312_v28  ;;  %v1376_v22 = vld [vmem:[%s2303_s0 + $0x120] sm:$0xf]  ;;  %v1637_v28 = vld [vmem:[%s2303_s0 + $0x134] sm:$0xf0] }
  0x21   :  { %987 = vmatpush.bf16.msra.mxu3 %v1682_v31  ;;  %724 = vmatmul.bf16.vlgmr.msra.gmra.mxu0 %v1233_v40  ;;  %v1314_v31 = vld [vmem:[%s2303_s0 + $0xb0] sm:$0xf0]  ;;  %v1328_v40 = vld [vmem:[%s2303_s0 + $0xc0] sm:$0xf]  ;;  %v1635_v29 = vld [vmem:[%s2303_s0 + $0x12c] sm:$0xf]  ;;  %v1377_v35 = vor.u32 %v1636_v23, %v1376_v22 }
  0x22   :  { %812 = vmatmul.bf16.vlgmr.msra.gmra.mxu1 %v1237_v41  ;;  %v1317_v37 = vor.u32 %v1618_v30, %v1314_v31  ;;  %v1624_v41 = vld [vmem:[%s2303_s0 + $0xcc] sm:$0xf0]  ;;  %v1386_v30 = vld [vmem:[%s2303_s0 + $0x138] sm:$0xf0]  ;;  %v1400_v57 = vld [vmem:[%s2303_s0 + $0x148] sm:$0xf] }
  0x23   :  { %900 = vmatmul.bf16.vlgmr.msra.gmra.mxu2 %v1241_v42  ;;  %v1622_v42 = vld [vmem:[%s2303_s0 + $0xc4] sm:$0xf]  ;;  %v1329_v48 = vor.u32 %v1624_v41, %v1328_v40  ;;  %v1389_v41 = vor.u32 %v1635_v29, %v1386_v30  ;;  %v1641_v58 = vld [vmem:[%s2303_s0 + $0x154] sm:$0xf0]  ;;  %v1639_v59 = vld [vmem:[%s2303_s0 + $0x14c] sm:$0xf] }
  0x24   :  { %988 = vmatmul.bf16.vlgmr.msra.gmra.mxu3 %v1245_v43  ;;  %v1330_v43 = vld [vmem:[%s2303_s0 + $0xd0] sm:$0xf0]  ;;  %v1642_v22 = vld [vmem:[%s2303_s0 + $0x164] sm:$0xf] }
  0x25   :  { %v1333_v49 = vor.u32 %v1622_v42, %v1330_v43  ;;  %v1410_v23 = vld [vmem:[%s2303_s0 + $0x170] sm:$0xf0] }
  0x31   :  { %729 = vmatmul.bf16.gmra.mxu0 %v1249_v52  ;;  %v1344_v52 = vld [vmem:[%s2303_s0 + $0xe0] sm:$0xf] }
  0x32   :  { %817 = vmatmul.bf16.gmra.mxu1 %v1253_v53  ;;  %v1628_v53 = vld [vmem:[%s2303_s0 + $0xec] sm:$0xf0] }
  0x33   :  { %905 = vmatmul.bf16.gmra.mxu2 %v1257_v54  ;;  %v1626_v54 = vld [vmem:[%s2303_s0 + $0xe4] sm:$0xf]  ;;  %v1345_v60 = vor.u32 %v1628_v53, %v1344_v52  ;;  %v1392_v52 = vld [vmem:[%s2303_s0 + $0x140] sm:$0xf]  ;;  %v1640_v53 = vld [vmem:[%s2303_s0 + $0x14c] sm:$0xf0] }
  0x34   :  { %993 = vmatmul.bf16.gmra.mxu3 %v1261_v55  ;;  %v1346_v55 = vld [vmem:[%s2303_s0 + $0xf0] sm:$0xf0] }
  0x35   :  { %v1349_v61 = vor.u32 %v1626_v54, %v1346_v55  ;;  %v1638_v55 = vld [vmem:[%s2303_s0 + $0x144] sm:$0xf] }
  0x41   :  { %734 = vmatmul.bf16.gmra.mxu0 %v1265_v0  ;;  %v1360_v0 = vld [vmem:[%s2303_s0 + $0x100] sm:$0xf] }
  0x42   :  { %822 = vmatmul.bf16.gmra.mxu1 %v1269_v1  ;;  %v1632_v1 = vld [vmem:[%s2303_s0 + $0x10c] sm:$0xf0] }
  0x43   :  { %910 = vmatmul.bf16.gmra.mxu2 %v1273_v2  ;;  %v1630_v2 = vld [vmem:[%s2303_s0 + $0x104] sm:$0xf]  ;;  %v1361_v8 = vor.u32 %v1632_v1, %v1360_v0  ;;  %v1393_v1 = vor.u32 %v1640_v53, %v1392_v52  ;;  %v1426_v53 = vld [vmem:[%s2303_s0 + $0x190] sm:$0xf0] }
  0x44   :  { %998 = vmatmul.bf16.gmra.mxu3 %v1277_v3  ;;  %v1362_v3 = vld [vmem:[%s2303_s0 + $0x110] sm:$0xf0]  ;;  %v1646_v52 = vld [vmem:[%s2303_s0 + $0x184] sm:$0xf] }
  0x45   :  { %v1365_v9 = vor.u32 %v1630_v2, %v1362_v3  ;;  %v1397_v2 = vor.u32 %v1638_v55, %v1394_v56  ;;  %v1649_v55 = vld [vmem:[%s2303_s0 + $0x194] sm:$0xf0]  ;;  %v1647_v56 = vld [vmem:[%s2303_s0 + $0x18c] sm:$0xf] }
  0x51   :  { %739 = vmatmul.bf16.gmra.mxu0 %v1281_v12  ;;  %v1369_v12 = vor.u32 %v1633_v5, %v1368_v4 }
  0x52   :  { %827 = vmatmul.bf16.gmra.mxu1 %v1285_v13  ;;  %v1373_v13 = vor.u32 %v1631_v6, %v1370_v7  ;;  %v1401_v6 = vor.u32 %v1641_v58, %v1400_v57  ;;  %v1434_v57 = vld [vmem:[%s2303_s0 + $0x198] sm:$0xf0] }
  0x53   :  { %915 = vmatmul.bf16.gmra.mxu2 %v1289_v14 }
  0x54   :  { %1003 = vmatmul.bf16.gmra.mxu3 %v1293_v15 }
  0x61   :  { %744 = vmatmul.bf16.gmra.mxu0 %v1297_v24 }
  0x62   :  { %832 = vmatmul.bf16.gmra.mxu1 %v1301_v25  ;;  %v1634_v25 = vld [vmem:[%s2303_s0 + $0x124] sm:$0xf] }
  0x63   :  { %920 = vmatmul.bf16.gmra.mxu2 %v1305_v26  ;;  %v1378_v26 = vld [vmem:[%s2303_s0 + $0x130] sm:$0xf0] }
  0x64   :  { %1008 = vmatmul.bf16.gmra.mxu3 %v1309_v27  ;;  %v1384_v27 = vld [vmem:[%s2303_s0 + $0x128] sm:$0xf] }
  0x65   :  { %v1385_v40 = vor.u32 %v1637_v28, %v1384_v27  ;;  %v1418_v27 = vld [vmem:[%s2303_s0 + $0x178] sm:$0xf0] }
  0x71   :  { %749 = vmatmul.bf16.gmra.mxu0 %v1313_v36  ;;  %v1381_v36 = vor.u32 %v1634_v25, %v1378_v26  ;;  %v1645_v25 = vld [vmem:[%s2303_s0 + $0x174] sm:$0xf0]  ;;  %v1643_v26 = vld [vmem:[%s2303_s0 + $0x16c] sm:$0xf] }
  0x72   :  { %837 = vmatmul.bf16.gmra.mxu1 %v1317_v37 }
  0x73   :  { %925 = vmatmul.bf16.gmra.mxu2 %v1321_v38 }
  0x74   :  { %1013 = vmatmul.bf16.gmra.mxu3 %v1325_v39 }
  0x81   :  { %754 = vmatmul.bf16.gmra.mxu0 %v1329_v48 }
  0x82   :  { %842 = vmatmul.bf16.gmra.mxu1 %v1333_v49 }
  0x83   :  { %930 = vmatmul.bf16.gmra.mxu2 %v1337_v50 }
  0x84   :  { %1018 = vmatmul.bf16.gmra.mxu3 %v1341_v51 }
  0x91   :  { %759 = vmatmul.bf16.gmra.mxu0 %v1345_v60  ;;  %v1402_v60 = vld [vmem:[%s2303_s0 + $0x158] sm:$0xf0] }
  0x92   :  { %847 = vmatmul.bf16.gmra.mxu1 %v1349_v61  ;;  %v1405_v7 = vor.u32 %v1639_v59, %v1402_v60 }
  0x93   :  { %935 = vmatmul.bf16.gmra.mxu2 %v1353_v62 }
  0x94   :  { %1023 = vmatmul.bf16.gmra.mxu3 %v1357_v63 }
  0x9e   :  { %v725_v10 = vpop.f32.mrf.mxu0 }
  0x9f   :  { %v813_v11 = vpop.f32.mrf.mxu1 }
  0xa0   :  { %v814_v14 = vadd.f32 %v813_v11, %v725_v10 }
  0xa1   :  { %764 = vmatmul.bf16.gmra.mxu0 %v1361_v8 }
  0xa2   :  { %852 = vmatmul.bf16.gmra.mxu1 %v1365_v9 }
  0xa3   :  { %940 = vmatmul.bf16.gmra.mxu2 %v1369_v12 }
  0xa4   :  { %1028 = vmatmul.bf16.gmra.mxu3 %v1373_v13 }
  0xa6   :  { %v901_v15 = vpop.f32.mrf.mxu2  ;;  %v727_v19 = vpop.f32.mrf.mxu0 }
  0xa7   :  { %v989_v16 = vpop.f32.mrf.mxu3  ;;  %v902_v17 = vadd.f32 %v901_v15, %v814_v14  ;;  %v815_v20 = vpop.f32.mrf.mxu1 }
  0xa8   :  { %v816_v32 = vadd.f32 %v815_v20, %v727_v19  ;;  %v1408_v19 = vld [vmem:[%s2303_s0 + $0x160] sm:$0xf]  ;;  %v1644_v20 = vld [vmem:[%s2303_s0 + $0x16c] sm:$0xf0] }
  0xa9   :  { %v990_v21 = vadd.f32 %v989_v16, %v902_v17 }
  0xab   :  { %v1068_v24 = vadd.f32 %v2026_v18, %v990_v21 }
  0xad   :  { %v1164_v31 = vmax.f32 %v1068_v24, 0.0  ;;  %v1416_v24 = vld [vmem:[%s2303_s0 + $0x168] sm:$0xf] }
  0xae   :  { %v903_v33 = vpop.f32.mrf.mxu2  ;;  %v730_v38 = vpop.f32.mrf.mxu0 }
  0xaf   :  { %v991_v34 = vpop.f32.mrf.mxu3  ;;  %1195 = vst [vmem:[%s2305_s3] sm:$0xff] %v1164_v31  ;;  %v904_v37 = vadd.f32 %v903_v33, %v816_v32  ;;  %v818_v39 = vpop.f32.mrf.mxu1  ;;  %v1409_v32 = vor.u32 %v1644_v20, %v1408_v19  ;;  %v1413_v33 = vor.u32 %v1642_v22, %v1410_v23  ;;  %v1650_v19 = vld [vmem:[%s2303_s0 + $0x1a4] sm:$0xf]  ;;  %v1442_v20 = vld [vmem:[%s2303_s0 + $0x1b0] sm:$0xf0]  ;;  %v1653_v22 = vld [vmem:[%s2303_s0 + $0x1b4] sm:$0xf0] }
  0xb0   :  { %v819_v44 = vadd.f32 %v818_v39, %v730_v38  ;;  %v1421_v38 = vor.u32 %v1643_v26, %v1418_v27  ;;  %v1651_v23 = vld [vmem:[%s2303_s0 + $0x1ac] sm:$0xf] }
  0xb1   :  { %v992_v42 = vadd.f32 %v991_v34, %v904_v37  ;;  %769 = vmatmul.bf16.gmra.mxu0 %v1377_v35  ;;  %v1417_v37 = vor.u32 %v1645_v25, %v1416_v24  ;;  %v1450_v24 = vld [vmem:[%s2303_s0 + $0x1b8] sm:$0xf0] }
  0xb2   :  { %857 = vmatmul.bf16.gmra.mxu1 %v1381_v36 }
  0xb3   :  { %v1069_v43 = vadd.f32 %v2026_v18, %v992_v42  ;;  %945 = vmatmul.bf16.gmra.mxu2 %v1385_v40 }
  0xb4   :  { %1033 = vmatmul.bf16.gmra.mxu3 %v1389_v41 }
  0xb5   :  { %v1165_v45 = vmax.f32 %v1069_v43, 0.0 }
  0xb6   :  { %v906_v46 = vpop.f32.mrf.mxu2  ;;  %v732_v49 = vpop.f32.mrf.mxu0 }
  0xb7   :  { %v994_v47 = vpop.f32.mrf.mxu3  ;;  %1196 = vst [vmem:[%s2305_s3 + $0x8] sm:$0xff] %v1165_v45  ;;  %v907_v48 = vadd.f32 %v906_v46, %v819_v44  ;;  %v820_v50 = vpop.f32.mrf.mxu1 }
  0xb8   :  { %v821_v62 = vadd.f32 %v820_v50, %v732_v49  ;;  %v1424_v49 = vld [vmem:[%s2303_s0 + $0x180] sm:$0xf]  ;;  %v1648_v50 = vld [vmem:[%s2303_s0 + $0x18c] sm:$0xf0] }
  0xb9   :  { %v995_v51 = vadd.f32 %v994_v47, %v907_v48 }
  0xbb   :  { %v1070_v54 = vadd.f32 %v2026_v18, %v995_v51 }
  0xbd   :  { %v1166_v61 = vmax.f32 %v1070_v54, 0.0  ;;  %v1432_v54 = vld [vmem:[%s2303_s0 + $0x188] sm:$0xf] }
  0xbe   :  { %v908_v63 = vpop.f32.mrf.mxu2  ;;  %v735_v4 = vpop.f32.mrf.mxu0 }
  0xbf   :  { %v996_v0 = vpop.f32.mrf.mxu3  ;;  %1197 = vst [vmem:[%s2305_s3 + $0x10] sm:$0xff] %v1166_v61  ;;  %v909_v3 = vadd.f32 %v908_v63, %v821_v62  ;;  %v823_v5 = vpop.f32.mrf.mxu1  ;;  %v1425_v62 = vor.u32 %v1648_v50, %v1424_v49  ;;  %v1429_v63 = vor.u32 %v1646_v52, %v1426_v53  ;;  %v1654_v49 = vld [vmem:[%s2303_s0 + $0x1c4] sm:$0xf]  ;;  %v1458_v50 = vld [vmem:[%s2303_s0 + $0x1d0] sm:$0xf0] }
  0xc0   :  { %v824_v10 = vadd.f32 %v823_v5, %v735_v4  ;;  %v1437_v4 = vor.u32 %v1647_v56, %v1434_v57  ;;  %v1657_v52 = vld [vmem:[%s2303_s0 + $0x1d4] sm:$0xf0]  ;;  %v1655_v53 = vld [vmem:[%s2303_s0 + $0x1cc] sm:$0xf] }
  0xc1   :  { %v997_v8 = vadd.f32 %v996_v0, %v909_v3  ;;  %774 = vmatmul.bf16.gmra.mxu0 %v1393_v1  ;;  %v1433_v3 = vor.u32 %v1649_v55, %v1432_v54  ;;  %v1466_v54 = vld [vmem:[%s2303_s0 + $0x1d8] sm:$0xf0] }
  0xc2   :  { %862 = vmatmul.bf16.gmra.mxu1 %v1397_v2 }
  0xc3   :  { %v1071_v9 = vadd.f32 %v2026_v18, %v997_v8  ;;  %950 = vmatmul.bf16.gmra.mxu2 %v1401_v6 }
  0xc4   :  { %1038 = vmatmul.bf16.gmra.mxu3 %v1405_v7 }
  0xc5   :  { %v1167_v11 = vmax.f32 %v1071_v9, 0.0 }
  0xc6   :  { %v911_v12 = vpop.f32.mrf.mxu2  ;;  %v737_v15 = vpop.f32.mrf.mxu0 }
  0xc7   :  { %v999_v13 = vpop.f32.mrf.mxu3  ;;  %1198 = vst [vmem:[%s2305_s3 + $0x18] sm:$0xff] %v1167_v11  ;;  %v912_v14 = vadd.f32 %v911_v12, %v824_v10  ;;  %v825_v16 = vpop.f32.mrf.mxu1 }
  0xc8   :  { %v826_v29 = vadd.f32 %v825_v16, %v737_v15  ;;  %v1440_v15 = vld [vmem:[%s2303_s0 + $0x1a0] sm:$0xf]  ;;  %v1652_v16 = vld [vmem:[%s2303_s0 + $0x1ac] sm:$0xf0] }
  0xc9   :  { %v1000_v17 = vadd.f32 %v999_v13, %v912_v14 }
  0xcb   :  { %v1072_v21 = vadd.f32 %v2026_v18, %v1000_v17 }
  0xcd   :  { %v1168_v28 = vmax.f32 %v1072_v21, 0.0  ;;  %v1448_v21 = vld [vmem:[%s2303_s0 + $0x1a8] sm:$0xf] }
  0xce   :  { %v913_v30 = vpop.f32.mrf.mxu2  ;;  %v740_v35 = vpop.f32.mrf.mxu0 }
  0xcf   :  { %v1001_v31 = vpop.f32.mrf.mxu3  ;;  %1199 = vst [vmem:[%s2305_s3 + $0x20] sm:$0xff] %v1168_v28  ;;  %v914_v34 = vadd.f32 %v913_v30, %v826_v29  ;;  %v828_v36 = vpop.f32.mrf.mxu1  ;;  %v1441_v29 = vor.u32 %v1652_v16, %v1440_v15  ;;  %v1445_v30 = vor.u32 %v1650_v19, %v1442_v20 }
  0xd0   :  { %v829_v41 = vadd.f32 %v828_v36, %v740_v35  ;;  %v1453_v35 = vor.u32 %v1651_v23, %v1450_v24 }
  0xd1   :  { %v1002_v39 = vadd.f32 %v1001_v31, %v914_v34  ;;  %779 = vmatmul.bf16.gmra.mxu0 %v1409_v32  ;;  %v1449_v34 = vor.u32 %v1653_v22, %v1448_v21 }
  0xd2   :  { %867 = vmatmul.bf16.gmra.mxu1 %v1413_v33 }
  0xd3   :  { %v1073_v40 = vadd.f32 %v2026_v18, %v1002_v39  ;;  %955 = vmatmul.bf16.gmra.mxu2 %v1417_v37 }
  0xd4   :  { %1043 = vmatmul.bf16.gmra.mxu3 %v1421_v38 }
  0xd5   :  { %v1169_v42 = vmax.f32 %v1073_v40, 0.0 }
  0xd6   :  { %v916_v43 = vpop.f32.mrf.mxu2  ;;  %v742_v46 = vpop.f32.mrf.mxu0 }
  0xd7   :  { %v1004_v44 = vpop.f32.mrf.mxu3  ;;  %1200 = vst [vmem:[%s2305_s3 + $0x28] sm:$0xff] %v1169_v42  ;;  %v917_v45 = vadd.f32 %v916_v43, %v829_v41  ;;  %v830_v47 = vpop.f32.mrf.mxu1 }
  0xd8   :  { %v831_v59 = vadd.f32 %v830_v47, %v742_v46  ;;  %v1456_v46 = vld [vmem:[%s2303_s0 + $0x1c0] sm:$0xf]  ;;  %v1656_v47 = vld [vmem:[%s2303_s0 + $0x1cc] sm:$0xf0] }
  0xd9   :  { %v1005_v48 = vadd.f32 %v1004_v44, %v917_v45 }
  0xdb   :  { %v1074_v51 = vadd.f32 %v2026_v18, %v1005_v48 }
  0xdd   :  { %v1170_v58 = vmax.f32 %v1074_v51, 0.0  ;;  %v1464_v51 = vld [vmem:[%s2303_s0 + $0x1c8] sm:$0xf] }
  0xde   :  { %v918_v60 = vpop.f32.mrf.mxu2  ;;  %v745_v1 = vpop.f32.mrf.mxu0 }
  0xdf   :  { %v1006_v61 = vpop.f32.mrf.mxu3  ;;  %1201 = vst [vmem:[%s2305_s3 + $0x30] sm:$0xff] %v1170_v58  ;;  %v919_v0 = vadd.f32 %v918_v60, %v831_v59  ;;  %v833_v2 = vpop.f32.mrf.mxu1  ;;  %v1457_v59 = vor.u32 %v1656_v47, %v1456_v46  ;;  %v1461_v60 = vor.u32 %v1654_v49, %v1458_v50 }
  0xe0   :  { %v834_v7 = vadd.f32 %v833_v2, %v745_v1  ;;  %v1469_v1 = vor.u32 %v1655_v53, %v1466_v54 }
  0xe1   :  { %v1007_v5 = vadd.f32 %v1006_v61, %v919_v0  ;;  %784 = vmatmul.bf16.gmra.mxu0 %v1425_v62  ;;  %v1465_v0 = vor.u32 %v1657_v52, %v1464_v51 }
  0xe2   :  { %872 = vmatmul.bf16.gmra.mxu1 %v1429_v63 }
  0xe3   :  { %v1075_v6 = vadd.f32 %v2026_v18, %v1007_v5  ;;  %960 = vmatmul.bf16.gmra.mxu2 %v1433_v3 }
  0xe4   :  { %1048 = vmatmul.bf16.gmra.mxu3 %v1437_v4 }
  0xe5   :  { %v1171_v8 = vmax.f32 %v1075_v6, 0.0 }
  0xe6   :  { %v921_v9 = vpop.f32.mrf.mxu2  ;;  %v747_v12 = vpop.f32.mrf.mxu0 }
  0xe7   :  { %v1009_v10 = vpop.f32.mrf.mxu3  ;;  %1202 = vst [vmem:[%s2305_s3 + $0x38] sm:$0xff] %v1171_v8  ;;  %v922_v11 = vadd.f32 %v921_v9, %v834_v7  ;;  %v835_v13 = vpop.f32.mrf.mxu1 }
  0xe8   :  { %v836_v26 = vadd.f32 %v835_v13, %v747_v12  ;;  %v145_v12 = vld [vmem:[%s2303_s0 + $0x1e8] sm:$0xff] }
  0xe9   :  { %v1010_v14 = vadd.f32 %v1009_v10, %v922_v11  ;;  %v144_v11 = vld [vmem:[%s2303_s0 + $0x1e0] sm:$0xff]  ;;  %v395_v19 = vunpack.c.h.b16 %v145_v12 }
  0xea   :  { %v393_v15 = vunpack.c.h.b16 %v144_v11 }
  0xeb   :  { %v1076_v17 = vadd.f32 %v2026_v18, %v1010_v14  ;;  %v392_v14 = vunpack.c.l.b16 %v144_v11 }
  0xed   :  { %v1172_v25 = vmax.f32 %v1076_v17, 0.0  ;;  %v394_v17 = vunpack.c.l.b16 %v145_v12  ;;  %v456_v24 = vpack.c.b16 %v392_v14, %v392_v14 }
  0xee   :  { %v923_v27 = vpop.f32.mrf.mxu2  ;;  %v750_v32 = vpop.f32.mrf.mxu0 }
  0xef   :  { %v1011_v28 = vpop.f32.mrf.mxu3  ;;  %1203 = vst [vmem:[%s2305_s3 + $0x40] sm:$0xff] %v1172_v25  ;;  %v924_v31 = vadd.f32 %v923_v27, %v836_v26  ;;  %v838_v33 = vpop.f32.mrf.mxu1  ;;  %v457_v25 = vpack.c.b16 %v393_v15, %v393_v15 }
  0xf0   :  { %v839_v38 = vadd.f32 %v838_v33, %v750_v32 }
  0xf1   :  { %v1012_v36 = vadd.f32 %v1011_v28, %v924_v31  ;;  %789 = vmatmul.bf16.gmra.mxu0 %v1441_v29  ;;  %v458_v29 = vpack.c.b16 %v394_v17, %v394_v17 }
  0xf2   :  { %877 = vmatmul.bf16.gmra.mxu1 %v1445_v30  ;;  %v459_v30 = vpack.c.b16 %v395_v19, %v395_v19 }
  0xf3   :  { %v1077_v37 = vadd.f32 %v2026_v18, %v1012_v36  ;;  %965 = vmatmul.bf16.gmra.mxu2 %v1449_v34 }
  0xf4   :  { %1053 = vmatmul.bf16.gmra.mxu3 %v1453_v35 }
  0xf5   :  { %v1173_v39 = vmax.f32 %v1077_v37, 0.0 }
  0xf6   :  { %v926_v40 = vpop.f32.mrf.mxu2  ;;  %v752_v43 = vpop.f32.mrf.mxu0 }
  0xf7   :  { %v1014_v41 = vpop.f32.mrf.mxu3  ;;  %1204 = vst [vmem:[%s2305_s3 + $0x48] sm:$0xff] %v1173_v39  ;;  %v927_v42 = vadd.f32 %v926_v40, %v839_v38  ;;  %v840_v44 = vpop.f32.mrf.mxu1 }
  0xf8   :  { %v841_v56 = vadd.f32 %v840_v44, %v752_v43 }
  0xf9   :  { %v1015_v45 = vadd.f32 %v1014_v41, %v927_v42 }
  0xfb   :  { %v1078_v48 = vadd.f32 %v2026_v18, %v1015_v45 }
  0xfd   :  { %v1174_v55 = vmax.f32 %v1078_v48, 0.0 }
  0xfe   :  { %v928_v57 = vpop.f32.mrf.mxu2  ;;  %v755_v62 = vpop.f32.mrf.mxu0 }
  0xff   :  { %v1016_v58 = vpop.f32.mrf.mxu3  ;;  %1205 = vst [vmem:[%s2305_s3 + $0x50] sm:$0xff] %v1174_v55  ;;  %v929_v61 = vadd.f32 %v928_v57, %v841_v56  ;;  %v843_v63 = vpop.f32.mrf.mxu1 }
 0x100   :  { %v844_v4 = vadd.f32 %v843_v63, %v755_v62 }
 0x101   :  { %v1017_v2 = vadd.f32 %v1016_v58, %v929_v61  ;;  %794 = vmatmul.bf16.gmra.mxu0 %v1457_v59 }
 0x102   :  { %882 = vmatmul.bf16.gmra.mxu1 %v1461_v60 }
 0x103   :  { %v1079_v3 = vadd.f32 %v2026_v18, %v1017_v2  ;;  %970 = vmatmul.bf16.gmra.mxu2 %v1465_v0 }
 0x104   :  { %1058 = vmatmul.bf16.gmra.mxu3 %v1469_v1 }
 0x105   :  { %v1175_v5 = vmax.f32 %v1079_v3, 0.0 }
 0x106   :  { %v931_v6 = vpop.f32.mrf.mxu2  ;;  %v757_v9 = vpop.f32.mrf.mxu0 }
 0x107   :  { %v1019_v7 = vpop.f32.mrf.mxu3  ;;  %1206 = vst [vmem:[%s2305_s3 + $0x58] sm:$0xff] %v1175_v5  ;;  %v932_v8 = vadd.f32 %v931_v6, %v844_v4  ;;  %v845_v10 = vpop.f32.mrf.mxu1 }
 0x108   :  { %v846_v21 = vadd.f32 %v845_v10, %v757_v9 }
 0x109   :  { %v1020_v13 = vadd.f32 %v1019_v7, %v932_v8 }
 0x10b   :  { %v1080_v16 = vadd.f32 %v2026_v18, %v1020_v13 }
 0x10d   :  { %v1176_v20 = vmax.f32 %v1080_v16, 0.0 }
 0x10e   :  { %v933_v22 = vpop.f32.mrf.mxu2  ;;  %v760_v27 = vpop.f32.mrf.mxu0 }
 0x10f   :  { %v1021_v23 = vpop.f32.mrf.mxu3  ;;  %1207 = vst [vmem:[%s2305_s3 + $0x60] sm:$0xff] %v1176_v20  ;;  %v934_v26 = vadd.f32 %v933_v22, %v846_v21  ;;  %v848_v28 = vpop.f32.mrf.mxu1 }
 0x110   :  { %v849_v33 = vadd.f32 %v848_v28, %v760_v27 }
 0x111   :  { %v1022_v31 = vadd.f32 %v1021_v23, %v934_v26  ;;  %799 = vmatmul.bf16.gmra.mxu0 %v456_v24 }
 0x112   :  { %887 = vmatmul.bf16.gmra.mxu1 %v457_v25 }
 0x113   :  { %v1081_v32 = vadd.f32 %v2026_v18, %v1022_v31  ;;  %975 = vmatmul.bf16.gmra.mxu2 %v458_v29 }
 0x114   :  { %1063 = vmatmul.bf16.gmra.mxu3 %v459_v30 }
 0x115   :  { %v1177_v34 = vmax.f32 %v1081_v32, 0.0 }
 0x116   :  { %v936_v35 = vpop.f32.mrf.mxu2  ;;  %v762_v38 = vpop.f32.mrf.mxu0 }
 0x117   :  { %v1024_v36 = vpop.f32.mrf.mxu3  ;;  %1208 = vst [vmem:[%s2305_s3 + $0x68] sm:$0xff] %v1177_v34  ;;  %v937_v37 = vadd.f32 %v936_v35, %v849_v33  ;;  %v850_v39 = vpop.f32.mrf.mxu1 }
 0x118   :  { %v851_v43 = vadd.f32 %v850_v39, %v762_v38 }
 0x119   :  { %v1025_v40 = vadd.f32 %v1024_v36, %v937_v37 }
 0x11b   :  { %v1082_v41 = vadd.f32 %v2026_v18, %v1025_v40 }
 0x11d   :  { %v1178_v42 = vmax.f32 %v1082_v41, 0.0 }
 0x11e   :  { %v938_v44 = vpop.f32.mrf.mxu2  ;;  %v765_v47 = vpop.f32.mrf.mxu0 }
 0x11f   :  { %v1026_v45 = vpop.f32.mrf.mxu3  ;;  %1209 = vst [vmem:[%s2305_s3 + $0x70] sm:$0xff] %v1178_v42  ;;  %v939_v46 = vadd.f32 %v938_v44, %v851_v43  ;;  %v853_v48 = vpop.f32.mrf.mxu1 }
 0x120   :  { %v854_v51 = vadd.f32 %v853_v48, %v765_v47 }
 0x121   :  { %v1027_v49 = vadd.f32 %v1026_v45, %v939_v46 }
 0x123   :  { %v1083_v50 = vadd.f32 %v2026_v18, %v1027_v49 }
 0x125   :  { %v1179_v52 = vmax.f32 %v1083_v50, 0.0 }
 0x126   :  { %v941_v53 = vpop.f32.mrf.mxu2  ;;  %v767_v56 = vpop.f32.mrf.mxu0 }
 0x127   :  { %v1029_v54 = vpop.f32.mrf.mxu3  ;;  %1210 = vst [vmem:[%s2305_s3 + $0x78] sm:$0xff] %v1179_v52  ;;  %v942_v55 = vadd.f32 %v941_v53, %v854_v51  ;;  %v855_v57 = vpop.f32.mrf.mxu1 }
 0x128   :  { %v856_v61 = vadd.f32 %v855_v57, %v767_v56 }
 0x129   :  { %v1030_v58 = vadd.f32 %v1029_v54, %v942_v55 }
 0x12b   :  { %v1084_v59 = vadd.f32 %v2026_v18, %v1030_v58 }
 0x12d   :  { %v1180_v60 = vmax.f32 %v1084_v59, 0.0 }
 0x12e   :  { %v943_v62 = vpop.f32.mrf.mxu2  ;;  %v770_v1 = vpop.f32.mrf.mxu0 }
 0x12f   :  { %v1031_v63 = vpop.f32.mrf.mxu3  ;;  %1211 = vst [vmem:[%s2305_s3 + $0x80] sm:$0xff] %v1180_v60  ;;  %v944_v0 = vadd.f32 %v943_v62, %v856_v61  ;;  %v858_v2 = vpop.f32.mrf.mxu1 }
 0x130   :  { %v859_v5 = vadd.f32 %v858_v2, %v770_v1 }
 0x131   :  { %v1032_v3 = vadd.f32 %v1031_v63, %v944_v0 }
 0x133   :  { %v1085_v4 = vadd.f32 %v2026_v18, %v1032_v3 }
 0x135   :  { %v1181_v6 = vmax.f32 %v1085_v4, 0.0 }
 0x136   :  { %v946_v7 = vpop.f32.mrf.mxu2  ;;  %v772_v10 = vpop.f32.mrf.mxu0 }
 0x137   :  { %v1034_v8 = vpop.f32.mrf.mxu3  ;;  %1212 = vst [vmem:[%s2305_s3 + $0x88] sm:$0xff] %v1181_v6  ;;  %v947_v9 = vadd.f32 %v946_v7, %v859_v5  ;;  %v860_v11 = vpop.f32.mrf.mxu1 }
 0x138   :  { %v861_v15 = vadd.f32 %v860_v11, %v772_v10 }
 0x139   :  { %v1035_v12 = vadd.f32 %v1034_v8, %v947_v9 }
 0x13b   :  { %v1086_v13 = vadd.f32 %v2026_v18, %v1035_v12 }
 0x13d   :  { %v1182_v14 = vmax.f32 %v1086_v13, 0.0 }
 0x13e   :  { %v948_v16 = vpop.f32.mrf.mxu2  ;;  %v775_v20 = vpop.f32.mrf.mxu0 }
 0x13f   :  { %v1036_v17 = vpop.f32.mrf.mxu3  ;;  %1213 = vst [vmem:[%s2305_s3 + $0x90] sm:$0xff] %v1182_v14  ;;  %v949_v19 = vadd.f32 %v948_v16, %v861_v15  ;;  %v863_v21 = vpop.f32.mrf.mxu1 }
 0x140   :  { %v864_v24 = vadd.f32 %v863_v21, %v775_v20 }
 0x141   :  { %v1037_v22 = vadd.f32 %v1036_v17, %v949_v19 }
 0x143   :  { %v1087_v23 = vadd.f32 %v2026_v18, %v1037_v22 }
 0x145   :  { %v1183_v25 = vmax.f32 %v1087_v23, 0.0 }
 0x146   :  { %v951_v26 = vpop.f32.mrf.mxu2  ;;  %v777_v29 = vpop.f32.mrf.mxu0 }
 0x147   :  { %v1039_v27 = vpop.f32.mrf.mxu3  ;;  %1214 = vst [vmem:[%s2305_s3 + $0x98] sm:$0xff] %v1183_v25  ;;  %v952_v28 = vadd.f32 %v951_v26, %v864_v24  ;;  %v865_v30 = vpop.f32.mrf.mxu1 }
 0x148   :  { %v866_v34 = vadd.f32 %v865_v30, %v777_v29 }
 0x149   :  { %v1040_v31 = vadd.f32 %v1039_v27, %v952_v28 }
 0x14b   :  { %v1088_v32 = vadd.f32 %v2026_v18, %v1040_v31 }
 0x14d   :  { %v1184_v33 = vmax.f32 %v1088_v32, 0.0 }
 0x14e   :  { %v953_v35 = vpop.f32.mrf.mxu2  ;;  %v780_v38 = vpop.f32.mrf.mxu0 }
 0x14f   :  { %v1041_v36 = vpop.f32.mrf.mxu3  ;;  %1215 = vst [vmem:[%s2305_s3 + $0xa0] sm:$0xff] %v1184_v33  ;;  %v954_v37 = vadd.f32 %v953_v35, %v866_v34  ;;  %v868_v39 = vpop.f32.mrf.mxu1 }
 0x150   :  { %v869_v42 = vadd.f32 %v868_v39, %v780_v38 }
 0x151   :  { %v1042_v40 = vadd.f32 %v1041_v36, %v954_v37 }
 0x153   :  { %v1089_v41 = vadd.f32 %v2026_v18, %v1042_v40 }
 0x155   :  { %v1185_v43 = vmax.f32 %v1089_v41, 0.0 }
 0x156   :  { %v956_v44 = vpop.f32.mrf.mxu2  ;;  %v782_v47 = vpop.f32.mrf.mxu0 }
 0x157   :  { %v1044_v45 = vpop.f32.mrf.mxu3  ;;  %1216 = vst [vmem:[%s2305_s3 + $0xa8] sm:$0xff] %v1185_v43  ;;  %v957_v46 = vadd.f32 %v956_v44, %v869_v42  ;;  %v870_v48 = vpop.f32.mrf.mxu1 }
 0x158   :  { %v871_v52 = vadd.f32 %v870_v48, %v782_v47 }
 0x159   :  { %v1045_v49 = vadd.f32 %v1044_v45, %v957_v46 }
 0x15b   :  { %v1090_v50 = vadd.f32 %v2026_v18, %v1045_v49 }
 0x15d   :  { %v1186_v51 = vmax.f32 %v1090_v50, 0.0 }
 0x15e   :  { %v958_v53 = vpop.f32.mrf.mxu2  ;;  %v785_v56 = vpop.f32.mrf.mxu0 }
 0x15f   :  { %v1046_v54 = vpop.f32.mrf.mxu3  ;;  %1217 = vst [vmem:[%s2305_s3 + $0xb0] sm:$0xff] %v1186_v51  ;;  %v959_v55 = vadd.f32 %v958_v53, %v871_v52  ;;  %v873_v57 = vpop.f32.mrf.mxu1 }
 0x160   :  { %v874_v60 = vadd.f32 %v873_v57, %v785_v56 }
 0x161   :  { %v1047_v58 = vadd.f32 %v1046_v54, %v959_v55 }
 0x163   :  { %v1091_v59 = vadd.f32 %v2026_v18, %v1047_v58 }
 0x165   :  { %v1187_v61 = vmax.f32 %v1091_v59, 0.0 }
 0x166   :  { %v961_v62 = vpop.f32.mrf.mxu2  ;;  %v787_v1 = vpop.f32.mrf.mxu0 }
 0x167   :  { %v1049_v63 = vpop.f32.mrf.mxu3  ;;  %1218 = vst [vmem:[%s2305_s3 + $0xb8] sm:$0xff] %v1187_v61  ;;  %v962_v0 = vadd.f32 %v961_v62, %v874_v60  ;;  %v875_v2 = vpop.f32.mrf.mxu1 }
 0x168   :  { %v876_v6 = vadd.f32 %v875_v2, %v787_v1 }
 0x169   :  { %v1050_v3 = vadd.f32 %v1049_v63, %v962_v0 }
 0x16b   :  { %v1092_v4 = vadd.f32 %v2026_v18, %v1050_v3 }
 0x16d   :  { %v1188_v5 = vmax.f32 %v1092_v4, 0.0 }
 0x16e   :  { %v963_v7 = vpop.f32.mrf.mxu2  ;;  %v790_v10 = vpop.f32.mrf.mxu0 }
 0x16f   :  { %v1051_v8 = vpop.f32.mrf.mxu3  ;;  %1219 = vst [vmem:[%s2305_s3 + $0xc0] sm:$0xff] %v1188_v5  ;;  %v964_v9 = vadd.f32 %v963_v7, %v876_v6  ;;  %v878_v11 = vpop.f32.mrf.mxu1 }
 0x170   :  { %v879_v14 = vadd.f32 %v878_v11, %v790_v10 }
 0x171   :  { %v1052_v12 = vadd.f32 %v1051_v8, %v964_v9 }
 0x173   :  { %v1093_v13 = vadd.f32 %v2026_v18, %v1052_v12 }
 0x175   :  { %v1189_v15 = vmax.f32 %v1093_v13, 0.0 }
 0x176   :  { %v966_v16 = vpop.f32.mrf.mxu2  ;;  %v792_v20 = vpop.f32.mrf.mxu0 }
 0x177   :  { %v1054_v17 = vpop.f32.mrf.mxu3  ;;  %1220 = vst [vmem:[%s2305_s3 + $0xc8] sm:$0xff] %v1189_v15  ;;  %v967_v19 = vadd.f32 %v966_v16, %v879_v14  ;;  %v880_v21 = vpop.f32.mrf.mxu1 }
 0x178   :  { %v881_v25 = vadd.f32 %v880_v21, %v792_v20 }
 0x179   :  { %v1055_v22 = vadd.f32 %v1054_v17, %v967_v19 }
 0x17b   :  { %v1094_v23 = vadd.f32 %v2026_v18, %v1055_v22 }
 0x17d   :  { %v1190_v24 = vmax.f32 %v1094_v23, 0.0 }
 0x17e   :  { %v968_v26 = vpop.f32.mrf.mxu2  ;;  %v795_v29 = vpop.f32.mrf.mxu0 }
 0x17f   :  { %v1056_v27 = vpop.f32.mrf.mxu3  ;;  %1221 = vst [vmem:[%s2305_s3 + $0xd0] sm:$0xff] %v1190_v24  ;;  %v969_v28 = vadd.f32 %v968_v26, %v881_v25  ;;  %v883_v30 = vpop.f32.mrf.mxu1 }
 0x180   :  { %v884_v33 = vadd.f32 %v883_v30, %v795_v29 }
 0x181   :  { %v1057_v31 = vadd.f32 %v1056_v27, %v969_v28 }
 0x183   :  { %v1095_v32 = vadd.f32 %v2026_v18, %v1057_v31 }
 0x185   :  { %v1191_v34 = vmax.f32 %v1095_v32, 0.0 }
 0x186   :  { %v971_v35 = vpop.f32.mrf.mxu2  ;;  %v797_v38 = vpop.f32.mrf.mxu0 }
 0x187   :  { %v1059_v36 = vpop.f32.mrf.mxu3  ;;  %1222 = vst [vmem:[%s2305_s3 + $0xd8] sm:$0xff] %v1191_v34  ;;  %v972_v37 = vadd.f32 %v971_v35, %v884_v33  ;;  %v885_v39 = vpop.f32.mrf.mxu1 }
 0x188   :  { %v886_v43 = vadd.f32 %v885_v39, %v797_v38 }
 0x189   :  { %v1060_v40 = vadd.f32 %v1059_v36, %v972_v37 }
 0x18b   :  { %v1096_v41 = vadd.f32 %v2026_v18, %v1060_v40 }
 0x18d   :  { %v1192_v42 = vmax.f32 %v1096_v41, 0.0 }
 0x18e   :  { %v973_v44 = vpop.f32.mrf.mxu2  ;;  %v800_v47 = vpop.f32.mrf.mxu0 }
 0x18f   :  { %v1061_v45 = vpop.f32.mrf.mxu3  ;;  %1223 = vst [vmem:[%s2305_s3 + $0xe0] sm:$0xff] %v1192_v42  ;;  %v974_v46 = vadd.f32 %v973_v44, %v886_v43  ;;  %v888_v48 = vpop.f32.mrf.mxu1 }
 0x190   :  { %v889_v51 = vadd.f32 %v888_v48, %v800_v47 }
 0x191   :  { %v1062_v49 = vadd.f32 %v1061_v45, %v974_v46 }
 0x193   :  { %v1097_v50 = vadd.f32 %v2026_v18, %v1062_v49 }
 0x195   :  { %v1193_v52 = vmax.f32 %v1097_v50, 0.0 }
 0x196   :  { %v976_v53 = vpop.f32.mrf.mxu2  ;;  %v802_v56 = vpop.f32.mrf.mxu0 }
 0x197   :  { %v1064_v54 = vpop.f32.mrf.mxu3  ;;  %1224 = vst [vmem:[%s2305_s3 + $0xe8] sm:$0xff] %v1193_v52  ;;  %v977_v55 = vadd.f32 %v976_v53, %v889_v51  ;;  %v890_v57 = vpop.f32.mrf.mxu1 }
 0x199   :  { %v1065_v58 = vadd.f32 %v1064_v54, %v977_v55 }
 0x19b   :  { %v1098_v59 = vadd.f32 %v2026_v18, %v1065_v58 }
 0x19d   :  { %v1194_v60 = vmax.f32 %v1098_v59, 0.0 }
 0x19e   :  { %v978_v61 = vpop.f32.mrf.mxu2 }
 0x19f   :  { %v1066_v62 = vpop.f32.mrf.mxu3  ;;  %1225 = vst [vmem:[%s2305_s3 + $0xf0] sm:$0xff] %v1194_v60 }

// kernel: bilinear_cnn_forward.13
= control target key start
LH: loop header
LB: loop body
LE: loop exit
PB: predicated region body
PF: predicated region fallthrough
CT: control target
= control target key end

     0   :  { %s777_s1 = inlined_call_operand.vmem [shape: bf16[384,128], index: 1, kind: input, shape index: {}]   ;;  %s778_s0 = inlined_call_operand.vmem [shape: bf16[56,384], index: 0, kind: input, shape index: {}]   ;;  %s779_s2 = inlined_call_operand.vmem [shape: f32[1,128], index: 2, kind: input, shape index: {}]   ;;  %s780_s3 = inlined_call_operand.vmem [shape: f32[56,128], index: 3, kind: output, shape index: {}]  }
   0x1   :  { %v575_v0 = vld [vmem:[%s777_s1 + $0x38] sm:$0xff]  ;;  %v574_v3 = vld [vmem:[%s777_s1 + $0x30] sm:$0xff]  ;;  %v573_v6 = vld [vmem:[%s777_s1 + $0x28] sm:$0xff] }
   0x2   :  { %v583_v1 = vld [vmem:[%s777_s1 + $0x78] sm:$0xff]  ;;  %301 = vmatpush.bf16.msra.mxu0 %v575_v0  ;;  %v582_v4 = vld [vmem:[%s777_s1 + $0x70] sm:$0xff]  ;;  %592 = vmatpush.bf16.msra.mxu3 %v575_v0  ;;  %v581_v7 = vld [vmem:[%s777_s1 + $0x68] sm:$0xff] }
   0x3   :  { %v591_v2 = vld [vmem:[%s777_s1 + $0xb8] sm:$0xff]  ;;  %329 = vmatpush.bf16.msra.mxu1 %v583_v1  ;;  %v590_v5 = vld [vmem:[%s777_s1 + $0xb0] sm:$0xff]  ;;  %v589_v8 = vld [vmem:[%s777_s1 + $0xa8] sm:$0xff] }
   0x4   :  { %357 = vmatpush.bf16.msra.mxu2 %v591_v2  ;;  %v572_v9 = vld [vmem:[%s777_s1 + $0x20] sm:$0xff]  ;;  %v571_v12 = vld [vmem:[%s777_s1 + $0x18] sm:$0xff]  ;;  %v570_v15 = vld [vmem:[%s777_s1 + $0x10] sm:$0xff] }
   0x5   :  { %v580_v10 = vld [vmem:[%s777_s1 + $0x60] sm:$0xff]  ;;  %v579_v13 = vld [vmem:[%s777_s1 + $0x58] sm:$0xff]  ;;  %v578_v16 = vld [vmem:[%s777_s1 + $0x50] sm:$0xff] }
   0x6   :  { %302 = vmatpush.bf16.msra.mxu0 %v574_v3  ;;  %593 = vmatpush.bf16.msra.mxu3 %v574_v3  ;;  %v588_v11 = vld [vmem:[%s777_s1 + $0xa0] sm:$0xff]  ;;  %v587_v14 = vld [vmem:[%s777_s1 + $0x98] sm:$0xff]  ;;  %v586_v17 = vld [vmem:[%s777_s1 + $0x90] sm:$0xff] }
   0x7   :  { %330 = vmatpush.bf16.msra.mxu1 %v582_v4  ;;  %v569_v18 = vld [vmem:[%s777_s1 + $0x8] sm:$0xff]  ;;  %v568_v21 = vld [vmem:[%s777_s1] sm:$0xff]  ;;  %v431_v27 = vld [vmem:[%s778_s0 + $0xc] sm:$0xf0] }
   0x8   :  { %358 = vmatpush.bf16.msra.mxu2 %v590_v5  ;;  %v577_v19 = vld [vmem:[%s777_s1 + $0x48] sm:$0xff]  ;;  %v576_v22 = vld [vmem:[%s777_s1 + $0x40] sm:$0xff]  ;;  %v561_v29 = vld [vmem:[%s778_s0 + $0x10] sm:$0xf0] }
   0x9   :  { %v585_v20 = vld [vmem:[%s777_s1 + $0x88] sm:$0xff]  ;;  %v584_v23 = vld [vmem:[%s777_s1 + $0x80] sm:$0xff]  ;;  %v441_v30 = vld [vmem:[%s778_s0 + $0x18] sm:$0xf] }
   0xa   :  { %303 = vmatpush.bf16.msra.mxu0 %v573_v6  ;;  %594 = vmatpush.bf16.msra.mxu3 %v573_v6  ;;  %v429_v24 = vld [vmem:[%s778_s0] sm:$0xf]  ;;  %v560_v25 = vld [vmem:[%s778_s0 + $0x8] sm:$0xf0]  ;;  %v559_v26 = vld [vmem:[%s778_s0 + $0x4] sm:$0xf] }
   0xb   :  { %331 = vmatpush.bf16.msra.mxu1 %v581_v7  ;;  %v437_v28 = vld [vmem:[%s778_s0 + $0x8] sm:$0xf]  ;;  %v563_v31 = vld [vmem:[%s778_s0 + $0x20] sm:$0xf0]  ;;  %v430_v32 = vor.u32 %v560_v25, %v429_v24  ;;  %v434_v33 = vor.u32 %v559_v26, %v431_v27  ;;  %v562_v36 = vld [vmem:[%s778_s0 + $0x1c] sm:$0xf] }
   0xc   :  { %359 = vmatpush.bf16.msra.mxu2 %v589_v8  ;;  %v438_v34 = vor.u32 %v561_v29, %v437_v28  ;;  %v442_v35 = vor.u32 %v563_v31, %v441_v30  ;;  %v443_v37 = vld [vmem:[%s778_s0 + $0x24] sm:$0xf0]  ;;  %v449_v38 = vld [vmem:[%s778_s0 + $0x20] sm:$0xf]  ;;  %v564_v39 = vld [vmem:[%s778_s0 + $0x28] sm:$0xf0] }
   0xd   :  { %v453_v40 = vld [vmem:[%s778_s0 + $0x30] sm:$0xf]  ;;  %v566_v41 = vld [vmem:[%s778_s0 + $0x38] sm:$0xf0]  ;;  %v446_v42 = vor.u32 %v562_v36, %v443_v37  ;;  %v450_v43 = vor.u32 %v564_v39, %v449_v38  ;;  %v48_v45 = vld [vmem:[%s778_s0 + $0x48] sm:$0xff] }
   0xe   :  { %304 = vmatpush.bf16.msra.mxu0 %v572_v9  ;;  %595 = vmatpush.bf16.msra.mxu3 %v572_v9  ;;  %v454_v44 = vor.u32 %v566_v41, %v453_v40  ;;  %v565_v46 = vld [vmem:[%s778_s0 + $0x34] sm:$0xf]  ;;  %v455_v47 = vld [vmem:[%s778_s0 + $0x3c] sm:$0xf0]  ;;  %v130_v48 = vunpack.c.l.b16 %v48_v45  ;;  %v461_v49 = vld [vmem:[%s778_s0 + $0x38] sm:$0xf]  ;;  %v131_v55 = vunpack.c.h.b16 %v48_v45 }
   0xf   :  { %332 = vmatpush.bf16.msra.mxu1 %v580_v10  ;;  %v567_v50 = vld [vmem:[%s778_s0 + $0x40] sm:$0xf0]  ;;  %v458_v51 = vor.u32 %v565_v46, %v455_v47  ;;  %v49_v54 = vld [vmem:[%s778_s0 + $0x50] sm:$0xf]  ;;  %v600_v62 = vld [vmem:[%s779_s2] ss:$0 sm:$0xff] }
  0x10   :  { %360 = vmatpush.bf16.msra.mxu2 %v588_v11  ;;  %v462_v52 = vor.u32 %v567_v50, %v461_v49  ;;  %v142_v53 = vpack.c.b16 %v130_v48, %v130_v48  ;;  %v132_v56 = vunpack.c.l.b16 %v49_v54  ;;  %v143_v57 = vpack.c.b16 %v131_v55, %v131_v55 }
  0x12   :  { %305 = vmatpush.bf16.msra.mxu0 %v571_v12  ;;  %596 = vmatpush.bf16.msra.mxu3 %v571_v12  ;;  %v144_v58 = vpack.c.b16 %v132_v56, %v132_v56 }
  0x13   :  { %333 = vmatpush.bf16.msra.mxu1 %v579_v13 }
  0x14   :  { %361 = vmatpush.bf16.msra.mxu2 %v587_v14 }
  0x16   :  { %306 = vmatpush.bf16.msra.mxu0 %v570_v15  ;;  %597 = vmatpush.bf16.msra.mxu3 %v570_v15 }
  0x17   :  { %334 = vmatpush.bf16.msra.mxu1 %v578_v16 }
  0x18   :  { %362 = vmatpush.bf16.msra.mxu2 %v586_v17 }
  0x1a   :  { %307 = vmatpush.bf16.msra.mxu0 %v569_v18  ;;  %598 = vmatpush.bf16.msra.mxu3 %v569_v18 }
  0x1b   :  { %335 = vmatpush.bf16.msra.mxu1 %v577_v19 }
  0x1c   :  { %363 = vmatpush.bf16.msra.mxu2 %v585_v20 }
  0x1e   :  { %308 = vmatpush.bf16.msra.mxu0 %v568_v21  ;;  %599 = vmatpush.bf16.msra.mxu3 %v568_v21 }
  0x1f   :  { %336 = vmatpush.bf16.msra.mxu1 %v576_v22 }
  0x20   :  { %364 = vmatpush.bf16.msra.mxu2 %v584_v23 }
  0x21   :  { %309 = vmatmul.bf16.vlgmr.msra.gmra.mxu0 %v430_v32  ;;  %314 = vmatmul.bf16.vlgmr.msra.gmra.mxu3 %v442_v35 }
  0x22   :  { %337 = vmatmul.bf16.vlgmr.msra.gmra.mxu1 %v434_v33 }
  0x23   :  { %365 = vmatmul.bf16.vlgmr.msra.gmra.mxu2 %v438_v34 }
  0x31   :  { %319 = vmatmul.bf16.gmra.mxu3 %v454_v44 }
  0x32   :  { %342 = vmatmul.bf16.gmra.mxu1 %v446_v42 }
  0x33   :  { %370 = vmatmul.bf16.gmra.mxu2 %v450_v43 }
  0x41   :  { %324 = vmatmul.bf16.gmra.mxu3 %v142_v53 }
  0x42   :  { %347 = vmatmul.bf16.gmra.mxu1 %v458_v51 }
  0x43   :  { %375 = vmatmul.bf16.gmra.mxu2 %v462_v52 }
  0x52   :  { %352 = vmatmul.bf16.gmra.mxu1 %v143_v57 }
  0x53   :  { %380 = vmatmul.bf16.gmra.mxu2 %v144_v58 }
  0x9e   :  { %v310_v60 = vpop.f32.mrf.mxu0 }
  0x9f   :  { %v338_v59 = vpop.f32.mrf.mxu1 }
  0xa0   :  { %v339_v61 = vadd.f32 %v338_v59, %v310_v60 }
  0xa4   :  { %v315_v0 = vpop.f32.mrf.mxu3 }
  0xa6   :  { %v366_v63 = vpop.f32.mrf.mxu2  ;;  %v312_v4 = vpop.f32.mrf.mxu0 }
  0xa7   :  { %v367_v1 = vadd.f32 %v366_v63, %v339_v61  ;;  %v340_v2 = vpop.f32.mrf.mxu1 }
  0xa8   :  { %v341_v6 = vadd.f32 %v340_v2, %v312_v4 }
  0xa9   :  { %v385_v3 = vadd.f32 %v600_v62, %v367_v1 }
  0xab   :  { %v409_v5 = vmax.f32 %v385_v3, 0.0 }
  0xac   :  { %v317_v8 = vpop.f32.mrf.mxu3 }
  0xad   :  { %416 = vst [vmem:[%s780_s3] sm:$0xff] %v409_v5 }
  0xae   :  { %v368_v7 = vpop.f32.mrf.mxu2 }
  0xaf   :  { %v369_v9 = vadd.f32 %v368_v7, %v341_v6  ;;  %v343_v10 = vpop.f32.mrf.mxu1 }
  0xb0   :  { %v344_v13 = vadd.f32 %v343_v10, %v315_v0 }
  0xb1   :  { %v386_v11 = vadd.f32 %v600_v62, %v369_v9 }
  0xb3   :  { %v410_v12 = vmax.f32 %v386_v11, 0.0 }
  0xb4   :  { %v320_v15 = vpop.f32.mrf.mxu3 }
  0xb5   :  { %417 = vst [vmem:[%s780_s3 + $0x8] sm:$0xff] %v410_v12 }
  0xb6   :  { %v371_v14 = vpop.f32.mrf.mxu2 }
  0xb7   :  { %v372_v16 = vadd.f32 %v371_v14, %v344_v13  ;;  %v345_v17 = vpop.f32.mrf.mxu1 }
  0xb8   :  { %v346_v20 = vadd.f32 %v345_v17, %v317_v8 }
  0xb9   :  { %v387_v18 = vadd.f32 %v600_v62, %v372_v16 }
  0xbb   :  { %v411_v19 = vmax.f32 %v387_v18, 0.0 }
  0xbc   :  { %v322_v22 = vpop.f32.mrf.mxu3 }
  0xbd   :  { %418 = vst [vmem:[%s780_s3 + $0x10] sm:$0xff] %v411_v19 }
  0xbe   :  { %v373_v21 = vpop.f32.mrf.mxu2 }
  0xbf   :  { %v374_v23 = vadd.f32 %v373_v21, %v346_v20  ;;  %v348_v24 = vpop.f32.mrf.mxu1 }
  0xc0   :  { %v349_v27 = vadd.f32 %v348_v24, %v320_v15 }
  0xc1   :  { %v388_v25 = vadd.f32 %v600_v62, %v374_v23 }
  0xc3   :  { %v412_v26 = vmax.f32 %v388_v25, 0.0 }
  0xc4   :  { %v325_v29 = vpop.f32.mrf.mxu3 }
  0xc5   :  { %419 = vst [vmem:[%s780_s3 + $0x18] sm:$0xff] %v412_v26 }
  0xc6   :  { %v376_v28 = vpop.f32.mrf.mxu2 }
  0xc7   :  { %v377_v30 = vadd.f32 %v376_v28, %v349_v27  ;;  %v350_v31 = vpop.f32.mrf.mxu1 }
  0xc8   :  { %v351_v34 = vadd.f32 %v350_v31, %v322_v22 }
  0xc9   :  { %v389_v32 = vadd.f32 %v600_v62, %v377_v30 }
  0xcb   :  { %v413_v33 = vmax.f32 %v389_v32, 0.0 }
  0xcc   :  { %v327_v36 = vpop.f32.mrf.mxu3 }
  0xcd   :  { %420 = vst [vmem:[%s780_s3 + $0x20] sm:$0xff] %v413_v33 }
  0xce   :  { %v378_v35 = vpop.f32.mrf.mxu2 }
  0xcf   :  { %v379_v37 = vadd.f32 %v378_v35, %v351_v34  ;;  %v353_v38 = vpop.f32.mrf.mxu1 }
  0xd0   :  { %v354_v41 = vadd.f32 %v353_v38, %v325_v29 }
  0xd1   :  { %v390_v39 = vadd.f32 %v600_v62, %v379_v37 }
  0xd3   :  { %v414_v40 = vmax.f32 %v390_v39, 0.0 }
  0xd5   :  { %421 = vst [vmem:[%s780_s3 + $0x28] sm:$0xff] %v414_v40 }
  0xd6   :  { %v381_v42 = vpop.f32.mrf.mxu2 }
  0xd7   :  { %v382_v43 = vadd.f32 %v381_v42, %v354_v41  ;;  %v355_v44 = vpop.f32.mrf.mxu1 }
  0xd9   :  { %v391_v45 = vadd.f32 %v600_v62, %v382_v43 }
  0xdb   :  { %v415_v46 = vmax.f32 %v391_v45, 0.0 }
  0xdd   :  { %422 = vst [vmem:[%s780_s3 + $0x30] sm:$0xff] %v415_v46 }
  0xde   :  { %v383_v47 = vpop.f32.mrf.mxu2 }

// kernel: bilinear_cnn_forward.14
= control target key start
LH: loop header
LB: loop body
LE: loop exit
PB: predicated region body
PF: predicated region fallthrough
CT: control target
= control target key end

     0   :  { %s982_s1 = inlined_call_operand.vmem [shape: bf16[512,128], index: 1, kind: input, shape index: {}]   ;;  %s983_s0 = inlined_call_operand.vmem [shape: bf16[56,512], index: 0, kind: input, shape index: {}]   ;;  %s984_s2 = inlined_call_operand.vmem [shape: f32[1,128], index: 2, kind: input, shape index: {}]   ;;  %s985_s3 = inlined_call_operand.vmem [shape: f32[56,128], index: 3, kind: output, shape index: {}]  }
   0x1   :  { %v729_v0 = vld [vmem:[%s982_s1 + $0x38] sm:$0xff]  ;;  %v728_v4 = vld [vmem:[%s982_s1 + $0x30] sm:$0xff]  ;;  %v727_v8 = vld [vmem:[%s982_s1 + $0x28] sm:$0xff] }
   0x2   :  { %v737_v1 = vld [vmem:[%s982_s1 + $0x78] sm:$0xff]  ;;  %380 = vmatpush.bf16.msra.mxu0 %v729_v0  ;;  %v736_v5 = vld [vmem:[%s982_s1 + $0x70] sm:$0xff]  ;;  %v735_v9 = vld [vmem:[%s982_s1 + $0x68] sm:$0xff] }
   0x3   :  { %v745_v2 = vld [vmem:[%s982_s1 + $0xb8] sm:$0xff]  ;;  %408 = vmatpush.bf16.msra.mxu1 %v737_v1  ;;  %v744_v6 = vld [vmem:[%s982_s1 + $0xb0] sm:$0xff]  ;;  %v743_v10 = vld [vmem:[%s982_s1 + $0xa8] sm:$0xff] }
   0x4   :  { %v753_v3 = vld [vmem:[%s982_s1 + $0xf8] sm:$0xff]  ;;  %436 = vmatpush.bf16.msra.mxu2 %v745_v2  ;;  %v752_v7 = vld [vmem:[%s982_s1 + $0xf0] sm:$0xff]  ;;  %v751_v11 = vld [vmem:[%s982_s1 + $0xe8] sm:$0xff] }
   0x5   :  { %464 = vmatpush.bf16.msra.mxu3 %v753_v3  ;;  %v726_v12 = vld [vmem:[%s982_s1 + $0x20] sm:$0xff]  ;;  %v725_v16 = vld [vmem:[%s982_s1 + $0x18] sm:$0xff]  ;;  %v724_v20 = vld [vmem:[%s982_s1 + $0x10] sm:$0xff] }
   0x6   :  { %381 = vmatpush.bf16.msra.mxu0 %v728_v4  ;;  %v734_v13 = vld [vmem:[%s982_s1 + $0x60] sm:$0xff]  ;;  %v733_v17 = vld [vmem:[%s982_s1 + $0x58] sm:$0xff]  ;;  %v732_v21 = vld [vmem:[%s982_s1 + $0x50] sm:$0xff] }
   0x7   :  { %409 = vmatpush.bf16.msra.mxu1 %v736_v5  ;;  %v742_v14 = vld [vmem:[%s982_s1 + $0xa0] sm:$0xff]  ;;  %v741_v18 = vld [vmem:[%s982_s1 + $0x98] sm:$0xff]  ;;  %v740_v22 = vld [vmem:[%s982_s1 + $0x90] sm:$0xff] }
   0x8   :  { %437 = vmatpush.bf16.msra.mxu2 %v744_v6  ;;  %v750_v15 = vld [vmem:[%s982_s1 + $0xe0] sm:$0xff]  ;;  %v749_v19 = vld [vmem:[%s982_s1 + $0xd8] sm:$0xff]  ;;  %v748_v23 = vld [vmem:[%s982_s1 + $0xd0] sm:$0xff] }
   0x9   :  { %465 = vmatpush.bf16.msra.mxu3 %v752_v7  ;;  %v723_v24 = vld [vmem:[%s982_s1 + $0x8] sm:$0xff]  ;;  %v722_v28 = vld [vmem:[%s982_s1] sm:$0xff]  ;;  %v712_v33 = vld [vmem:[%s983_s0 + $0xc] sm:$0xf0] }
   0xa   :  { %382 = vmatpush.bf16.msra.mxu0 %v727_v8  ;;  %v731_v25 = vld [vmem:[%s982_s1 + $0x48] sm:$0xff]  ;;  %v730_v29 = vld [vmem:[%s982_s1 + $0x40] sm:$0xff]  ;;  %v538_v35 = vld [vmem:[%s983_s0 + $0x10] sm:$0xf0] }
   0xb   :  { %410 = vmatpush.bf16.msra.mxu1 %v735_v9  ;;  %v739_v26 = vld [vmem:[%s982_s1 + $0x88] sm:$0xff]  ;;  %v738_v30 = vld [vmem:[%s982_s1 + $0x80] sm:$0xff]  ;;  %v713_v37 = vld [vmem:[%s983_s0 + $0x14] sm:$0xf0] }
   0xc   :  { %438 = vmatpush.bf16.msra.mxu2 %v743_v10  ;;  %v747_v27 = vld [vmem:[%s982_s1 + $0xc8] sm:$0xff]  ;;  %v746_v31 = vld [vmem:[%s982_s1 + $0xc0] sm:$0xff]  ;;  %v546_v39 = vld [vmem:[%s983_s0 + $0x18] sm:$0xf0] }
   0xd   :  { %466 = vmatpush.bf16.msra.mxu3 %v751_v11  ;;  %v536_v32 = vld [vmem:[%s983_s0] sm:$0xf]  ;;  %v710_v34 = vld [vmem:[%s983_s0 + $0x4] sm:$0xf]  ;;  %v544_v36 = vld [vmem:[%s983_s0 + $0x8] sm:$0xf] }
   0xe   :  { %383 = vmatpush.bf16.msra.mxu0 %v726_v12  ;;  %v711_v38 = vld [vmem:[%s983_s0 + $0xc] sm:$0xf]  ;;  %v537_v40 = vor.u32 %v712_v33, %v536_v32  ;;  %v541_v41 = vor.u32 %v710_v34, %v538_v35  ;;  %v545_v42 = vor.u32 %v713_v37, %v544_v36  ;;  %v552_v44 = vld [vmem:[%s983_s0 + $0x20] sm:$0xf]  ;;  %v716_v45 = vld [vmem:[%s983_s0 + $0x2c] sm:$0xf0] }
   0xf   :  { %411 = vmatpush.bf16.msra.mxu1 %v734_v13  ;;  %v549_v43 = vor.u32 %v711_v38, %v546_v39  ;;  %v714_v46 = vld [vmem:[%s983_s0 + $0x24] sm:$0xf]  ;;  %v554_v47 = vld [vmem:[%s983_s0 + $0x30] sm:$0xf0]  ;;  %v560_v48 = vld [vmem:[%s983_s0 + $0x28] sm:$0xf]  ;;  %v553_v52 = vor.u32 %v716_v45, %v552_v44 }
  0x10   :  { %439 = vmatpush.bf16.msra.mxu2 %v742_v14  ;;  %v717_v49 = vld [vmem:[%s983_s0 + $0x34] sm:$0xf0]  ;;  %v715_v50 = vld [vmem:[%s983_s0 + $0x2c] sm:$0xf]  ;;  %v562_v51 = vld [vmem:[%s983_s0 + $0x38] sm:$0xf0]  ;;  %v557_v53 = vor.u32 %v714_v46, %v554_v47 }
  0x11   :  { %467 = vmatpush.bf16.msra.mxu3 %v750_v15  ;;  %v561_v54 = vor.u32 %v717_v49, %v560_v48  ;;  %v565_v55 = vor.u32 %v715_v50, %v562_v51  ;;  %v568_v56 = vld [vmem:[%s983_s0 + $0x40] sm:$0xf]  ;;  %v720_v57 = vld [vmem:[%s983_s0 + $0x4c] sm:$0xf0]  ;;  %v718_v58 = vld [vmem:[%s983_s0 + $0x44] sm:$0xf] }
  0x12   :  { %384 = vmatpush.bf16.msra.mxu0 %v725_v16  ;;  %v570_v59 = vld [vmem:[%s983_s0 + $0x50] sm:$0xf0]  ;;  %v576_v60 = vld [vmem:[%s983_s0 + $0x48] sm:$0xf]  ;;  %v721_v61 = vld [vmem:[%s983_s0 + $0x54] sm:$0xf0]  ;;  %v569_v0 = vor.u32 %v720_v57, %v568_v56 }
  0x13   :  { %412 = vmatpush.bf16.msra.mxu1 %v733_v17  ;;  %v719_v62 = vld [vmem:[%s983_s0 + $0x4c] sm:$0xf]  ;;  %v578_v63 = vld [vmem:[%s983_s0 + $0x58] sm:$0xf0]  ;;  %v573_v1 = vor.u32 %v718_v58, %v570_v59  ;;  %v577_v2 = vor.u32 %v721_v61, %v576_v60  ;;  %v48_v4 = vld [vmem:[%s983_s0 + $0x60] sm:$0xff] }
  0x14   :  { %440 = vmatpush.bf16.msra.mxu2 %v741_v18  ;;  %v581_v3 = vor.u32 %v719_v62, %v578_v63  ;;  %v49_v5 = vld [vmem:[%s983_s0 + $0x68] sm:$0xff]  ;;  %v152_v6 = vunpack.c.l.b16 %v48_v4  ;;  %v153_v7 = vunpack.c.h.b16 %v48_v4 }
  0x15   :  { %468 = vmatpush.bf16.msra.mxu3 %v749_v19  ;;  %v154_v8 = vunpack.c.l.b16 %v49_v5  ;;  %v155_v9 = vunpack.c.h.b16 %v49_v5 }
  0x16   :  { %385 = vmatpush.bf16.msra.mxu0 %v724_v20  ;;  %v168_v10 = vpack.c.b16 %v152_v6, %v152_v6  ;;  %v169_v11 = vpack.c.b16 %v153_v7, %v153_v7  ;;  %v952_v20 = vld [vmem:[%s984_s2] ss:$0 sm:$0xff] }
  0x17   :  { %413 = vmatpush.bf16.msra.mxu1 %v732_v21  ;;  %v170_v12 = vpack.c.b16 %v154_v8, %v154_v8  ;;  %v171_v13 = vpack.c.b16 %v155_v9, %v155_v9 }
  0x18   :  { %441 = vmatpush.bf16.msra.mxu2 %v740_v22 }
  0x19   :  { %469 = vmatpush.bf16.msra.mxu3 %v748_v23 }
  0x1a   :  { %386 = vmatpush.bf16.msra.mxu0 %v723_v24 }
  0x1b   :  { %414 = vmatpush.bf16.msra.mxu1 %v731_v25 }
  0x1c   :  { %442 = vmatpush.bf16.msra.mxu2 %v739_v26 }
  0x1d   :  { %470 = vmatpush.bf16.msra.mxu3 %v747_v27 }
  0x1e   :  { %387 = vmatpush.bf16.msra.mxu0 %v722_v28 }
  0x1f   :  { %415 = vmatpush.bf16.msra.mxu1 %v730_v29 }
  0x20   :  { %443 = vmatpush.bf16.msra.mxu2 %v738_v30 }
  0x21   :  { %471 = vmatpush.bf16.msra.mxu3 %v746_v31  ;;  %388 = vmatmul.bf16.vlgmr.msra.gmra.mxu0 %v537_v40 }
  0x22   :  { %416 = vmatmul.bf16.vlgmr.msra.gmra.mxu1 %v541_v41 }
  0x23   :  { %444 = vmatmul.bf16.vlgmr.msra.gmra.mxu2 %v545_v42 }
  0x24   :  { %472 = vmatmul.bf16.vlgmr.msra.gmra.mxu3 %v549_v43 }
  0x31   :  { %393 = vmatmul.bf16.gmra.mxu0 %v553_v52 }
  0x32   :  { %421 = vmatmul.bf16.gmra.mxu1 %v557_v53 }
  0x33   :  { %449 = vmatmul.bf16.gmra.mxu2 %v561_v54 }
  0x34   :  { %477 = vmatmul.bf16.gmra.mxu3 %v565_v55 }
  0x41   :  { %398 = vmatmul.bf16.gmra.mxu0 %v569_v0 }
  0x42   :  { %426 = vmatmul.bf16.gmra.mxu1 %v573_v1 }
  0x43   :  { %454 = vmatmul.bf16.gmra.mxu2 %v577_v2 }
  0x44   :  { %482 = vmatmul.bf16.gmra.mxu3 %v581_v3 }
  0x51   :  { %403 = vmatmul.bf16.gmra.mxu0 %v168_v10 }
  0x52   :  { %431 = vmatmul.bf16.gmra.mxu1 %v169_v11 }
  0x53   :  { %459 = vmatmul.bf16.gmra.mxu2 %v170_v12 }
  0x54   :  { %487 = vmatmul.bf16.gmra.mxu3 %v171_v13 }
  0x9e   :  { %v389_v14 = vpop.f32.mrf.mxu0 }
  0x9f   :  { %v417_v15 = vpop.f32.mrf.mxu1 }
  0xa0   :  { %v418_v16 = vadd.f32 %v417_v15, %v389_v14 }
  0xa6   :  { %v445_v17 = vpop.f32.mrf.mxu2  ;;  %v391_v21 = vpop.f32.mrf.mxu0 }
  0xa7   :  { %v473_v18 = vpop.f32.mrf.mxu3  ;;  %v446_v19 = vadd.f32 %v445_v17, %v418_v16  ;;  %v419_v22 = vpop.f32.mrf.mxu1 }
  0xa8   :  { %v420_v26 = vadd.f32 %v419_v22, %v391_v21 }
  0xa9   :  { %v474_v23 = vadd.f32 %v473_v18, %v446_v19 }
  0xab   :  { %v492_v24 = vadd.f32 %v952_v20, %v474_v23 }
  0xad   :  { %v516_v25 = vmax.f32 %v492_v24, 0.0 }
  0xae   :  { %v447_v27 = vpop.f32.mrf.mxu2  ;;  %v394_v30 = vpop.f32.mrf.mxu0 }
  0xaf   :  { %v475_v28 = vpop.f32.mrf.mxu3  ;;  %523 = vst [vmem:[%s985_s3] sm:$0xff] %v516_v25  ;;  %v448_v29 = vadd.f32 %v447_v27, %v420_v26  ;;  %v422_v31 = vpop.f32.mrf.mxu1 }
  0xb0   :  { %v423_v34 = vadd.f32 %v422_v31, %v394_v30 }
  0xb1   :  { %v476_v32 = vadd.f32 %v475_v28, %v448_v29 }
  0xb3   :  { %v493_v33 = vadd.f32 %v952_v20, %v476_v32 }
  0xb5   :  { %v517_v35 = vmax.f32 %v493_v33, 0.0 }
  0xb6   :  { %v450_v36 = vpop.f32.mrf.mxu2  ;;  %v396_v39 = vpop.f32.mrf.mxu0 }
  0xb7   :  { %v478_v37 = vpop.f32.mrf.mxu3  ;;  %524 = vst [vmem:[%s985_s3 + $0x8] sm:$0xff] %v517_v35  ;;  %v451_v38 = vadd.f32 %v450_v36, %v423_v34  ;;  %v424_v40 = vpop.f32.mrf.mxu1 }
  0xb8   :  { %v425_v44 = vadd.f32 %v424_v40, %v396_v39 }
  0xb9   :  { %v479_v41 = vadd.f32 %v478_v37, %v451_v38 }
  0xbb   :  { %v494_v42 = vadd.f32 %v952_v20, %v479_v41 }
  0xbd   :  { %v518_v43 = vmax.f32 %v494_v42, 0.0 }
  0xbe   :  { %v452_v45 = vpop.f32.mrf.mxu2  ;;  %v399_v48 = vpop.f32.mrf.mxu0 }
  0xbf   :  { %v480_v46 = vpop.f32.mrf.mxu3  ;;  %525 = vst [vmem:[%s985_s3 + $0x10] sm:$0xff] %v518_v43  ;;  %v453_v47 = vadd.f32 %v452_v45, %v425_v44  ;;  %v427_v49 = vpop.f32.mrf.mxu1 }
  0xc0   :  { %v428_v52 = vadd.f32 %v427_v49, %v399_v48 }
  0xc1   :  { %v481_v50 = vadd.f32 %v480_v46, %v453_v47 }
  0xc3   :  { %v495_v51 = vadd.f32 %v952_v20, %v481_v50 }
  0xc5   :  { %v519_v53 = vmax.f32 %v495_v51, 0.0 }
  0xc6   :  { %v455_v54 = vpop.f32.mrf.mxu2  ;;  %v401_v57 = vpop.f32.mrf.mxu0 }
  0xc7   :  { %v483_v55 = vpop.f32.mrf.mxu3  ;;  %526 = vst [vmem:[%s985_s3 + $0x18] sm:$0xff] %v519_v53  ;;  %v456_v56 = vadd.f32 %v455_v54, %v428_v52  ;;  %v429_v58 = vpop.f32.mrf.mxu1 }
  0xc8   :  { %v430_v62 = vadd.f32 %v429_v58, %v401_v57 }
  0xc9   :  { %v484_v59 = vadd.f32 %v483_v55, %v456_v56 }
  0xcb   :  { %v496_v60 = vadd.f32 %v952_v20, %v484_v59 }
  0xcd   :  { %v520_v61 = vmax.f32 %v496_v60, 0.0 }
  0xce   :  { %v457_v63 = vpop.f32.mrf.mxu2  ;;  %v404_v2 = vpop.f32.mrf.mxu0 }
  0xcf   :  { %v485_v0 = vpop.f32.mrf.mxu3  ;;  %527 = vst [vmem:[%s985_s3 + $0x20] sm:$0xff] %v520_v61  ;;  %v458_v1 = vadd.f32 %v457_v63, %v430_v62  ;;  %v432_v3 = vpop.f32.mrf.mxu1 }
  0xd0   :  { %v433_v6 = vadd.f32 %v432_v3, %v404_v2 }
  0xd1   :  { %v486_v4 = vadd.f32 %v485_v0, %v458_v1 }
  0xd3   :  { %v497_v5 = vadd.f32 %v952_v20, %v486_v4 }
  0xd5   :  { %v521_v7 = vmax.f32 %v497_v5, 0.0 }
  0xd6   :  { %v460_v8 = vpop.f32.mrf.mxu2  ;;  %v406_v11 = vpop.f32.mrf.mxu0 }
  0xd7   :  { %v488_v9 = vpop.f32.mrf.mxu3  ;;  %528 = vst [vmem:[%s985_s3 + $0x28] sm:$0xff] %v521_v7  ;;  %v461_v10 = vadd.f32 %v460_v8, %v433_v6  ;;  %v434_v12 = vpop.f32.mrf.mxu1 }
  0xd9   :  { %v489_v13 = vadd.f32 %v488_v9, %v461_v10 }
  0xdb   :  { %v498_v14 = vadd.f32 %v952_v20, %v489_v13 }
  0xdd   :  { %v522_v15 = vmax.f32 %v498_v14, 0.0 }
  0xde   :  { %v462_v16 = vpop.f32.mrf.mxu2 }
  0xdf   :  { %v490_v17 = vpop.f32.mrf.mxu3  ;;  %529 = vst [vmem:[%s985_s3 + $0x30] sm:$0xff] %v522_v15 }

// kernel: bilinear_cnn_forward.16
= control target key start
LH: loop header
LB: loop body
LE: loop exit
PB: predicated region body
PF: predicated region fallthrough
CT: control target
= control target key end

     0   :  { %s356_s6 = smov 0   ;;  %s458_s0 = inlined_call_operand.vmem [shape: f32[2,128,128], index: 0, kind: input, shape index: {}]   ;;  %s459_s1 = inlined_call_operand.vmem [shape: f32[2,128,128], index: 1, kind: output, shape index: {}]  }
   0x1 LB: > { %s269_s7 = sadd.s32 4294967295, %s344_s6   ;;  %p273_p0 = scmp.ge.s32.totalorder %s344_s6, 1  ;;  %s344_s6 = sphi %s356_s6, %s11_s6  }
   0x2   : > { %p87_p1 = scmp.lt.s32.totalorder %s344_s6, 3 }
   0x4   : > { %p88_p2 = pnand %p273_p0, %p87_p1 }
   0x5   : > { %p107_p3 = scmp.lt.s32.totalorder (!%p88_p2), %s269_s7, 1 }
   0x6   : > { %91 = sbr.rel (%p88_p2) target bundleno = 236 (0xec), region = 24 }
   0xb   : > { %s461_s7 = smov (!%p107_p3, %s269_s7), 1 }
   0xc   : > { %s280_s8 = sshll.u32 %s461_s7, 7 }
   0xd   : > { %s372_s11 = scalar_lea.vmem %s458_s0, %s280_s8  ;;  %s437_s14 = scalar_lea.vmem %s459_s1, %s280_s8 }
   0xe   : > { %v375_v0 = vld [vmem:[%s372_s11 + $0x78] sm:$0xff]  ;;  %v380_v1 = vld [vmem:[%s372_s11 + $0x70] sm:$0xff]  ;;  %v387_v2 = vld [vmem:[%s372_s11 + $0x68] sm:$0xff] }
   0xf   : > { %283 = vmatpush.xpose.msra.mxu2 %v375_v0  ;;  %284 = vmatpush.xpose.msra.mxu3 %v375_v0  ;;  %v394_v3 = vld [vmem:[%s372_s11 + $0x60] sm:$0xff]  ;;  %v401_v4 = vld [vmem:[%s372_s11 + $0x58] sm:$0xff]  ;;  %v408_v5 = vld [vmem:[%s372_s11 + $0x50] sm:$0xff] }
  0x10   : > { %133 = vmatpush.xpose.msra.mxu0 %v375_v0  ;;  %282 = vmatpush.xpose.msra.mxu1 %v375_v0  ;;  %v126_v6 = vld [vmem:[%s372_s11 + $0x48] sm:$0xff]  ;;  %v125_v7 = vld [vmem:[%s372_s11 + $0x40] sm:$0xff]  ;;  %v124_v8 = vld [vmem:[%s372_s11 + $0x38] sm:$0xff] }
  0x11   : > { %v123_v9 = vld [vmem:[%s372_s11 + $0x30] sm:$0xff]  ;;  %v122_v10 = vld [vmem:[%s372_s11 + $0x28] sm:$0xff]  ;;  %v121_v11 = vld [vmem:[%s372_s11 + $0x20] sm:$0xff] }
  0x12   : > { %v120_v12 = vld [vmem:[%s372_s11 + $0x18] sm:$0xff]  ;;  %v119_v13 = vld [vmem:[%s372_s11 + $0x10] sm:$0xff]  ;;  %v118_v14 = vld [vmem:[%s372_s11 + $0x8] sm:$0xff] }
  0x13   : > { %286 = vmatpush.xpose.msra.mxu2 %v380_v1  ;;  %287 = vmatpush.xpose.msra.mxu3 %v380_v1  ;;  %v117_v15 = vld [vmem:[%s372_s11] sm:$0xff] }
  0x14   : > { %134 = vmatpush.xpose.msra.mxu0 %v380_v1  ;;  %285 = vmatpush.xpose.msra.mxu1 %v380_v1 }
  0x17   : > { %289 = vmatpush.xpose.msra.mxu2 %v387_v2  ;;  %290 = vmatpush.xpose.msra.mxu3 %v387_v2 }
  0x18   : > { %135 = vmatpush.xpose.msra.mxu0 %v387_v2  ;;  %288 = vmatpush.xpose.msra.mxu1 %v387_v2 }
  0x1b   : > { %292 = vmatpush.xpose.msra.mxu2 %v394_v3  ;;  %293 = vmatpush.xpose.msra.mxu3 %v394_v3 }
  0x1c   : > { %136 = vmatpush.xpose.msra.mxu0 %v394_v3  ;;  %291 = vmatpush.xpose.msra.mxu1 %v394_v3 }
  0x1f   : > { %295 = vmatpush.xpose.msra.mxu2 %v401_v4  ;;  %296 = vmatpush.xpose.msra.mxu3 %v401_v4 }
  0x20   : > { %137 = vmatpush.xpose.msra.mxu0 %v401_v4  ;;  %294 = vmatpush.xpose.msra.mxu1 %v401_v4 }
  0x23   : > { %298 = vmatpush.xpose.msra.mxu2 %v408_v5  ;;  %299 = vmatpush.xpose.msra.mxu3 %v408_v5 }
  0x24   : > { %138 = vmatpush.xpose.msra.mxu0 %v408_v5  ;;  %297 = vmatpush.xpose.msra.mxu1 %v408_v5 }
  0x27   : > { %301 = vmatpush.xpose.msra.mxu2 %v126_v6  ;;  %302 = vmatpush.xpose.msra.mxu3 %v126_v6 }
  0x28   : > { %139 = vmatpush.xpose.msra.mxu0 %v126_v6  ;;  %300 = vmatpush.xpose.msra.mxu1 %v126_v6 }
  0x2b   : > { %304 = vmatpush.xpose.msra.mxu2 %v125_v7  ;;  %305 = vmatpush.xpose.msra.mxu3 %v125_v7 }
  0x2c   : > { %140 = vmatpush.xpose.msra.mxu0 %v125_v7  ;;  %303 = vmatpush.xpose.msra.mxu1 %v125_v7 }
  0x2f   : > { %307 = vmatpush.xpose.msra.mxu2 %v124_v8  ;;  %308 = vmatpush.xpose.msra.mxu3 %v124_v8 }
  0x30   : > { %141 = vmatpush.xpose.msra.mxu0 %v124_v8  ;;  %306 = vmatpush.xpose.msra.mxu1 %v124_v8 }
  0x33   : > { %310 = vmatpush.xpose.msra.mxu2 %v123_v9  ;;  %311 = vmatpush.xpose.msra.mxu3 %v123_v9 }
  0x34   : > { %142 = vmatpush.xpose.msra.mxu0 %v123_v9  ;;  %309 = vmatpush.xpose.msra.mxu1 %v123_v9 }
  0x37   : > { %313 = vmatpush.xpose.msra.mxu2 %v122_v10  ;;  %314 = vmatpush.xpose.msra.mxu3 %v122_v10 }
  0x38   : > { %143 = vmatpush.xpose.msra.mxu0 %v122_v10  ;;  %312 = vmatpush.xpose.msra.mxu1 %v122_v10 }
  0x3b   : > { %316 = vmatpush.xpose.msra.mxu2 %v121_v11  ;;  %317 = vmatpush.xpose.msra.mxu3 %v121_v11 }
  0x3c   : > { %144 = vmatpush.xpose.msra.mxu0 %v121_v11  ;;  %315 = vmatpush.xpose.msra.mxu1 %v121_v11 }
  0x3f   : > { %319 = vmatpush.xpose.msra.mxu2 %v120_v12  ;;  %320 = vmatpush.xpose.msra.mxu3 %v120_v12 }
  0x40   : > { %145 = vmatpush.xpose.msra.mxu0 %v120_v12  ;;  %318 = vmatpush.xpose.msra.mxu1 %v120_v12 }
  0x43   : > { %322 = vmatpush.xpose.msra.mxu2 %v119_v13  ;;  %323 = vmatpush.xpose.msra.mxu3 %v119_v13 }
  0x44   : > { %146 = vmatpush.xpose.msra.mxu0 %v119_v13  ;;  %321 = vmatpush.xpose.msra.mxu1 %v119_v13 }
  0x47   : > { %325 = vmatpush.xpose.msra.mxu2 %v118_v14  ;;  %326 = vmatpush.xpose.msra.mxu3 %v118_v14 }
  0x48   : > { %147 = vmatpush.xpose.msra.mxu0 %v118_v14  ;;  %324 = vmatpush.xpose.msra.mxu1 %v118_v14 }
  0x4b   : > { %328 = vmatpush.xpose.msra.mxu2 %v117_v15  ;;  %329 = vmatpush.xpose.msra.mxu3 %v117_v15 }
  0x4c   : > { %148 = vmatpush.xpose.msra.mxu0 %v117_v15  ;;  %327 = vmatpush.xpose.msra.mxu1 %v117_v15 }
  0x4e   : > { %173 = vmatmul.f32.vlgmr.msra.gmra.mxu2 %v125_v7  ;;  %185 = vmatmul.f32.vlgmr.msra.gmra.mxu3 %v394_v3 }
  0x4f   : > { %149 = vmatmul.f32.vlgmr.msra.gmra.mxu0 %v117_v15  ;;  %161 = vmatmul.f32.vlgmr.msra.gmra.mxu1 %v121_v11 }
  0x56   : > { %176 = vmatmul.f32.gmra.mxu2 %v126_v6  ;;  %188 = vmatmul.f32.gmra.mxu3 %v387_v2 }
  0x57   : > { %152 = vmatmul.f32.gmra.mxu0 %v118_v14  ;;  %164 = vmatmul.f32.gmra.mxu1 %v122_v10 }
  0x5e   : > { %179 = vmatmul.f32.gmra.mxu2 %v408_v5  ;;  %191 = vmatmul.f32.gmra.mxu3 %v380_v1 }
  0x5f   : > { %155 = vmatmul.f32.gmra.mxu0 %v119_v13  ;;  %167 = vmatmul.f32.gmra.mxu1 %v123_v9 }
  0x66   : > { %182 = vmatmul.f32.gmra.mxu2 %v401_v4  ;;  %194 = vmatmul.f32.gmra.mxu3 %v375_v0 }
  0x67   : > { %158 = vmatmul.f32.gmra.mxu0 %v120_v12  ;;  %170 = vmatmul.f32.gmra.mxu1 %v124_v8 }
  0xcc   : > { %v150_v16 = vpop.f32.mrf.mxu0  ;;  %v162_v17 = vpop.f32.mrf.mxu1 }
  0xcd   : > { %198 = vst [vmem:[%s437_s14] sm:$0xff] %v150_v16 }
  0xce   : > { %202 = vst [vmem:[%s437_s14 + $0x20] sm:$0xff] %v162_v17 }
  0xd1   : > { %v174_v18 = vpop.f32.mrf.mxu2  ;;  %v186_v19 = vpop.f32.mrf.mxu3 }
  0xd2   : > { %206 = vst [vmem:[%s437_s14 + $0x40] sm:$0xff] %v174_v18 }
  0xd3   : > { %210 = vst [vmem:[%s437_s14 + $0x60] sm:$0xff] %v186_v19 }
  0xd4   : > { %v153_v20 = vpop.f32.mrf.mxu0  ;;  %v165_v21 = vpop.f32.mrf.mxu1 }
  0xd5   : > { %199 = vst [vmem:[%s437_s14 + $0x8] sm:$0xff] %v153_v20 }
  0xd6   : > { %203 = vst [vmem:[%s437_s14 + $0x28] sm:$0xff] %v165_v21 }
  0xd9   : > { %v177_v22 = vpop.f32.mrf.mxu2  ;;  %v189_v23 = vpop.f32.mrf.mxu3 }
  0xda   : > { %207 = vst [vmem:[%s437_s14 + $0x48] sm:$0xff] %v177_v22 }
  0xdb   : > { %211 = vst [vmem:[%s437_s14 + $0x68] sm:$0xff] %v189_v23 }
  0xdc   : > { %v156_v24 = vpop.f32.mrf.mxu0  ;;  %v168_v25 = vpop.f32.mrf.mxu1 }
  0xdd   : > { %200 = vst [vmem:[%s437_s14 + $0x10] sm:$0xff] %v156_v24 }
  0xde   : > { %204 = vst [vmem:[%s437_s14 + $0x30] sm:$0xff] %v168_v25 }
  0xe1   : > { %v180_v26 = vpop.f32.mrf.mxu2  ;;  %v192_v27 = vpop.f32.mrf.mxu3 }
  0xe2   : > { %208 = vst [vmem:[%s437_s14 + $0x50] sm:$0xff] %v180_v26 }
  0xe3   : > { %212 = vst [vmem:[%s437_s14 + $0x70] sm:$0xff] %v192_v27 }
  0xe4   : > { %v159_v28 = vpop.f32.mrf.mxu0  ;;  %v171_v29 = vpop.f32.mrf.mxu1 }
  0xe5   : > { %201 = vst [vmem:[%s437_s14 + $0x18] sm:$0xff] %v159_v28 }
  0xe6   : > { %205 = vst [vmem:[%s437_s14 + $0x38] sm:$0xff] %v171_v29 }
  0xe9   : > { %v183_v30 = vpop.f32.mrf.mxu2  ;;  %v195_v31 = vpop.f32.mrf.mxu3 }
  0xea   : > { %209 = vst [vmem:[%s437_s14 + $0x58] sm:$0xff] %v183_v30 }
  0xeb   : > { %213 = vst [vmem:[%s437_s14 + $0x78] sm:$0xff] %v195_v31 }
  0xec PF: > { %s11_s6 = sadd.s32 1, %s344_s6  }
  0xed   : > { %p8_p4 = scmp.ge.s32.totalorder %s11_s6, 4  }
  0xef   :  { %10 = sbr.rel (!%p8_p4) target bundleno = 1 (0x1), region = 54 }

// kernel: bilinear_cnn_forward.18
= control target key start
LH: loop header
LB: loop body
LE: loop exit
PB: predicated region body
PF: predicated region fallthrough
CT: control target
= control target key end

     0   :  { %s356_s1 = inlined_call_operand.vmem [shape: bf16[256,128], index: 1, kind: input, shape index: {}]   ;;  %s357_s0 = inlined_call_operand.vmem [shape: bf16[8,256], index: 0, kind: input, shape index: {}]   ;;  %s358_s2 = inlined_call_operand.vmem [shape: f32[1,128], index: 2, kind: input, shape index: {}]   ;;  %s359_s3 = inlined_call_operand.vmem [shape: f32[8,128], index: 3, kind: output, shape index: {}]  }
   0x1   :  { %v269_v0 = vld [vmem:[%s356_s1 + $0x38] sm:$0xff]  ;;  %v268_v2 = vld [vmem:[%s356_s1 + $0x30] sm:$0xff]  ;;  %v267_v4 = vld [vmem:[%s356_s1 + $0x28] sm:$0xff] }
   0x2   :  { %v277_v1 = vld [vmem:[%s356_s1 + $0x78] sm:$0xff]  ;;  %160 = vmatpush.bf16.msra.mxu0 %v269_v0  ;;  %v276_v3 = vld [vmem:[%s356_s1 + $0x70] sm:$0xff]  ;;  %v275_v5 = vld [vmem:[%s356_s1 + $0x68] sm:$0xff] }
   0x3   :  { %173 = vmatpush.bf16.msra.mxu1 %v277_v1  ;;  %v266_v6 = vld [vmem:[%s356_s1 + $0x20] sm:$0xff]  ;;  %v265_v8 = vld [vmem:[%s356_s1 + $0x18] sm:$0xff]  ;;  %v264_v10 = vld [vmem:[%s356_s1 + $0x10] sm:$0xff] }
   0x4   :  { %v274_v7 = vld [vmem:[%s356_s1 + $0x60] sm:$0xff]  ;;  %v273_v9 = vld [vmem:[%s356_s1 + $0x58] sm:$0xff]  ;;  %v272_v11 = vld [vmem:[%s356_s1 + $0x50] sm:$0xff] }
   0x5   :  { %v263_v12 = vld [vmem:[%s356_s1 + $0x8] sm:$0xff]  ;;  %v24_v14 = vld [vmem:[%s357_s0] sm:$0xff] }
   0x6   :  { %161 = vmatpush.bf16.msra.mxu0 %v268_v2  ;;  %v271_v13 = vld [vmem:[%s356_s1 + $0x48] sm:$0xff]  ;;  %v58_v15 = vunpack.c.l.b16 %v24_v14  ;;  %v59_v16 = vunpack.c.h.b16 %v24_v14  ;;  %v262_v17 = vld [vmem:[%s356_s1] sm:$0xff] }
   0x7   :  { %174 = vmatpush.bf16.msra.mxu1 %v276_v3  ;;  %v270_v18 = vld [vmem:[%s356_s1 + $0x40] sm:$0xff] }
   0x8   :  { %v60_v19 = vpack.c.b16 %v58_v15, %v58_v15  ;;  %v61_v20 = vpack.c.b16 %v59_v16, %v59_v16  ;;  %v278_v21 = vld [vmem:[%s358_s2] ss:$0 sm:$0xff] }
   0xa   :  { %162 = vmatpush.bf16.msra.mxu0 %v267_v4 }
   0xb   :  { %175 = vmatpush.bf16.msra.mxu1 %v275_v5 }
   0xe   :  { %163 = vmatpush.bf16.msra.mxu0 %v266_v6 }
   0xf   :  { %176 = vmatpush.bf16.msra.mxu1 %v274_v7 }
  0x12   :  { %164 = vmatpush.bf16.msra.mxu0 %v265_v8 }
  0x13   :  { %177 = vmatpush.bf16.msra.mxu1 %v273_v9 }
  0x16   :  { %165 = vmatpush.bf16.msra.mxu0 %v264_v10 }
  0x17   :  { %178 = vmatpush.bf16.msra.mxu1 %v272_v11 }
  0x1a   :  { %166 = vmatpush.bf16.msra.mxu0 %v263_v12 }
  0x1b   :  { %179 = vmatpush.bf16.msra.mxu1 %v271_v13 }
  0x1e   :  { %167 = vmatpush.bf16.msra.mxu0 %v262_v17 }
  0x1f   :  { %180 = vmatpush.bf16.msra.mxu1 %v270_v18 }
  0x21   :  { %168 = vmatmul.bf16.vlgmr.msra.gmra.mxu0 %v60_v19 }
  0x22   :  { %181 = vmatmul.bf16.vlgmr.msra.gmra.mxu1 %v61_v20 }
  0x9e   :  { %v169_v22 = vpop.f32.mrf.mxu0 }
  0x9f   :  { %v182_v23 = vpop.f32.mrf.mxu1 }
  0xa0   :  { %v183_v24 = vadd.f32 %v182_v23, %v169_v22 }
  0xa2   :  { %v186_v25 = vadd.f32 %v278_v21, %v183_v24 }
  0xa4   :  { %v192_v26 = vmax.f32 %v186_v25, 0.0 }
  0xa6   :  { %193 = vst [vmem:[%s359_s3] sm:$0xff] %v192_v26  ;;  %v171_v27 = vpop.f32.mrf.mxu0 }
  0xa7   :  { %v184_v28 = vpop.f32.mrf.mxu1 }

// kernel: bilinear_cnn_forward.19
= control target key start
LH: loop header
LB: loop body
LE: loop exit
PB: predicated region body
PF: predicated region fallthrough
CT: control target
= control target key end

     0   :  { %s208_s1 = inlined_call_operand.vmem [shape: bf16[128,128], index: 1, kind: input, shape index: {}]   ;;  %s209_s2 = inlined_call_operand.vmem [shape: f32[1,128], index: 2, kind: input, shape index: {}]   ;;  %s210_s0 = inlined_call_operand.vmem [shape: bf16[8,128], index: 0, kind: input, shape index: {}]   ;;  %s211_s3 = inlined_call_operand.vmem [shape: f32[8,128], index: 3, kind: output, shape index: {}]  }
   0x1   :  { %v153_v0 = vld [vmem:[%s208_s1 + $0x38] sm:$0xff]  ;;  %v152_v1 = vld [vmem:[%s208_s1 + $0x30] sm:$0xff]  ;;  %v151_v2 = vld [vmem:[%s208_s1 + $0x28] sm:$0xff] }
   0x2   :  { %89 = vmatpush.bf16.msra.mxu0 %v153_v0  ;;  %v150_v3 = vld [vmem:[%s208_s1 + $0x20] sm:$0xff]  ;;  %v149_v4 = vld [vmem:[%s208_s1 + $0x18] sm:$0xff]  ;;  %v148_v5 = vld [vmem:[%s208_s1 + $0x10] sm:$0xff] }
   0x3   :  { %v147_v6 = vld [vmem:[%s208_s1 + $0x8] sm:$0xff]  ;;  %v146_v7 = vld [vmem:[%s208_s1] sm:$0xff] }
   0x4   :  { %v24_v8 = vld [vmem:[%s210_s0] sm:$0xf] }
   0x5   :  { %v154_v9 = vld [vmem:[%s209_s2] ss:$0 sm:$0xff] }
   0x6   :  { %90 = vmatpush.bf16.msra.mxu0 %v152_v1 }
   0xa   :  { %91 = vmatpush.bf16.msra.mxu0 %v151_v2 }
   0xe   :  { %92 = vmatpush.bf16.msra.mxu0 %v150_v3 }
  0x12   :  { %93 = vmatpush.bf16.msra.mxu0 %v149_v4 }
  0x16   :  { %94 = vmatpush.bf16.msra.mxu0 %v148_v5 }
  0x1a   :  { %95 = vmatpush.bf16.msra.mxu0 %v147_v6 }
  0x1e   :  { %96 = vmatpush.bf16.msra.mxu0 %v146_v7 }
  0x21   :  { %97 = vmatmul.bf16.vlgmr.msra.gmra.mxu0 %v24_v8 }
  0x9e   :  { %v98_v10 = vpop.f32.mrf.mxu0 }
  0x9f   :  { %v102_v11 = vadd.f32 %v154_v9, %v98_v10 }
  0xa1   :  { %v108_v12 = vmax.f32 %v102_v11, 0.0 }
  0xa3   :  { %109 = vst [vmem:[%s211_s3] sm:$0xff] %v108_v12 }
  0xa6   :  { %v100_v13 = vpop.f32.mrf.mxu0 }

// kernel: bilinear_cnn_forward.17
= control target key start
LH: loop header
LB: loop body
LE: loop exit
PB: predicated region body
PF: predicated region fallthrough
CT: control target
= control target key end

     0   :  { %s2534_s1 = inlined_call_operand.vmem [shape: bf16[1024,256], index: 1, kind: input, shape index: {}]   ;;  %s2535_s0 = inlined_call_operand.vmem [shape: bf16[8,1024], index: 0, kind: input, shape index: {}]   ;;  %s2536_s2 = inlined_call_operand.vmem [shape: f32[1,256], index: 2, kind: input, shape index: {}]   ;;  %s2537_s3 = inlined_call_operand.vmem [shape: f32[8,256], index: 3, kind: output, shape index: {}]  }
   0x1   :  { %v1111_v0 = vld [vmem:[%s2534_s1 + $0x70] sm:$0xf]  ;;  %v1580_v1 = vld [vmem:[%s2534_s1 + $0x74] sm:$0xf0]  ;;  %v1103_v11 = vld [vmem:[%s2534_s1 + $0x60] sm:$0xf] }
   0x2   :  { %v1175_v2 = vld [vmem:[%s2534_s1 + $0xf0] sm:$0xf]  ;;  %v1112_v3 = vor.u32 %v1580_v1, %v1111_v0  ;;  %v1596_v4 = vld [vmem:[%s2534_s1 + $0xf4] sm:$0xf0]  ;;  %v1578_v13 = vld [vmem:[%s2534_s1 + $0x64] sm:$0xf0] }
   0x3   :  { %v1239_v5 = vld [vmem:[%s2534_s1 + $0x170] sm:$0xf]  ;;  %v1612_v6 = vld [vmem:[%s2534_s1 + $0x174] sm:$0xf0]  ;;  %v1176_v7 = vor.u32 %v1596_v4, %v1175_v2  ;;  %v1167_v14 = vld [vmem:[%s2534_s1 + $0xe0] sm:$0xf]  ;;  %v1104_v16 = vor.u32 %v1578_v13, %v1103_v11 }
   0x4   :  { %v1240_v8 = vor.u32 %v1612_v6, %v1239_v5  ;;  %v1303_v9 = vld [vmem:[%s2534_s1 + $0x1f0] sm:$0xf]  ;;  %v1628_v10 = vld [vmem:[%s2534_s1 + $0x1f4] sm:$0xf0]  ;;  %828 = vmatpush.bf16.msra.mxu0 %v1112_v3  ;;  %v1594_v15 = vld [vmem:[%s2534_s1 + $0xe4] sm:$0xf0] }
   0x5   :  { %v1304_v12 = vor.u32 %v1628_v10, %v1303_v9  ;;  %841 = vmatpush.bf16.msra.mxu1 %v1176_v7  ;;  %v1168_v17 = vor.u32 %v1594_v15, %v1167_v14  ;;  %v1231_v18 = vld [vmem:[%s2534_s1 + $0x160] sm:$0xf]  ;;  %v1610_v19 = vld [vmem:[%s2534_s1 + $0x164] sm:$0xf0]  ;;  %v1095_v23 = vld [vmem:[%s2534_s1 + $0x50] sm:$0xf] }
   0x6   :  { %854 = vmatpush.bf16.msra.mxu2 %v1240_v8  ;;  %v1295_v20 = vld [vmem:[%s2534_s1 + $0x1e0] sm:$0xf]  ;;  %v1232_v21 = vor.u32 %v1610_v19, %v1231_v18  ;;  %v1626_v22 = vld [vmem:[%s2534_s1 + $0x1e4] sm:$0xf0]  ;;  %v1576_v24 = vld [vmem:[%s2534_s1 + $0x54] sm:$0xf0] }
   0x7   :  { %867 = vmatpush.bf16.msra.mxu3 %v1304_v12  ;;  %v1296_v25 = vor.u32 %v1626_v22, %v1295_v20  ;;  %v1159_v26 = vld [vmem:[%s2534_s1 + $0xd0] sm:$0xf]  ;;  %v1592_v27 = vld [vmem:[%s2534_s1 + $0xd4] sm:$0xf0]  ;;  %v1096_v29 = vor.u32 %v1576_v24, %v1095_v23  ;;  %v1087_v35 = vld [vmem:[%s2534_s1 + $0x40] sm:$0xf] }
   0x8   :  { %v1223_v28 = vld [vmem:[%s2534_s1 + $0x150] sm:$0xf]  ;;  %829 = vmatpush.bf16.msra.mxu0 %v1104_v16  ;;  %v1608_v30 = vld [vmem:[%s2534_s1 + $0x154] sm:$0xf0]  ;;  %v1160_v33 = vor.u32 %v1592_v27, %v1159_v26  ;;  %v1574_v36 = vld [vmem:[%s2534_s1 + $0x44] sm:$0xf0] }
   0x9   :  { %v1287_v31 = vld [vmem:[%s2534_s1 + $0x1d0] sm:$0xf]  ;;  %v1624_v32 = vld [vmem:[%s2534_s1 + $0x1d4] sm:$0xf0]  ;;  %842 = vmatpush.bf16.msra.mxu1 %v1168_v17  ;;  %v1224_v34 = vor.u32 %v1608_v30, %v1223_v28  ;;  %v1151_v37 = vld [vmem:[%s2534_s1 + $0xc0] sm:$0xf]  ;;  %v1088_v44 = vor.u32 %v1574_v36, %v1087_v35 }
   0xa   :  { %855 = vmatpush.bf16.msra.mxu2 %v1232_v21  ;;  %v1288_v38 = vor.u32 %v1624_v32, %v1287_v31  ;;  %v1590_v39 = vld [vmem:[%s2534_s1 + $0xc4] sm:$0xf0]  ;;  %v1215_v40 = vld [vmem:[%s2534_s1 + $0x140] sm:$0xf]  ;;  %v1079_v47 = vld [vmem:[%s2534_s1 + $0x30] sm:$0xf] }
   0xb   :  { %868 = vmatpush.bf16.msra.mxu3 %v1296_v25  ;;  %v1606_v41 = vld [vmem:[%s2534_s1 + $0x144] sm:$0xf0]  ;;  %v1279_v42 = vld [vmem:[%s2534_s1 + $0x1c0] sm:$0xf]  ;;  %v1152_v45 = vor.u32 %v1590_v39, %v1151_v37  ;;  %v1572_v48 = vld [vmem:[%s2534_s1 + $0x34] sm:$0xf0] }
   0xc   :  { %v1622_v43 = vld [vmem:[%s2534_s1 + $0x1c4] sm:$0xf0]  ;;  %830 = vmatpush.bf16.msra.mxu0 %v1096_v29  ;;  %v1216_v46 = vor.u32 %v1606_v41, %v1215_v40  ;;  %v1143_v49 = vld [vmem:[%s2534_s1 + $0xb0] sm:$0xf]  ;;  %v1588_v51 = vld [vmem:[%s2534_s1 + $0xb4] sm:$0xf0]  ;;  %v1080_v56 = vor.u32 %v1572_v48, %v1079_v47 }
   0xd   :  { %843 = vmatpush.bf16.msra.mxu1 %v1160_v33  ;;  %v1280_v50 = vor.u32 %v1622_v43, %v1279_v42  ;;  %v1207_v52 = vld [vmem:[%s2534_s1 + $0x130] sm:$0xf]  ;;  %v1604_v53 = vld [vmem:[%s2534_s1 + $0x134] sm:$0xf0]  ;;  %v1144_v57 = vor.u32 %v1588_v51, %v1143_v49  ;;  %v1071_v59 = vld [vmem:[%s2534_s1 + $0x20] sm:$0xf] }
   0xe   :  { %856 = vmatpush.bf16.msra.mxu2 %v1224_v34  ;;  %v1271_v54 = vld [vmem:[%s2534_s1 + $0x1b0] sm:$0xf]  ;;  %v1620_v55 = vld [vmem:[%s2534_s1 + $0x1b4] sm:$0xf0]  ;;  %v1208_v58 = vor.u32 %v1604_v53, %v1207_v52  ;;  %v1570_v60 = vld [vmem:[%s2534_s1 + $0x24] sm:$0xf0] }
   0xf   :  { %869 = vmatpush.bf16.msra.mxu3 %v1288_v38  ;;  %v1135_v61 = vld [vmem:[%s2534_s1 + $0xa0] sm:$0xf]  ;;  %v1272_v62 = vor.u32 %v1620_v55, %v1271_v54  ;;  %v1586_v63 = vld [vmem:[%s2534_s1 + $0xa4] sm:$0xf0]  ;;  %v1072_v4 = vor.u32 %v1570_v60, %v1071_v59  ;;  %v1063_v7 = vld [vmem:[%s2534_s1 + $0x10] sm:$0xf] }
  0x10   :  { %831 = vmatpush.bf16.msra.mxu0 %v1088_v44  ;;  %v1199_v0 = vld [vmem:[%s2534_s1 + $0x120] sm:$0xf]  ;;  %v1602_v1 = vld [vmem:[%s2534_s1 + $0x124] sm:$0xf0]  ;;  %v1136_v5 = vor.u32 %v1586_v63, %v1135_v61  ;;  %v1568_v8 = vld [vmem:[%s2534_s1 + $0x14] sm:$0xf0] }
  0x11   :  { %844 = vmatpush.bf16.msra.mxu1 %v1152_v45  ;;  %v1263_v2 = vld [vmem:[%s2534_s1 + $0x1a0] sm:$0xf]  ;;  %v1618_v3 = vld [vmem:[%s2534_s1 + $0x1a4] sm:$0xf0]  ;;  %v1200_v6 = vor.u32 %v1602_v1, %v1199_v0  ;;  %v1127_v9 = vld [vmem:[%s2534_s1 + $0x90] sm:$0xf]  ;;  %v1064_v16 = vor.u32 %v1568_v8, %v1063_v7 }
  0x12   :  { %857 = vmatpush.bf16.msra.mxu2 %v1216_v46  ;;  %v1264_v10 = vor.u32 %v1618_v3, %v1263_v2  ;;  %v1584_v11 = vld [vmem:[%s2534_s1 + $0x94] sm:$0xf0]  ;;  %v1191_v12 = vld [vmem:[%s2534_s1 + $0x110] sm:$0xf]  ;;  %v1055_v17 = vld [vmem:[%s2534_s1] sm:$0xf] }
  0x13   :  { %870 = vmatpush.bf16.msra.mxu3 %v1280_v50  ;;  %v1600_v13 = vld [vmem:[%s2534_s1 + $0x114] sm:$0xf0]  ;;  %v1255_v14 = vld [vmem:[%s2534_s1 + $0x190] sm:$0xf]  ;;  %v1566_v18 = vld [vmem:[%s2534_s1 + $0x4] sm:$0xf0]  ;;  %v1128_v19 = vor.u32 %v1584_v11, %v1127_v9 }
  0x14   :  { %832 = vmatpush.bf16.msra.mxu0 %v1080_v56  ;;  %v1616_v15 = vld [vmem:[%s2534_s1 + $0x194] sm:$0xf0]  ;;  %v1192_v20 = vor.u32 %v1600_v13, %v1191_v12  ;;  %v1119_v21 = vld [vmem:[%s2534_s1 + $0x80] sm:$0xf]  ;;  %v1582_v22 = vld [vmem:[%s2534_s1 + $0x84] sm:$0xf0]  ;;  %v1056_v31 = vor.u32 %v1566_v18, %v1055_v17 }
  0x15   :  { %845 = vmatpush.bf16.msra.mxu1 %v1144_v57  ;;  %v1183_v23 = vld [vmem:[%s2534_s1 + $0x100] sm:$0xf]  ;;  %v1256_v24 = vor.u32 %v1616_v15, %v1255_v14  ;;  %v1598_v25 = vld [vmem:[%s2534_s1 + $0x104] sm:$0xf0]  ;;  %v1367_v28 = vld [vmem:[%s2534_s1 + $0x270] sm:$0xf]  ;;  %v1120_v35 = vor.u32 %v1582_v22, %v1119_v21 }
  0x16   :  { %858 = vmatpush.bf16.msra.mxu2 %v1208_v58  ;;  %v1247_v26 = vld [vmem:[%s2534_s1 + $0x180] sm:$0xf]  ;;  %v1614_v27 = vld [vmem:[%s2534_s1 + $0x184] sm:$0xf0]  ;;  %v1644_v29 = vld [vmem:[%s2534_s1 + $0x274] sm:$0xf0]  ;;  %v1184_v36 = vor.u32 %v1598_v25, %v1183_v23 }
  0x17   :  { %871 = vmatpush.bf16.msra.mxu3 %v1272_v62  ;;  %v1431_v30 = vld [vmem:[%s2534_s1 + $0x2f0] sm:$0xf]  ;;  %v1660_v32 = vld [vmem:[%s2534_s1 + $0x2f4] sm:$0xf0]  ;;  %v1248_v39 = vor.u32 %v1614_v27, %v1247_v26  ;;  %v1368_v40 = vor.u32 %v1644_v29, %v1367_v28  ;;  %v1359_v43 = vld [vmem:[%s2534_s1 + $0x260] sm:$0xf] }
  0x18   :  { %833 = vmatpush.bf16.msra.mxu0 %v1072_v4  ;;  %v1495_v33 = vld [vmem:[%s2534_s1 + $0x370] sm:$0xf]  ;;  %v1676_v34 = vld [vmem:[%s2534_s1 + $0x374] sm:$0xf0]  ;;  %v1432_v41 = vor.u32 %v1660_v32, %v1431_v30  ;;  %v1642_v44 = vld [vmem:[%s2534_s1 + $0x264] sm:$0xf0] }
  0x19   :  { %846 = vmatpush.bf16.msra.mxu1 %v1136_v5  ;;  %v1559_v37 = vld [vmem:[%s2534_s1 + $0x3f0] sm:$0xf]  ;;  %v1692_v38 = vld [vmem:[%s2534_s1 + $0x3f4] sm:$0xf0]  ;;  %v1496_v42 = vor.u32 %v1676_v34, %v1495_v33  ;;  %v1423_v45 = vld [vmem:[%s2534_s1 + $0x2e0] sm:$0xf]  ;;  %v1360_v52 = vor.u32 %v1642_v44, %v1359_v43 }
  0x1a   :  { %859 = vmatpush.bf16.msra.mxu2 %v1200_v6  ;;  %v1560_v46 = vor.u32 %v1692_v38, %v1559_v37  ;;  %v1658_v47 = vld [vmem:[%s2534_s1 + $0x2e4] sm:$0xf0]  ;;  %v1487_v48 = vld [vmem:[%s2534_s1 + $0x360] sm:$0xf]  ;;  %v1351_v53 = vld [vmem:[%s2534_s1 + $0x250] sm:$0xf] }
  0x1b   :  { %872 = vmatpush.bf16.msra.mxu3 %v1264_v10  ;;  %v1674_v49 = vld [vmem:[%s2534_s1 + $0x364] sm:$0xf0]  ;;  %v1551_v50 = vld [vmem:[%s2534_s1 + $0x3e0] sm:$0xf]  ;;  %v1424_v54 = vor.u32 %v1658_v47, %v1423_v45  ;;  %v1640_v56 = vld [vmem:[%s2534_s1 + $0x254] sm:$0xf0] }
  0x1c   :  { %834 = vmatpush.bf16.msra.mxu0 %v1064_v16  ;;  %v1690_v51 = vld [vmem:[%s2534_s1 + $0x3e4] sm:$0xf0]  ;;  %v1488_v55 = vor.u32 %v1674_v49, %v1487_v48  ;;  %v1415_v57 = vld [vmem:[%s2534_s1 + $0x2d0] sm:$0xf]  ;;  %v1656_v60 = vld [vmem:[%s2534_s1 + $0x2d4] sm:$0xf0]  ;;  %v1352_v3 = vor.u32 %v1640_v56, %v1351_v53 }
  0x1d   :  { %847 = vmatpush.bf16.msra.mxu1 %v1128_v19  ;;  %v29_v58 = vld [vmem:[%s2535_s0 + $0x8] sm:$0xff]  ;;  %v1552_v59 = vor.u32 %v1690_v51, %v1551_v50  ;;  %v1479_v61 = vld [vmem:[%s2534_s1 + $0x350] sm:$0xf]  ;;  %v1672_v62 = vld [vmem:[%s2534_s1 + $0x354] sm:$0xf0]  ;;  %v1416_v7 = vor.u32 %v1656_v60, %v1415_v57 }
  0x1e   :  { %860 = vmatpush.bf16.msra.mxu2 %v1192_v20  ;;  %v166_v63 = vunpack.c.l.b16 %v29_v58  ;;  %v167_v0 = vunpack.c.h.b16 %v29_v58  ;;  %v1543_v1 = vld [vmem:[%s2534_s1 + $0x3d0] sm:$0xf]  ;;  %v1688_v2 = vld [vmem:[%s2534_s1 + $0x3d4] sm:$0xf0]  ;;  %v28_v5 = vld [vmem:[%s2535_s0] sm:$0xff]  ;;  %v1480_v8 = vor.u32 %v1672_v62, %v1479_v61 }
  0x1f   :  { %873 = vmatpush.bf16.msra.mxu3 %v1256_v24  ;;  %v1343_v9 = vld [vmem:[%s2534_s1 + $0x240] sm:$0xf]  ;;  %v1638_v10 = vld [vmem:[%s2534_s1 + $0x244] sm:$0xf0]  ;;  %v164_v12 = vunpack.c.l.b16 %v28_v5  ;;  %v165_v13 = vunpack.c.h.b16 %v28_v5  ;;  %v1544_v14 = vor.u32 %v1688_v2, %v1543_v1  ;;  %v1335_v25 = vld [vmem:[%s2534_s1 + $0x230] sm:$0xf] }
  0x20   :  { %835 = vmatpush.bf16.msra.mxu0 %v1056_v31  ;;  %v1980_v4 = vpack.c.b16 %v166_v63, %v166_v63  ;;  %v1985_v6 = vpack.c.b16 %v167_v0, %v167_v0  ;;  %v1407_v11 = vld [vmem:[%s2534_s1 + $0x2c0] sm:$0xf]  ;;  %v1654_v15 = vld [vmem:[%s2534_s1 + $0x2c4] sm:$0xf0]  ;;  %v1344_v22 = vor.u32 %v1638_v10, %v1343_v9  ;;  %v1636_v26 = vld [vmem:[%s2534_s1 + $0x234] sm:$0xf0] }
  0x21   :  { %848 = vmatpush.bf16.msra.mxu1 %v1120_v35  ;;  %v1471_v16 = vld [vmem:[%s2534_s1 + $0x340] sm:$0xf]  ;;  %v1670_v17 = vld [vmem:[%s2534_s1 + $0x344] sm:$0xf0]  ;;  %v2012_v20 = vpack.c.b16 %v164_v12, %v164_v12  ;;  %v2015_v21 = vpack.c.b16 %v165_v13, %v165_v13  ;;  %v1408_v23 = vor.u32 %v1654_v15, %v1407_v11  ;;  %v1399_v27 = vld [vmem:[%s2534_s1 + $0x2b0] sm:$0xf]  ;;  %v1336_v34 = vor.u32 %v1636_v26, %v1335_v25 }
  0x22   :  { %861 = vmatpush.bf16.msra.mxu2 %v1184_v36  ;;  %v1535_v18 = vld [vmem:[%s2534_s1 + $0x3c0] sm:$0xf]  ;;  %v1686_v19 = vld [vmem:[%s2534_s1 + $0x3c4] sm:$0xf0]  ;;  %v1472_v24 = vor.u32 %v1670_v17, %v1471_v16  ;;  %v1652_v29 = vld [vmem:[%s2534_s1 + $0x2b4] sm:$0xf0] }
  0x23   :  { %874 = vmatpush.bf16.msra.mxu3 %v1248_v39  ;;  %v1536_v28 = vor.u32 %v1686_v19, %v1535_v18  ;;  %v1463_v30 = vld [vmem:[%s2534_s1 + $0x330] sm:$0xf]  ;;  %v1668_v31 = vld [vmem:[%s2534_s1 + $0x334] sm:$0xf0]  ;;  %836 = vmatmul.bf16.vlgmr.msra.gmra.mxu0 %v2012_v20  ;;  %v1400_v35 = vor.u32 %v1652_v29, %v1399_v27  ;;  %v1327_v37 = vld [vmem:[%s2534_s1 + $0x220] sm:$0xf] }
  0x24   :  { %880 = vmatpush.bf16.msrb.mxu0 %v1368_v40  ;;  %v1527_v32 = vld [vmem:[%s2534_s1 + $0x3b0] sm:$0xf]  ;;  %v1684_v33 = vld [vmem:[%s2534_s1 + $0x3b4] sm:$0xf0]  ;;  %849 = vmatmul.bf16.vlgmr.msra.gmra.mxu1 %v2015_v21  ;;  %v1464_v36 = vor.u32 %v1668_v31, %v1463_v30  ;;  %v1634_v38 = vld [vmem:[%s2534_s1 + $0x224] sm:$0xf0] }
  0x25   :  { %893 = vmatpush.bf16.msrb.mxu1 %v1432_v41  ;;  %862 = vmatmul.bf16.vlgmr.msra.gmra.mxu2 %v1980_v4  ;;  %v1391_v39 = vld [vmem:[%s2534_s1 + $0x2a0] sm:$0xf]  ;;  %v1528_v40 = vor.u32 %v1684_v33, %v1527_v32  ;;  %v1650_v41 = vld [vmem:[%s2534_s1 + $0x2a4] sm:$0xf0]  ;;  %v1319_v49 = vld [vmem:[%s2534_s1 + $0x210] sm:$0xf] }
  0x26   :  { %906 = vmatpush.bf16.msrb.mxu2 %v1496_v42  ;;  %875 = vmatmul.bf16.vlgmr.msra.gmra.mxu3 %v1985_v6  ;;  %v1455_v42 = vld [vmem:[%s2534_s1 + $0x320] sm:$0xf]  ;;  %v1666_v43 = vld [vmem:[%s2534_s1 + $0x324] sm:$0xf0]  ;;  %v1392_v47 = vor.u32 %v1650_v41, %v1391_v39  ;;  %v1632_v50 = vld [vmem:[%s2534_s1 + $0x214] sm:$0xf0] }
  0x27   :  { %919 = vmatpush.bf16.msrb.mxu3 %v1560_v46  ;;  %v1519_v44 = vld [vmem:[%s2534_s1 + $0x3a0] sm:$0xf]  ;;  %v1682_v45 = vld [vmem:[%s2534_s1 + $0x3a4] sm:$0xf0]  ;;  %v1328_v46 = vor.u32 %v1634_v38, %v1327_v37  ;;  %v1456_v48 = vor.u32 %v1666_v43, %v1455_v42  ;;  %v1383_v51 = vld [vmem:[%s2534_s1 + $0x290] sm:$0xf] }
  0x28   :  { %881 = vmatpush.bf16.msrb.mxu0 %v1360_v52  ;;  %v1520_v52 = vor.u32 %v1682_v45, %v1519_v44  ;;  %v1648_v53 = vld [vmem:[%s2534_s1 + $0x294] sm:$0xf0]  ;;  %v1511_v56 = vld [vmem:[%s2534_s1 + $0x390] sm:$0xf]  ;;  %v1311_v58 = vld [vmem:[%s2534_s1 + $0x200] sm:$0xf] }
  0x29   :  { %894 = vmatpush.bf16.msrb.mxu1 %v1424_v54  ;;  %v1447_v54 = vld [vmem:[%s2534_s1 + $0x310] sm:$0xf]  ;;  %v1680_v57 = vld [vmem:[%s2534_s1 + $0x394] sm:$0xf0]  ;;  %v1630_v60 = vld [vmem:[%s2534_s1 + $0x204] sm:$0xf0]  ;;  %v1384_v63 = vor.u32 %v1648_v53, %v1383_v51 }
  0x2a   :  { %907 = vmatpush.bf16.msrb.mxu2 %v1488_v55  ;;  %v1664_v55 = vld [vmem:[%s2534_s1 + $0x314] sm:$0xf0]  ;;  %v1375_v61 = vld [vmem:[%s2534_s1 + $0x280] sm:$0xf]  ;;  %v1646_v62 = vld [vmem:[%s2534_s1 + $0x284] sm:$0xf0]  ;;  %v1512_v5 = vor.u32 %v1680_v57, %v1511_v56  ;;  %v1312_v13 = vor.u32 %v1630_v60, %v1311_v58 }
  0x2b   :  { %920 = vmatpush.bf16.msrb.mxu3 %v1552_v59  ;;  %v1320_v59 = vor.u32 %v1632_v50, %v1319_v49  ;;  %v1448_v0 = vor.u32 %v1664_v55, %v1447_v54  ;;  %v1439_v1 = vld [vmem:[%s2534_s1 + $0x300] sm:$0xf]  ;;  %v1662_v2 = vld [vmem:[%s2534_s1 + $0x304] sm:$0xf0]  ;;  %v30_v9 = vld [vmem:[%s2535_s0 + $0x10] sm:$0xff]  ;;  %v1376_v18 = vor.u32 %v1646_v62, %v1375_v61 }
  0x2c   :  { %882 = vmatpush.bf16.msrb.mxu0 %v1352_v3  ;;  %v31_v3 = vld [vmem:[%s2535_s0 + $0x18] sm:$0xff]  ;;  %v1579_v10 = vld [vmem:[%s2534_s1 + $0x74] sm:$0xf]  ;;  %v1440_v19 = vor.u32 %v1662_v2, %v1439_v1  ;;  %v1577_v31 = vld [vmem:[%s2534_s1 + $0x64] sm:$0xf] }
  0x2d   :  { %895 = vmatpush.bf16.msrb.mxu1 %v1416_v7  ;;  %v1503_v7 = vld [vmem:[%s2534_s1 + $0x380] sm:$0xf]  ;;  %v1113_v11 = vld [vmem:[%s2534_s1 + $0x78] sm:$0xf0]  ;;  %v1595_v12 = vld [vmem:[%s2534_s1 + $0xf4] sm:$0xf]  ;;  %v170_v17 = vunpack.c.l.b16 %v31_v3  ;;  %v171_v25 = vunpack.c.h.b16 %v31_v3 }
  0x2e   :  { %908 = vmatpush.bf16.msrb.mxu2 %v1480_v8  ;;  %v1678_v8 = vld [vmem:[%s2534_s1 + $0x384] sm:$0xf0]  ;;  %v1611_v15 = vld [vmem:[%s2534_s1 + $0x174] sm:$0xf]  ;;  %v1241_v16 = vld [vmem:[%s2534_s1 + $0x178] sm:$0xf0]  ;;  %v1116_v27 = vor.u32 %v1579_v10, %v1113_v11 }
  0x2f   :  { %921 = vmatpush.bf16.msrb.mxu3 %v1544_v14  ;;  %v1177_v14 = vld [vmem:[%s2534_s1 + $0xf8] sm:$0xf0]  ;;  %v1504_v26 = vor.u32 %v1678_v8, %v1503_v7  ;;  %v1244_v30 = vor.u32 %v1611_v15, %v1241_v16  ;;  %v1105_v32 = vld [vmem:[%s2534_s1 + $0x68] sm:$0xf0]  ;;  %v1593_v33 = vld [vmem:[%s2534_s1 + $0xe4] sm:$0xf]  ;;  %v2163_v38 = vpack.c.b16 %v170_v17, %v170_v17  ;;  %v2173_v42 = vpack.c.b16 %v171_v25, %v171_v25 }
  0x30   :  { %883 = vmatpush.bf16.msrb.mxu0 %v1344_v22  ;;  %v1627_v22 = vld [vmem:[%s2534_s1 + $0x1f4] sm:$0xf]  ;;  %v1180_v29 = vor.u32 %v1595_v12, %v1177_v14  ;;  %v1233_v37 = vld [vmem:[%s2534_s1 + $0x168] sm:$0xf0]  ;;  %v1625_v39 = vld [vmem:[%s2534_s1 + $0x1e4] sm:$0xf]  ;;  %v1108_v43 = vor.u32 %v1577_v31, %v1105_v32 }
  0x31   :  { %896 = vmatpush.bf16.msrb.mxu1 %v1408_v23  ;;  %v1305_v23 = vld [vmem:[%s2534_s1 + $0x1f8] sm:$0xf0]  ;;  %v1591_v49 = vld [vmem:[%s2534_s1 + $0xd4] sm:$0xf]  ;;  %v1089_v60 = vld [vmem:[%s2534_s1 + $0x48] sm:$0xf0] }
  0x32   :  { %909 = vmatpush.bf16.msrb.mxu2 %v1472_v24  ;;  %v168_v24 = vunpack.c.l.b16 %v30_v9  ;;  %v1161_v51 = vld [vmem:[%s2534_s1 + $0xd8] sm:$0xf0]  ;;  %v1623_v54 = vld [vmem:[%s2534_s1 + $0x1d4] sm:$0xf]  ;;  %v1589_v61 = vld [vmem:[%s2534_s1 + $0xc4] sm:$0xf] }
  0x33   :  { %922 = vmatpush.bf16.msrb.mxu3 %v1536_v28  ;;  %v169_v28 = vunpack.c.h.b16 %v30_v9  ;;  %v1225_v53 = vld [vmem:[%s2534_s1 + $0x158] sm:$0xf0]  ;;  %v1164_v57 = vor.u32 %v1591_v49, %v1161_v51  ;;  %v1217_v1 = vld [vmem:[%s2534_s1 + $0x148] sm:$0xf0]  ;;  %v1621_v2 = vld [vmem:[%s2534_s1 + $0x1c4] sm:$0xf] }
  0x34   :  { %884 = vmatpush.bf16.msrb.mxu0 %v1336_v34  ;;  %v1308_v34 = vor.u32 %v1627_v22, %v1305_v23  ;;  %v2171_v41 = vpack.c.b16 %v168_v24, %v168_v24  ;;  %v1289_v55 = vld [vmem:[%s2534_s1 + $0x1d8] sm:$0xf0]  ;;  %v1281_v3 = vld [vmem:[%s2534_s1 + $0x1c8] sm:$0xf0]  ;;  %v1571_v9 = vld [vmem:[%s2534_s1 + $0x34] sm:$0xf] }
  0x35   :  { %897 = vmatpush.bf16.msrb.mxu1 %v1400_v35  ;;  %v1169_v35 = vld [vmem:[%s2534_s1 + $0xe8] sm:$0xf0]  ;;  %v2175_v44 = vpack.c.b16 %v169_v28, %v169_v28  ;;  %v1292_v62 = vor.u32 %v1623_v54, %v1289_v55  ;;  %v1081_v10 = vld [vmem:[%s2534_s1 + $0x38] sm:$0xf0]  ;;  %v1587_v11 = vld [vmem:[%s2534_s1 + $0xb4] sm:$0xf]  ;;  %v1284_v12 = vor.u32 %v1621_v2, %v1281_v3 }
  0x36   :  { %910 = vmatpush.bf16.msrb.mxu2 %v1464_v36  ;;  %v1609_v36 = vld [vmem:[%s2534_s1 + $0x164] sm:$0xf]  ;;  %v1172_v45 = vor.u32 %v1593_v33, %v1169_v35  ;;  %v1603_v14 = vld [vmem:[%s2534_s1 + $0x134] sm:$0xf]  ;;  %v1209_v15 = vld [vmem:[%s2534_s1 + $0x138] sm:$0xf0] }
  0x37   :  { %923 = vmatpush.bf16.msrb.mxu3 %v1528_v40  ;;  %v1297_v40 = vld [vmem:[%s2534_s1 + $0x1e8] sm:$0xf0]  ;;  %v1619_v16 = vld [vmem:[%s2534_s1 + $0x1b4] sm:$0xf]  ;;  %v1273_v17 = vld [vmem:[%s2534_s1 + $0x1b8] sm:$0xf0]  ;;  %v1212_v22 = vor.u32 %v1603_v14, %v1209_v15 }
  0x38   :  { %885 = vmatpush.bf16.msrb.mxu0 %v1328_v46  ;;  %v1236_v46 = vor.u32 %v1609_v36, %v1233_v37  ;;  %v1300_v50 = vor.u32 %v1625_v39, %v1297_v40  ;;  %v1569_v23 = vld [vmem:[%s2534_s1 + $0x24] sm:$0xf]  ;;  %v1073_v24 = vld [vmem:[%s2534_s1 + $0x28] sm:$0xf0]  ;;  %v1567_v35 = vld [vmem:[%s2534_s1 + $0x14] sm:$0xf] }
  0x39   :  { %898 = vmatpush.bf16.msrb.mxu1 %v1392_v47  ;;  %v1575_v47 = vld [vmem:[%s2534_s1 + $0x54] sm:$0xf]  ;;  %v1585_v25 = vld [vmem:[%s2534_s1 + $0xa4] sm:$0xf]  ;;  %v1265_v31 = vld [vmem:[%s2534_s1 + $0x1a8] sm:$0xf0]  ;;  %v1076_v32 = vor.u32 %v1569_v23, %v1073_v24 }
  0x3a   :  { %911 = vmatpush.bf16.msrb.mxu2 %v1456_v48  ;;  %v1097_v48 = vld [vmem:[%s2534_s1 + $0x58] sm:$0xf0]  ;;  %v1601_v28 = vld [vmem:[%s2534_s1 + $0x124] sm:$0xf]  ;;  %v1583_v37 = vld [vmem:[%s2534_s1 + $0x94] sm:$0xf] }
  0x3b   :  { %924 = vmatpush.bf16.msrb.mxu3 %v1520_v52  ;;  %v1607_v52 = vld [vmem:[%s2534_s1 + $0x154] sm:$0xf]  ;;  %v1100_v56 = vor.u32 %v1575_v47, %v1097_v48  ;;  %v1065_v36 = vld [vmem:[%s2534_s1 + $0x18] sm:$0xf0]  ;;  %v1565_v49 = vld [vmem:[%s2534_s1 + $0x4] sm:$0xf] }
  0x3c   :  { %886 = vmatpush.bf16.msrb.mxu0 %v1320_v59  ;;  %v1228_v58 = vor.u32 %v1607_v52, %v1225_v53  ;;  %v1573_v59 = vld [vmem:[%s2534_s1 + $0x44] sm:$0xf]  ;;  %v1129_v40 = vld [vmem:[%s2534_s1 + $0x98] sm:$0xf0]  ;;  %v1068_v48 = vor.u32 %v1567_v35, %v1065_v36  ;;  %v1121_v54 = vld [vmem:[%s2534_s1 + $0x88] sm:$0xf0] }
  0x3d   :  { %899 = vmatpush.bf16.msrb.mxu1 %v1384_v63  ;;  %v1153_v63 = vld [vmem:[%s2534_s1 + $0xc8] sm:$0xf0]  ;;  %v1257_v47 = vld [vmem:[%s2534_s1 + $0x198] sm:$0xf0]  ;;  %v1132_v51 = vor.u32 %v1583_v37, %v1129_v40  ;;  %v1581_v53 = vld [vmem:[%s2534_s1 + $0x84] sm:$0xf] }
  0x3e   :  { %912 = vmatpush.bf16.msrb.mxu2 %v1448_v0  ;;  %v1605_v0 = vld [vmem:[%s2534_s1 + $0x144] sm:$0xf]  ;;  %v1156_v7 = vor.u32 %v1589_v61, %v1153_v63  ;;  %v1369_v61 = vld [vmem:[%s2534_s1 + $0x278] sm:$0xf0]  ;;  %v1124_v3 = vor.u32 %v1581_v53, %v1121_v54  ;;  %v1361_v14 = vld [vmem:[%s2534_s1 + $0x268] sm:$0xf0] }
  0x3f   :  { %925 = vmatpush.bf16.msrb.mxu3 %v1512_v5  ;;  %v1092_v5 = vor.u32 %v1573_v59, %v1089_v60  ;;  %v1220_v8 = vor.u32 %v1605_v0, %v1217_v1  ;;  %v1597_v55 = vld [vmem:[%s2534_s1 + $0x104] sm:$0xf]  ;;  %v1249_v59 = vld [vmem:[%s2534_s1 + $0x188] sm:$0xf0]  ;;  %v1643_v60 = vld [vmem:[%s2534_s1 + $0x274] sm:$0xf] }
  0x40   :  { %887 = vmatpush.bf16.msrb.mxu0 %v1312_v13  ;;  %v1145_v13 = vld [vmem:[%s2534_s1 + $0xb8] sm:$0xf0]  ;;  %v1675_v1 = vld [vmem:[%s2534_s1 + $0x374] sm:$0xf]  ;;  %v1657_v15 = vld [vmem:[%s2534_s1 + $0x2e4] sm:$0xf] }
  0x41   :  { %900 = vmatpush.bf16.msrb.mxu1 %v1376_v18  ;;  %v1084_v18 = vor.u32 %v1571_v9, %v1081_v10  ;;  %v1433_v0 = vld [vmem:[%s2534_s1 + $0x2f8] sm:$0xf0]  ;;  %v1372_v10 = vor.u32 %v1643_v60, %v1369_v61  ;;  %v1553_v23 = vld [vmem:[%s2534_s1 + $0x3e8] sm:$0xf0]  ;;  %v1651_v53 = vld [vmem:[%s2534_s1 + $0x2b4] sm:$0xf] }
  0x42   :  { %913 = vmatpush.bf16.msrb.mxu2 %v1440_v19  ;;  %v1148_v19 = vor.u32 %v1587_v11, %v1145_v13  ;;  %v1497_v2 = vld [vmem:[%s2534_s1 + $0x378] sm:$0xf0]  ;;  %v1641_v13 = vld [vmem:[%s2534_s1 + $0x264] sm:$0xf]  ;;  %v1345_v40 = vld [vmem:[%s2534_s1 + $0x248] sm:$0xf0] }
  0x43   :  { %926 = vmatpush.bf16.msrb.mxu3 %v1504_v26  ;;  %888 = vmatmul.bf16.vlgmr.msrb.gmra.mxu0 %v2171_v41  ;;  %v1276_v26 = vor.u32 %v1619_v16, %v1273_v17  ;;  %v1425_v17 = vld [vmem:[%s2534_s1 + $0x2e8] sm:$0xf0]  ;;  %v1364_v24 = vor.u32 %v1641_v13, %v1361_v14  ;;  %v1631_v13 = vld [vmem:[%s2534_s1 + $0x214] sm:$0xf]  ;;  %v1321_v14 = vld [vmem:[%s2534_s1 + $0x218] sm:$0xf0] }
  0x44   :  { %932 = vmatpush.bf16.msra.mxu0 %v1116_v27  ;;  %901 = vmatmul.bf16.vlgmr.msrb.gmra.mxu1 %v2175_v44  ;;  %v1137_v27 = vld [vmem:[%s2534_s1 + $0xa8] sm:$0xf0] }
  0x45   :  { %945 = vmatpush.bf16.msra.mxu1 %v1180_v29  ;;  %914 = vmatmul.bf16.vlgmr.msrb.gmra.mxu2 %v2163_v38  ;;  %v1201_v29 = vld [vmem:[%s2534_s1 + $0x128] sm:$0xf0]  ;;  %v1140_v33 = vor.u32 %v1585_v25, %v1137_v27  ;;  %v1428_v25 = vor.u32 %v1657_v15, %v1425_v17  ;;  %v1639_v27 = vld [vmem:[%s2534_s1 + $0x254] sm:$0xf]  ;;  %v1385_v17 = vld [vmem:[%s2534_s1 + $0x298] sm:$0xf0] }
  0x46   :  { %958 = vmatpush.bf16.msra.mxu2 %v1244_v30  ;;  %927 = vmatmul.bf16.vlgmr.msrb.gmra.mxu3 %v2173_v42  ;;  %v1617_v30 = vld [vmem:[%s2534_s1 + $0x1a4] sm:$0xf]  ;;  %v1647_v15 = vld [vmem:[%s2534_s1 + $0x294] sm:$0xf] }
  0x47   :  { %971 = vmatpush.bf16.msra.mxu3 %v1308_v34  ;;  %v1204_v34 = vor.u32 %v1601_v28, %v1201_v29  ;;  %v1268_v39 = vor.u32 %v1617_v30, %v1265_v31  ;;  %v1353_v28 = vld [vmem:[%s2534_s1 + $0x258] sm:$0xf0]  ;;  %v1655_v29 = vld [vmem:[%s2534_s1 + $0x2d4] sm:$0xf] }
  0x48   :  { %933 = vmatpush.bf16.msra.mxu0 %v1108_v43  ;;  %v1599_v43 = vld [vmem:[%s2534_s1 + $0x114] sm:$0xf]  ;;  %v1417_v31 = vld [vmem:[%s2534_s1 + $0x2d8] sm:$0xf0]  ;;  %v1356_v35 = vor.u32 %v1639_v27, %v1353_v28  ;;  %v1629_v27 = vld [vmem:[%s2534_s1 + $0x204] sm:$0xf] }
  0x49   :  { %946 = vmatpush.bf16.msra.mxu1 %v1172_v45  ;;  %v1193_v45 = vld [vmem:[%s2534_s1 + $0x118] sm:$0xf0]  ;;  %v1420_v36 = vor.u32 %v1655_v29, %v1417_v31  ;;  %v1313_v28 = vld [vmem:[%s2534_s1 + $0x208] sm:$0xf0]  ;;  %v1645_v29 = vld [vmem:[%s2534_s1 + $0x284] sm:$0xf] }
  0x4a   :  { %959 = vmatpush.bf16.msra.mxu2 %v1236_v46  ;;  %v1615_v46 = vld [vmem:[%s2534_s1 + $0x194] sm:$0xf]  ;;  %v1196_v52 = vor.u32 %v1599_v43, %v1193_v45  ;;  %v1669_v43 = vld [vmem:[%s2534_s1 + $0x344] sm:$0xf]  ;;  %v1473_v45 = vld [vmem:[%s2534_s1 + $0x348] sm:$0xf0] }
  0x4b   :  { %972 = vmatpush.bf16.msra.mxu3 %v1300_v50  ;;  %v1057_v50 = vld [vmem:[%s2534_s1 + $0x8] sm:$0xf0] }
  0x4c   :  { %934 = vmatpush.bf16.msra.mxu0 %v1100_v56  ;;  %v1260_v56 = vor.u32 %v1615_v46, %v1257_v47  ;;  %v1060_v63 = vor.u32 %v1565_v49, %v1057_v50  ;;  %v1685_v46 = vld [vmem:[%s2534_s1 + $0x3c4] sm:$0xf]  ;;  %v1537_v47 = vld [vmem:[%s2534_s1 + $0x3c8] sm:$0xf0]  ;;  %v1476_v50 = vor.u32 %v1669_v43, %v1473_v45 }
  0x4d   :  { %947 = vmatpush.bf16.msra.mxu1 %v1164_v57  ;;  %v1185_v57 = vld [vmem:[%s2534_s1 + $0x108] sm:$0xf0]  ;;  %v1540_v54 = vor.u32 %v1685_v46, %v1537_v47 }
  0x4e   :  { %960 = vmatpush.bf16.msra.mxu2 %v1228_v58  ;;  %v1613_v58 = vld [vmem:[%s2534_s1 + $0x184] sm:$0xf]  ;;  %v1377_v31 = vld [vmem:[%s2534_s1 + $0x288] sm:$0xf0] }
  0x4f   :  { %973 = vmatpush.bf16.msra.mxu3 %v1292_v62  ;;  %v1659_v62 = vld [vmem:[%s2534_s1 + $0x2f4] sm:$0xf]  ;;  %v1252_v9 = vor.u32 %v1613_v58, %v1249_v59  ;;  %v1529_v59 = vld [vmem:[%s2534_s1 + $0x3b8] sm:$0xf0] }
  0x50   :  { %935 = vmatpush.bf16.msra.mxu0 %v1092_v5  ;;  %v1188_v5 = vor.u32 %v1597_v55, %v1185_v57  ;;  %v1436_v11 = vor.u32 %v1659_v62, %v1433_v0  ;;  %v1401_v55 = vld [vmem:[%s2534_s1 + $0x2b8] sm:$0xf0]  ;;  %v1683_v58 = vld [vmem:[%s2534_s1 + $0x3b4] sm:$0xf]  ;;  %v1329_v0 = vld [vmem:[%s2534_s1 + $0x228] sm:$0xf0] }
  0x51   :  { %948 = vmatpush.bf16.msra.mxu1 %v1156_v7  ;;  %v1691_v7 = vld [vmem:[%s2534_s1 + $0x3f4] sm:$0xf]  ;;  %v1465_v57 = vld [vmem:[%s2534_s1 + $0x338] sm:$0xf0]  ;;  %v1404_v61 = vor.u32 %v1651_v53, %v1401_v55 }
  0x52   :  { %961 = vmatpush.bf16.msra.mxu2 %v1220_v8  ;;  %v1561_v8 = vld [vmem:[%s2534_s1 + $0x3f8] sm:$0xf0] }
  0x53   :  { %974 = vmatpush.bf16.msra.mxu3 %v1284_v12  ;;  %v1500_v12 = vor.u32 %v1675_v1, %v1497_v2  ;;  %v1564_v16 = vor.u32 %v1691_v7, %v1561_v8  ;;  %v1649_v1 = vld [vmem:[%s2534_s1 + $0x2a4] sm:$0xf]  ;;  %v1532_v2 = vor.u32 %v1683_v58, %v1529_v59  ;;  %v1457_v7 = vld [vmem:[%s2534_s1 + $0x328] sm:$0xf0] }
  0x54   :  { %936 = vmatpush.bf16.msra.mxu0 %v1084_v18  ;;  %v1673_v18 = vld [vmem:[%s2534_s1 + $0x364] sm:$0xf] }
  0x55   :  { %949 = vmatpush.bf16.msra.mxu1 %v1148_v19  ;;  %v1489_v19 = vld [vmem:[%s2534_s1 + $0x368] sm:$0xf0]  ;;  %v1681_v8 = vld [vmem:[%s2534_s1 + $0x3a4] sm:$0xf] }
  0x56   :  { %962 = vmatpush.bf16.msra.mxu2 %v1212_v22  ;;  %v1689_v22 = vld [vmem:[%s2534_s1 + $0x3e4] sm:$0xf] }
  0x57   :  { %975 = vmatpush.bf16.msra.mxu3 %v1276_v26  ;;  %v1492_v26 = vor.u32 %v1673_v18, %v1489_v19  ;;  %v1556_v30 = vor.u32 %v1689_v22, %v1553_v23  ;;  %v1663_v18 = vld [vmem:[%s2534_s1 + $0x314] sm:$0xf]  ;;  %v1449_v19 = vld [vmem:[%s2534_s1 + $0x318] sm:$0xf0] }
  0x58   :  { %937 = vmatpush.bf16.msra.mxu0 %v1076_v32  ;;  %v1671_v32 = vld [vmem:[%s2534_s1 + $0x354] sm:$0xf]  ;;  %v1513_v23 = vld [vmem:[%s2534_s1 + $0x398] sm:$0xf0] }
  0x59   :  { %950 = vmatpush.bf16.msra.mxu1 %v1140_v33  ;;  %v1481_v33 = vld [vmem:[%s2534_s1 + $0x358] sm:$0xf0]  ;;  %v1679_v22 = vld [vmem:[%s2534_s1 + $0x394] sm:$0xf] }
  0x5a   :  { %963 = vmatpush.bf16.msra.mxu2 %v1204_v34  ;;  %v1687_v34 = vld [vmem:[%s2534_s1 + $0x3d4] sm:$0xf]  ;;  %v1484_v37 = vor.u32 %v1671_v32, %v1481_v33  ;;  %v1661_v32 = vld [vmem:[%s2534_s1 + $0x304] sm:$0xf]  ;;  %v1441_v33 = vld [vmem:[%s2534_s1 + $0x308] sm:$0xf0] }
  0x5b   :  { %976 = vmatpush.bf16.msra.mxu3 %v1268_v39  ;;  %v1637_v39 = vld [vmem:[%s2534_s1 + $0x244] sm:$0xf] }
  0x5c   :  { %938 = vmatpush.bf16.msra.mxu0 %v1068_v48  ;;  %v1348_v48 = vor.u32 %v1637_v39, %v1345_v40 }
  0x5d   :  { %951 = vmatpush.bf16.msra.mxu1 %v1132_v51  ;;  %v1635_v51 = vld [vmem:[%s2534_s1 + $0x234] sm:$0xf] }
  0x5e   :  { %964 = vmatpush.bf16.msra.mxu2 %v1196_v52  ;;  %v1337_v52 = vld [vmem:[%s2534_s1 + $0x238] sm:$0xf0] }
  0x5f   :  { %977 = vmatpush.bf16.msra.mxu3 %v1260_v56  ;;  %v1667_v56 = vld [vmem:[%s2534_s1 + $0x334] sm:$0xf]  ;;  %v1340_v60 = vor.u32 %v1635_v51, %v1337_v52 }
  0x60   :  { %939 = vmatpush.bf16.msra.mxu0 %v1060_v63  ;;  %v1468_v62 = vor.u32 %v1667_v56, %v1465_v57  ;;  %v1633_v63 = vld [vmem:[%s2534_s1 + $0x224] sm:$0xf] }
  0x61   :  { %952 = vmatpush.bf16.msra.mxu1 %v1124_v3  ;;  %v1393_v3 = vld [vmem:[%s2534_s1 + $0x2a8] sm:$0xf0] }
  0x62   :  { %965 = vmatpush.bf16.msra.mxu2 %v1188_v5  ;;  %v1665_v5 = vld [vmem:[%s2534_s1 + $0x324] sm:$0xf] }
  0x63   :  { %978 = vmatpush.bf16.msra.mxu3 %v1252_v9  ;;  %940 = vmatmul.bf16.vlgmr.msra.gmra.mxu0 %v2012_v20  ;;  %v1521_v9 = vld [vmem:[%s2534_s1 + $0x3a8] sm:$0xf0] }
  0x64   :  { %984 = vmatpush.bf16.msrb.mxu0 %v1372_v10  ;;  %953 = vmatmul.bf16.vlgmr.msra.gmra.mxu1 %v2015_v21  ;;  %v1409_v21 = vld [vmem:[%s2534_s1 + $0x2c8] sm:$0xf0]  ;;  %v1332_v10 = vor.u32 %v1633_v63, %v1329_v0 }
  0x65   :  { %997 = vmatpush.bf16.msrb.mxu1 %v1436_v11  ;;  %966 = vmatmul.bf16.vlgmr.msra.gmra.mxu2 %v1980_v4  ;;  %v1545_v4 = vld [vmem:[%s2534_s1 + $0x3d8] sm:$0xf0]  ;;  %v1396_v11 = vor.u32 %v1649_v1, %v1393_v3 }
  0x66   :  { %1010 = vmatpush.bf16.msrb.mxu2 %v1500_v12  ;;  %979 = vmatmul.bf16.vlgmr.msra.gmra.mxu3 %v1985_v6  ;;  %v1653_v6 = vld [vmem:[%s2534_s1 + $0x2c4] sm:$0xf]  ;;  %v1548_v20 = vor.u32 %v1687_v34, %v1545_v4  ;;  %v1460_v12 = vor.u32 %v1665_v5, %v1457_v7  ;;  %v1505_v4 = vld [vmem:[%s2534_s1 + $0x388] sm:$0xf0] }
  0x67   :  { %1023 = vmatpush.bf16.msrb.mxu3 %v1564_v16  ;;  %v1412_v49 = vor.u32 %v1653_v6, %v1409_v21  ;;  %v1524_v16 = vor.u32 %v1681_v8, %v1521_v9  ;;  %v1677_v34 = vld [vmem:[%s2534_s1 + $0x384] sm:$0xf] }
  0x68   :  { %985 = vmatpush.bf16.msrb.mxu0 %v1364_v24  ;;  %v1324_v24 = vor.u32 %v1631_v13, %v1321_v14  ;;  %v1508_v39 = vor.u32 %v1677_v34, %v1505_v4 }
  0x69   :  { %998 = vmatpush.bf16.msrb.mxu1 %v1428_v25  ;;  %v1388_v25 = vor.u32 %v1647_v15, %v1385_v17 }
  0x6a   :  { %1011 = vmatpush.bf16.msrb.mxu2 %v1492_v26  ;;  %v1452_v26 = vor.u32 %v1663_v18, %v1449_v19 }
  0x6b   :  { %1024 = vmatpush.bf16.msrb.mxu3 %v1556_v30  ;;  %v1516_v30 = vor.u32 %v1679_v22, %v1513_v23 }
  0x6c   :  { %986 = vmatpush.bf16.msrb.mxu0 %v1356_v35  ;;  %v1316_v35 = vor.u32 %v1629_v27, %v1313_v28 }
  0x6d   :  { %999 = vmatpush.bf16.msrb.mxu1 %v1420_v36  ;;  %v1380_v36 = vor.u32 %v1645_v29, %v1377_v31 }
  0x6e   :  { %1012 = vmatpush.bf16.msrb.mxu2 %v1484_v37  ;;  %v1444_v37 = vor.u32 %v1661_v32, %v1441_v33 }
  0x6f   :  { %1025 = vmatpush.bf16.msrb.mxu3 %v1548_v20 }
  0x70   :  { %987 = vmatpush.bf16.msrb.mxu0 %v1348_v48 }
  0x71   :  { %1000 = vmatpush.bf16.msrb.mxu1 %v1412_v49 }
  0x72   :  { %1013 = vmatpush.bf16.msrb.mxu2 %v1476_v50 }
  0x73   :  { %1026 = vmatpush.bf16.msrb.mxu3 %v1540_v54 }
  0x74   :  { %988 = vmatpush.bf16.msrb.mxu0 %v1340_v60 }
  0x75   :  { %1001 = vmatpush.bf16.msrb.mxu1 %v1404_v61 }
  0x76   :  { %1014 = vmatpush.bf16.msrb.mxu2 %v1468_v62 }
  0x77   :  { %1027 = vmatpush.bf16.msrb.mxu3 %v1532_v2 }
  0x78   :  { %989 = vmatpush.bf16.msrb.mxu0 %v1332_v10 }
  0x79   :  { %1002 = vmatpush.bf16.msrb.mxu1 %v1396_v11 }
  0x7a   :  { %1015 = vmatpush.bf16.msrb.mxu2 %v1460_v12 }
  0x7b   :  { %1028 = vmatpush.bf16.msrb.mxu3 %v1524_v16 }
  0x7c   :  { %990 = vmatpush.bf16.msrb.mxu0 %v1324_v24 }
  0x7d   :  { %1003 = vmatpush.bf16.msrb.mxu1 %v1388_v25 }
  0x7e   :  { %1016 = vmatpush.bf16.msrb.mxu2 %v1452_v26 }
  0x7f   :  { %1029 = vmatpush.bf16.msrb.mxu3 %v1516_v30 }
  0x80   :  { %991 = vmatpush.bf16.msrb.mxu0 %v1316_v35 }
  0x81   :  { %1004 = vmatpush.bf16.msrb.mxu1 %v1380_v36 }
  0x82   :  { %1017 = vmatpush.bf16.msrb.mxu2 %v1444_v37 }
  0x83   :  { %1030 = vmatpush.bf16.msrb.mxu3 %v1508_v39  ;;  %992 = vmatmul.bf16.vlgmr.msrb.gmra.mxu0 %v2171_v41 }
  0x84   :  { %1005 = vmatmul.bf16.vlgmr.msrb.gmra.mxu1 %v2175_v44 }
  0x85   :  { %1018 = vmatmul.bf16.vlgmr.msrb.gmra.mxu2 %v2163_v38  ;;  %v18_v38 = vld [vmem:[%s2536_s2] sm:$0x3] }
  0x86   :  { %1031 = vmatmul.bf16.vlgmr.msrb.gmra.mxu3 %v2173_v42  ;;  %v20_v54 = vperm.slane %v18_v38, 0  ;;  %v21_v18 = vperm.slane %v18_v38, 1 }
  0xa0   :  { %v837_v40 = vpop.f32.mrf.mxu0 }
  0xa1   :  { %v850_v6 = vpop.f32.mrf.mxu1 }
  0xa2   :  { %v851_v48 = vadd.f32 %v850_v6, %v837_v40 }
  0xa8   :  { %v863_v20 = vpop.f32.mrf.mxu2  ;;  %v839_v43 = vpop.f32.mrf.mxu0 }
  0xa9   :  { %v876_v21 = vpop.f32.mrf.mxu3  ;;  %v852_v45 = vpop.f32.mrf.mxu1  ;;  %v864_v49 = vadd.f32 %v863_v20, %v851_v48 }
  0xab   :  { %v877_v50 = vadd.f32 %v876_v21, %v864_v49 }
  0xb0   :  { %v865_v46 = vpop.f32.mrf.mxu2 }
  0xb1   :  { %v878_v47 = vpop.f32.mrf.mxu3 }
  0xc0   :  { %v889_v51 = vpop.f32.mrf.mxu0 }
  0xc1   :  { %v890_v52 = vadd.f32 %v889_v51, %v877_v50  ;;  %v902_v41 = vpop.f32.mrf.mxu1 }
  0xc3   :  { %v903_v53 = vadd.f32 %v902_v41, %v890_v52 }
  0xc8   :  { %v915_v42 = vpop.f32.mrf.mxu2  ;;  %v891_v57 = vpop.f32.mrf.mxu0 }
  0xc9   :  { %v916_v44 = vadd.f32 %v915_v42, %v903_v53  ;;  %v928_v55 = vpop.f32.mrf.mxu3  ;;  %v904_v58 = vpop.f32.mrf.mxu1 }
  0xcb   :  { %v929_v56 = vadd.f32 %v928_v55, %v916_v44 }
  0xcd   :  { %v1036_v59 = vadd.f32 %v929_v56, %v20_v54 }
  0xcf   :  { %v1045_v60 = vmax.f32 %v1036_v59, 0.0 }
  0xd0   :  { %v917_v61 = vpop.f32.mrf.mxu2 }
  0xd1   :  { %1047 = vst [vmem:[%s2537_s3] sm:$0xff] %v1045_v60  ;;  %v930_v62 = vpop.f32.mrf.mxu3 }
  0xe0   :  { %v941_v63 = vpop.f32.mrf.mxu0 }
  0xe1   :  { %v954_v0 = vpop.f32.mrf.mxu1 }
  0xe2   :  { %v955_v9 = vadd.f32 %v954_v0, %v941_v63 }
  0xe8   :  { %v967_v1 = vpop.f32.mrf.mxu2  ;;  %v943_v3 = vpop.f32.mrf.mxu0 }
  0xe9   :  { %v980_v2 = vpop.f32.mrf.mxu3  ;;  %v956_v5 = vpop.f32.mrf.mxu1  ;;  %v968_v10 = vadd.f32 %v967_v1, %v955_v9 }
  0xeb   :  { %v981_v11 = vadd.f32 %v980_v2, %v968_v10 }
  0xf0   :  { %v969_v7 = vpop.f32.mrf.mxu2 }
  0xf1   :  { %v982_v8 = vpop.f32.mrf.mxu3 }
 0x100   :  { %v993_v12 = vpop.f32.mrf.mxu0 }
 0x101   :  { %v1006_v13 = vpop.f32.mrf.mxu1  ;;  %v994_v14 = vadd.f32 %v993_v12, %v981_v11 }
 0x103   :  { %v1007_v15 = vadd.f32 %v1006_v13, %v994_v14 }
 0x108   :  { %v1019_v16 = vpop.f32.mrf.mxu2  ;;  %v995_v22 = vpop.f32.mrf.mxu0 }
 0x109   :  { %v1020_v17 = vadd.f32 %v1019_v16, %v1007_v15  ;;  %v1032_v19 = vpop.f32.mrf.mxu3  ;;  %v1008_v23 = vpop.f32.mrf.mxu1 }
 0x10b   :  { %v1033_v24 = vadd.f32 %v1032_v19, %v1020_v17 }
 0x10d   :  { %v1037_v25 = vadd.f32 %v1033_v24, %v21_v18 }
 0x10f   :  { %v1046_v26 = vmax.f32 %v1037_v25, 0.0 }
 0x110   :  { %v1021_v27 = vpop.f32.mrf.mxu2 }
 0x111   :  { %1048 = vst [vmem:[%s2537_s3 + $0x8] sm:$0xff] %v1046_v26  ;;  %v1034_v28 = vpop.f32.mrf.mxu3 }

// kernel: bilinear_cnn_forward.21
= control target key start
LH: loop header
LB: loop body
LE: loop exit
PB: predicated region body
PF: predicated region fallthrough
CT: control target
= control target key end

     0   :  { %s202_s1 = inlined_call_operand.vmem [shape: bf16[128,128], index: 1, kind: input, shape index: {}]   ;;  %s203_s2 = inlined_call_operand.vmem [shape: f32[1,128], index: 2, kind: input, shape index: {}]   ;;  %s204_s0 = inlined_call_operand.vmem [shape: bf16[8,128], index: 0, kind: input, shape index: {}]   ;;  %s205_s3 = inlined_call_operand.vmem [shape: f32[8,128], index: 3, kind: output, shape index: {}]  }
   0x1   :  { %v147_v0 = vld [vmem:[%s202_s1 + $0x38] sm:$0xff]  ;;  %v146_v1 = vld [vmem:[%s202_s1 + $0x30] sm:$0xff]  ;;  %v145_v2 = vld [vmem:[%s202_s1 + $0x28] sm:$0xff] }
   0x2   :  { %89 = vmatpush.bf16.msra.mxu0 %v147_v0  ;;  %v144_v3 = vld [vmem:[%s202_s1 + $0x20] sm:$0xff]  ;;  %v143_v4 = vld [vmem:[%s202_s1 + $0x18] sm:$0xff]  ;;  %v142_v5 = vld [vmem:[%s202_s1 + $0x10] sm:$0xff] }
   0x3   :  { %v141_v6 = vld [vmem:[%s202_s1 + $0x8] sm:$0xff]  ;;  %v140_v7 = vld [vmem:[%s202_s1] sm:$0xff] }
   0x4   :  { %v24_v8 = vld [vmem:[%s204_s0] sm:$0xf] }
   0x5   :  { %v148_v9 = vld [vmem:[%s203_s2] ss:$0 sm:$0xff] }
   0x6   :  { %90 = vmatpush.bf16.msra.mxu0 %v146_v1 }
   0xa   :  { %91 = vmatpush.bf16.msra.mxu0 %v145_v2 }
   0xe   :  { %92 = vmatpush.bf16.msra.mxu0 %v144_v3 }
  0x12   :  { %93 = vmatpush.bf16.msra.mxu0 %v143_v4 }
  0x16   :  { %94 = vmatpush.bf16.msra.mxu0 %v142_v5 }
  0x1a   :  { %95 = vmatpush.bf16.msra.mxu0 %v141_v6 }
  0x1e   :  { %96 = vmatpush.bf16.msra.mxu0 %v140_v7 }
  0x21   :  { %97 = vmatmul.bf16.vlgmr.msra.gmra.mxu0 %v24_v8 }
  0x9e   :  { %v98_v10 = vpop.f32.mrf.mxu0 }
  0x9f   :  { %v102_v11 = vadd.f32 %v148_v9, %v98_v10 }
  0xa1   :  { %103 = vst [vmem:[%s205_s3] sm:$0xff] %v102_v11 }
  0xa6   :  { %v100_v12 = vpop.f32.mrf.mxu0 }

</bundles_post_ra>
